<compile_context>
chip_gen: v5e
topology: v5e:2x2
jax: 0.10.0
libtpu: 0.0.40
codegen_flags: <defaults>
</compile_context>

<pallas_src>
import functools

import numpy as np
import jax
import jax.numpy as jnp
from jax import lax
from jax.experimental import pallas as pl
from jax.experimental.pallas import tpu as pltpu


def _round_up(x, m):
    return (x + m - 1) // m * m


# ----------------------------------------------------------------------------
# The fused Pallas kernel.
# ----------------------------------------------------------------------------
def _capsules_kernel(p1_ref, w1_ref, b1_ref, g_ref, w2_ref, b2c_ref, wrt_ref,
                     rt_ref, rr_ref, o_ref, *, rn, in_d, out_d, J, iters, eps):
    B = g_ref.shape[1]
    N = g_ref.shape[2]
    JD = J * out_d

    # ---- conv1: one MXU matmul + bias + ReLU --------------------------------
    y1 = jnp.dot(p1_ref[...], w1_ref[...], preferred_element_type=jnp.float32)
    y1 = jnp.maximum(y1 + b1_ref[...], 0.0)                     # (M1p, C1)

    # ---- conv2 (+ capsule view/permute) via one-hot gather matmuls ----------
    # caps[b, n, d] accumulated over 2 kernel rows x rn channel groups.
    caps = jnp.broadcast_to(b2c_ref[...][None, :, :], (B, N, in_d))
    for kh in range(2):
        for r in range(rn):
            q = kh * rn + r
            ywq = jnp.dot(y1, w2_ref[kh, r],
                          preferred_element_type=jnp.float32)   # (M1p, in_d)
            ywq_b = jnp.broadcast_to(ywq[None, :, :], (B,) + ywq.shape)
            caps = caps + jnp.einsum('bnm,bmd->bnd', g_ref[q], ywq_b,
                                     preferred_element_type=jnp.float32)

    # ---- u_hat[b, i, j*out_d+m] = sum_d caps[b, i, d] * w[i, j, d, m] -------
    u2 = caps[:, :, 0:1] * wrt_ref[0][None, :, :]
    for d in range(1, in_d):
        u2 = u2 + caps[:, :, d:d + 1] * wrt_ref[d][None, :, :]  # (B, N, JD)

    # label <-> lane-block expand / reduce indicators (hoisted broadcasts).
    rt = rt_ref[...]                                            # (J, JD)
    rr = rr_ref[...]                                            # (JD, J)
    rt_b = jnp.broadcast_to(rt[None, :, :], (B, J, JD))
    rr_b = jnp.broadcast_to(rr[None, :, :], (B, JD, J))

    # ---- dynamic routing: vectorized over (b, i, j); loop only over iters ----
    bb = None                                                   # routing logits
    v_flat = None
    for it in range(iters):
        if it == 0:
            # logits are all zero => coupling is exactly uniform => plain mean.
            s_flat = jnp.mean(u2, axis=1)                       # (B, JD)
        else:
            m = jnp.max(bb, axis=1, keepdims=True)              # softmax over capsules
            e = jnp.exp(bb - m)
            z = jnp.sum(e, axis=1, keepdims=True)
            c = e * pl.reciprocal(z, approx=True)               # (B, N, J)
            cexp = jnp.einsum('bnj,bjk->bnk', c, rt_b,
                              preferred_element_type=jnp.float32)  # (B, N, JD)
            s_flat = jnp.sum(cexp * u2, axis=1)                 # (B, JD)
        # squash (per label block of out_d lanes)
        s2 = jnp.dot(s_flat * s_flat, rr,
                     preferred_element_type=jnp.float32)        # (B, J)
        s2e = jnp.dot(s2, rt, preferred_element_type=jnp.float32)  # (B, JD)
        scale = s2e * lax.rsqrt(s2e + eps) * pl.reciprocal(1.0 + s2e, approx=True)
        v_flat = s_flat * scale                                 # squashed v
        if it + 1 < iters:                                      # last `a` is unused
            a = jnp.einsum('bnk,bkj->bnj', u2 * v_flat[:, None, :], rr_b,
                           preferred_element_type=jnp.float32)  # (B, N, J)
            bb = a if bb is None else bb + a

    # ---- (v ** 2).sum(-1): single dense (B, J) store -------------------------
    o_ref[...] = jnp.dot(v_flat * v_flat, rr, preferred_element_type=jnp.float32)


# ----------------------------------------------------------------------------
# One-hot gather matrices for conv2 (stride 2, padding p, kernel (2, 1)) fused
# with the capsule row ordering n = r*H2*W2 + h*W2 + w.  Static, built once.
# ----------------------------------------------------------------------------
def _conv2_gather(B, H1, W1, H2, W2, rn, pad, rows_pad):
    g = np.zeros((2 * rn, B, rn * H2 * W2, rows_pad), np.float32)
    for kh in range(2):
        for r in range(rn):
            q = kh * rn + r
            for b in range(B):
                for oh in range(H2):
                    for ow in range(W2):
                        h1 = 2 * oh + kh - pad
                        w1 = 2 * ow - pad
                        if 0 <= h1 < H1 and 0 <= w1 < W1:
                            n = r * H2 * W2 + oh * W2 + ow
                            g[q, b, n, b * H1 * W1 + h1 * W1 + w1] = 1.0
    return jnp.asarray(g)


# ----------------------------------------------------------------------------
# Full forward pass (glue: embedding gather, conv1 im2col prep, weight layout).
# ----------------------------------------------------------------------------
def capsules_forward(data, params, cfg):
    p = cfg['pad_size']
    in_d, out_d = cfg['in_d'], cfg['out_d']
    rn, J = cfg['reshape_num'], cfg['nums_label']
    E = cfg['embedding_size']
    iters = cfg['iter']
    if iters < 1:
        raise ValueError("dynamic routing needs at least one iteration")

    # TODO(synk): embedding lookup is a data-dependent gather; kept as an XLA op.
    emb = params['embedding'][data]                      # (B, L, E)
    B, L, _ = emb.shape
    C1 = params['conv1_w'].shape[0]                      # 256

    H1 = L + 2 * p - 2 + 1                               # conv1 out height
    W1 = 2 * p + 1                                       # conv1 out width
    H2 = (H1 + 2 * p - 2) // 2 + 1                       # conv2 out height
    W2 = (W1 + 2 * p - 1) // 2 + 1                       # conv2 out width
    M1, K1 = B * H1 * W1, 2 * E
    M1p, K1p = _round_up(M1, 8), _round_up(K1, 128)      # MXU-friendly padding
    N, JD = rn * H2 * W2, J * out_d

    # conv1 im2col (tiny XLA input prep; rows ordered (b, oh, ow)).
    xp = jnp.pad(emb, ((0, 0), (p, p), (p, p)))
    cols = []
    for kh in range(2):
        per_ow = [xp[:, kh:kh + H1, ow:ow + E] for ow in range(W1)]
        cols.append(jnp.stack(per_ow, axis=2))           # (B, H1, W1, E)
    patches1 = jnp.concatenate(cols, axis=-1).reshape(M1, K1)
    patches1 = jnp.pad(patches1, ((0, M1p - M1), (0, K1p - K1)))

    # Weight / constant layout prep (independent of the data values).
    w1m = jnp.pad(params['conv1_w'].reshape(C1, K1).T, ((0, K1p - K1), (0, 0)))
    b1 = params['conv1_b'].reshape(1, C1)
    g = _conv2_gather(B, H1, W1, H2, W2, rn, p, M1p)     # (2*rn, B, N, M1p)
    # w2r[kh, r, c, d] = conv2_w[d*rn + r, c, kh, 0]
    w2r = params['conv2_w'][..., 0].reshape(in_d, rn, C1, 2).transpose(3, 1, 2, 0)
    # per-capsule conv2 bias, rows n = r*H2*W2 + hw
    b2c = jnp.repeat(params['conv2_b'].reshape(in_d, rn).T, H2 * W2, axis=0)
    # wrt[d, i, j*out_d + m] = router_w[i, j, d, m]
    wrt = params['router_w'].transpose(2, 0, 1, 3).reshape(in_d, N, JD)
    # label <-> lane-block indicators
    rt = jnp.repeat(jnp.eye(J, dtype=jnp.float32), out_d, axis=1)   # (J, JD)
    rr = rt.T                                                       # (JD, J)

    kern = functools.partial(_capsules_kernel, rn=rn, in_d=in_d, out_d=out_d,
                             J=J, iters=iters, eps=1e-8)
    return pl.pallas_call(
        kern,
        out_shape=jax.ShapeDtypeStruct((B, J), jnp.float32),
        grid=(1,),
        in_specs=[
            pl.BlockSpec((M1p, K1p), lambda i: (0, 0)),
            pl.BlockSpec((K1p, C1), lambda i: (0, 0)),
            pl.BlockSpec((1, C1), lambda i: (0, 0)),
            pl.BlockSpec((2 * rn, B, N, M1p), lambda i: (0, 0, 0, 0)),
            pl.BlockSpec((2, rn, C1, in_d), lambda i: (0, 0, 0, 0)),
            pl.BlockSpec((N, in_d), lambda i: (0, 0)),
            pl.BlockSpec((in_d, N, JD), lambda i: (0, 0, 0)),
            pl.BlockSpec((J, JD), lambda i: (0, 0)),
            pl.BlockSpec((JD, J), lambda i: (0, 0)),
        ],
        out_specs=pl.BlockSpec((B, J), lambda i: (0, 0)),
        compiler_params=pltpu.CompilerParams(
            dimension_semantics=("arbitrary",)),
    )(patches1, w1m, b1, g, w2r, b2c, wrt, rt, rr)


# ----------------------------------------------------------------------------
# Deterministic parameter init (shapes from module __init__; Router.w is created
# with torch.randn inside forward -> made a deterministic parameter here).
# ----------------------------------------------------------------------------
def init_params(key, cfg, num_caps):
    keys = jax.random.split(key, 6)
    E = cfg['embedding_size']
    C2 = cfg['reshape_num'] * cfg['in_d']
    emb = jax.random.normal(keys[0], (cfg['vocab_size'], E), jnp.float32)
    emb = emb.at[cfg['vocab_size'] - 1].set(0.0)          # padding_idx row = 0
    return {
        'embedding': emb,
        'conv1_w': 0.1 * jax.random.normal(keys[1], (256, 1, 2, E), jnp.float32),
        'conv1_b': 0.1 * jax.random.normal(keys[2], (256,), jnp.float32),
        'conv2_w': 0.1 * jax.random.normal(keys[3], (C2, 256, 2, 1), jnp.float32),
        'conv2_b': 0.1 * jax.random.normal(keys[4], (C2,), jnp.float32),
        'router_w': jax.random.normal(
            keys[5], (num_caps, cfg['nums_label'], cfg['in_d'], cfg['out_d']),
            jnp.float32),
    }


# ----------------------------------------------------------------------------
# Pure-JAX reference (correctness check of the Pallas path).
# ----------------------------------------------------------------------------
def reference_forward(data, params, cfg):
    p = cfg['pad_size']
    in_d, out_d = cfg['in_d'], cfg['out_d']
    rn, J = cfg['reshape_num'], cfg['nums_label']
    emb = params['embedding'][data]
    x = emb[:, None, :, :]
    y = jax.lax.conv_general_dilated(x, params['conv1_w'], (1, 1), [(p, p), (p, p)],
                                     dimension_numbers=('NCHW', 'OIHW', 'NCHW'))
    y = jax.nn.relu(y + params['conv1_b'][None, :, None, None])
    y = jax.lax.conv_general_dilated(y, params['conv2_w'], (2, 2), [(p, p), (p, p)],
                                     dimension_numbers=('NCHW', 'OIHW', 'NCHW'))
    y = y + params['conv2_b'][None, :, None, None]
    B, _, H2, W2 = y.shape
    caps = y.reshape(B, in_d, rn * H2 * W2).transpose(0, 2, 1)
    wr = params['router_w']
    u_hat = jnp.einsum('ijnm,bin->bijm', wr, caps)
    b_log = jnp.zeros((B, caps.shape[1], J), jnp.float32)
    v = None
    for _ in range(cfg['iter']):
        c = jax.nn.softmax(b_log, axis=1)
        s = jnp.einsum('bij,bijm->bjm', c, u_hat)
        s2 = jnp.sum(s ** 2, -1, keepdims=True)
        v = s2 / (1.0 + s2) * (s / jnp.sqrt(s2 + 1e-8))
        a = jnp.einsum('bjm,bijm->bij', v, u_hat)
        b_log = b_log + a
    return jnp.sum(v ** 2, -1)


if __name__ == "__main__":
    cfg = dict(vocab_size=50, embedding_size=32, pad_size=1, in_d=8, out_d=16,
               nums_label=4, reshape_num=2, iter=3)
    B, L = 2, 8
    p = cfg['pad_size']
    H1 = L + 2 * p - 1
    W1 = 2 * p + 1
    H2 = (H1 + 2 * p - 2) // 2 + 1
    W2 = (W1 + 2 * p - 1) // 2 + 1
    num_caps = cfg['reshape_num'] * H2 * W2

    key = jax.random.PRNGKey(0)
    kp, kd = jax.random.split(key)
    params = init_params(kp, cfg, num_caps)
    data = jax.random.randint(kd, (B, L), 0, cfg['vocab_size'], dtype=jnp.int32)

    fwd = jax.jit(functools.partial(capsules_forward, cfg=cfg))
    out = jax.block_until_ready(fwd(data, params))
    ref = jax.block_until_ready(reference_forward(data, params, cfg))

    assert out.shape == (B, cfg['nums_label']), out.shape
    assert jnp.allclose(out, ref, rtol=2e-2, atol=2e-2), (out, ref)
    print("KERNEL_OK")
</pallas_src>

<mosaic_0001>
module attributes {stable_mosaic.version = 11 : i64} {
  func.func @_capsules_kernel(%arg0: i32, %arg1: memref<56x128xf32, #tpu.memory_space<vmem>>, %arg2: memref<128x256xf32, #tpu.memory_space<vmem>>, %arg3: memref<1x256xf32, #tpu.memory_space<vmem>>, %arg4: memref<4x2x30x56xf32, #tpu.memory_space<vmem>>, %arg5: memref<2x2x256x8xf32, #tpu.memory_space<vmem>>, %arg6: memref<30x8xf32, #tpu.memory_space<vmem>>, %arg7: memref<8x30x64xf32, #tpu.memory_space<vmem>>, %arg8: memref<4x64xf32, #tpu.memory_space<vmem>>, %arg9: memref<64x4xf32, #tpu.memory_space<vmem>>, %arg10: memref<2x4xf32, #tpu.memory_space<vmem>>) attributes {dimension_semantics = [#tpu.dimension_semantics<arbitrary>], iteration_bounds = array<i64: 1>, scalar_prefetch = 0 : i64, scratch_operands = 0 : i64, tpu.core_type = #tpu.core_type<tc>, window_params = [{pipeline_mode = #tpu.pipeline_mode<synchronous>, transform_indices = @transform_0, window_bounds = array<i64: 56, 128>}, {pipeline_mode = #tpu.pipeline_mode<synchronous>, transform_indices = @transform_1, window_bounds = array<i64: 128, 256>}, {pipeline_mode = #tpu.pipeline_mode<synchronous>, transform_indices = @transform_2, window_bounds = array<i64: 1, 256>}, {pipeline_mode = #tpu.pipeline_mode<synchronous>, transform_indices = @transform_3, window_bounds = array<i64: 4, 2, 30, 56>}, {pipeline_mode = #tpu.pipeline_mode<synchronous>, transform_indices = @transform_4, window_bounds = array<i64: 2, 2, 256, 8>}, {pipeline_mode = #tpu.pipeline_mode<synchronous>, transform_indices = @transform_5, window_bounds = array<i64: 30, 8>}, {pipeline_mode = #tpu.pipeline_mode<synchronous>, transform_indices = @transform_6, window_bounds = array<i64: 8, 30, 64>}, {pipeline_mode = #tpu.pipeline_mode<synchronous>, transform_indices = @transform_7, window_bounds = array<i64: 4, 64>}, {pipeline_mode = #tpu.pipeline_mode<synchronous>, transform_indices = @transform_8, window_bounds = array<i64: 64, 4>}, {pipeline_mode = #tpu.pipeline_mode<synchronous>, transform_indices = @transform_9, window_bounds = array<i64: 2, 4>}]} {
    %c0 = arith.constant 0 : index
    %c0_0 = arith.constant 0 : index
    %0 = vector.load %arg1[%c0, %c0_0] : memref<56x128xf32, #tpu.memory_space<vmem>>, vector<56x128xf32>
    %c0_1 = arith.constant 0 : index
    %c0_2 = arith.constant 0 : index
    %1 = vector.load %arg2[%c0_1, %c0_2] : memref<128x256xf32, #tpu.memory_space<vmem>>, vector<128x256xf32>
    %cst = arith.constant dense<0.000000e+00> : vector<56x256xf32>
    %2 = tpu.matmul %0, %1, %cst {dimension_numbers = #tpu.dot_dimension_numbers<[1], [0], [0], [1], [0, 0, 1, 1], [], []>} : vector<56x128xf32>, vector<128x256xf32>, vector<56x256xf32> -> vector<56x256xf32>
    %c0_3 = arith.constant 0 : index
    %c0_4 = arith.constant 0 : index
    %3 = vector.load %arg3[%c0_3, %c0_4] : memref<1x256xf32, #tpu.memory_space<vmem>>, vector<1x256xf32>
    %4 = vector.broadcast %3 : vector<1x256xf32> to vector<56x256xf32>
    %5 = arith.addf %2, %4 : vector<56x256xf32>
    %cst_5 = arith.constant 0.000000e+00 : f32
    %6 = vector.broadcast %cst_5 : f32 to vector<56x256xf32>
    %7 = arith.maximumf %5, %6 : vector<56x256xf32>
    %c0_6 = arith.constant 0 : index
    %c0_7 = arith.constant 0 : index
    %8 = vector.load %arg6[%c0_6, %c0_7] : memref<30x8xf32, #tpu.memory_space<vmem>>, vector<30x8xf32>
    %9 = vector.shape_cast %8 : vector<30x8xf32> to vector<1x30x8xf32>
    %10 = vector.shape_cast %9 : vector<1x30x8xf32> to vector<1x30x8xf32>
    %11 = vector.broadcast %10 : vector<1x30x8xf32> to vector<2x30x8xf32>
    %c0_8 = arith.constant 0 : index
    %c0_9 = arith.constant 0 : index
    %c0_10 = arith.constant 0 : index
    %c0_11 = arith.constant 0 : index
    %12 = vector.load %arg5[%c0_8, %c0_9, %c0_10, %c0_11] : memref<2x2x256x8xf32, #tpu.memory_space<vmem>>, vector<1x1x256x8xf32>
    %13 = vector.shape_cast %12 : vector<1x1x256x8xf32> to vector<256x8xf32>
    %cst_12 = arith.constant dense<0.000000e+00> : vector<56x8xf32>
    %14 = tpu.matmul %7, %13, %cst_12 {dimension_numbers = #tpu.dot_dimension_numbers<[1], [0], [0], [1], [0, 0, 1, 1], [], []>} : vector<56x256xf32>, vector<256x8xf32>, vector<56x8xf32> -> vector<56x8xf32>
    %15 = vector.shape_cast %14 : vector<56x8xf32> to vector<1x56x8xf32>
    %16 = vector.shape_cast %15 : vector<1x56x8xf32> to vector<1x56x8xf32>
    %17 = vector.broadcast %16 : vector<1x56x8xf32> to vector<2x56x8xf32>
    %c0_13 = arith.constant 0 : index
    %c0_14 = arith.constant 0 : index
    %c0_15 = arith.constant 0 : index
    %c0_16 = arith.constant 0 : index
    %18 = vector.load %arg4[%c0_13, %c0_14, %c0_15, %c0_16] : memref<4x2x30x56xf32, #tpu.memory_space<vmem>>, vector<1x2x30x56xf32>
    %19 = vector.shape_cast %18 : vector<1x2x30x56xf32> to vector<2x30x56xf32>
    "tpu.trace_start"() <{level = 10 : i32, message = "bnm,bmd->bnd"}> : () -> ()
    %cst_17 = arith.constant dense<0.000000e+00> : vector<2x30x8xf32>
    %20 = tpu.matmul %19, %17, %cst_17 {dimension_numbers = #tpu.dot_dimension_numbers<[2], [1], [1], [2], [0, 0, 0, 1, 1, 2], [0], [0]>} : vector<2x30x56xf32>, vector<2x56x8xf32>, vector<2x30x8xf32> -> vector<2x30x8xf32>
    "tpu.trace_stop"() : () -> ()
    %21 = arith.addf %11, %20 : vector<2x30x8xf32>
    %c0_18 = arith.constant 0 : index
    %c1 = arith.constant 1 : index
    %c0_19 = arith.constant 0 : index
    %c0_20 = arith.constant 0 : index
    %22 = vector.load %arg5[%c0_18, %c1, %c0_19, %c0_20] : memref<2x2x256x8xf32, #tpu.memory_space<vmem>>, vector<1x1x256x8xf32>
    %23 = vector.shape_cast %22 : vector<1x1x256x8xf32> to vector<256x8xf32>
    %cst_21 = arith.constant dense<0.000000e+00> : vector<56x8xf32>
    %24 = tpu.matmul %7, %23, %cst_21 {dimension_numbers = #tpu.dot_dimension_numbers<[1], [0], [0], [1], [0, 0, 1, 1], [], []>} : vector<56x256xf32>, vector<256x8xf32>, vector<56x8xf32> -> vector<56x8xf32>
    %25 = vector.shape_cast %24 : vector<56x8xf32> to vector<1x56x8xf32>
    %26 = vector.shape_cast %25 : vector<1x56x8xf32> to vector<1x56x8xf32>
    %27 = vector.broadcast %26 : vector<1x56x8xf32> to vector<2x56x8xf32>
    %c1_22 = arith.constant 1 : index
    %c0_23 = arith.constant 0 : index
    %c0_24 = arith.constant 0 : index
    %c0_25 = arith.constant 0 : index
    %28 = vector.load %arg4[%c1_22, %c0_23, %c0_24, %c0_25] : memref<4x2x30x56xf32, #tpu.memory_space<vmem>>, vector<1x2x30x56xf32>
    %29 = vector.shape_cast %28 : vector<1x2x30x56xf32> to vector<2x30x56xf32>
    "tpu.trace_start"() <{level = 10 : i32, message = "bnm,bmd->bnd"}> : () -> ()
    %cst_26 = arith.constant dense<0.000000e+00> : vector<2x30x8xf32>
    %30 = tpu.matmul %29, %27, %cst_26 {dimension_numbers = #tpu.dot_dimension_numbers<[2], [1], [1], [2], [0, 0, 0, 1, 1, 2], [0], [0]>} : vector<2x30x56xf32>, vector<2x56x8xf32>, vector<2x30x8xf32> -> vector<2x30x8xf32>
    "tpu.trace_stop"() : () -> ()
    %31 = arith.addf %21, %30 : vector<2x30x8xf32>
    %c1_27 = arith.constant 1 : index
    %c0_28 = arith.constant 0 : index
    %c0_29 = arith.constant 0 : index
    %c0_30 = arith.constant 0 : index
    %32 = vector.load %arg5[%c1_27, %c0_28, %c0_29, %c0_30] : memref<2x2x256x8xf32, #tpu.memory_space<vmem>>, vector<1x1x256x8xf32>
    %33 = vector.shape_cast %32 : vector<1x1x256x8xf32> to vector<256x8xf32>
    %cst_31 = arith.constant dense<0.000000e+00> : vector<56x8xf32>
    %34 = tpu.matmul %7, %33, %cst_31 {dimension_numbers = #tpu.dot_dimension_numbers<[1], [0], [0], [1], [0, 0, 1, 1], [], []>} : vector<56x256xf32>, vector<256x8xf32>, vector<56x8xf32> -> vector<56x8xf32>
    %35 = vector.shape_cast %34 : vector<56x8xf32> to vector<1x56x8xf32>
    %36 = vector.shape_cast %35 : vector<1x56x8xf32> to vector<1x56x8xf32>
    %37 = vector.broadcast %36 : vector<1x56x8xf32> to vector<2x56x8xf32>
    %c2 = arith.constant 2 : index
    %c0_32 = arith.constant 0 : index
    %c0_33 = arith.constant 0 : index
    %c0_34 = arith.constant 0 : index
    %38 = vector.load %arg4[%c2, %c0_32, %c0_33, %c0_34] : memref<4x2x30x56xf32, #tpu.memory_space<vmem>>, vector<1x2x30x56xf32>
    %39 = vector.shape_cast %38 : vector<1x2x30x56xf32> to vector<2x30x56xf32>
    "tpu.trace_start"() <{level = 10 : i32, message = "bnm,bmd->bnd"}> : () -> ()
    %cst_35 = arith.constant dense<0.000000e+00> : vector<2x30x8xf32>
    %40 = tpu.matmul %39, %37, %cst_35 {dimension_numbers = #tpu.dot_dimension_numbers<[2], [1], [1], [2], [0, 0, 0, 1, 1, 2], [0], [0]>} : vector<2x30x56xf32>, vector<2x56x8xf32>, vector<2x30x8xf32> -> vector<2x30x8xf32>
    "tpu.trace_stop"() : () -> ()
    %41 = arith.addf %31, %40 : vector<2x30x8xf32>
    %c1_36 = arith.constant 1 : index
    %c1_37 = arith.constant 1 : index
    %c0_38 = arith.constant 0 : index
    %c0_39 = arith.constant 0 : index
    %42 = vector.load %arg5[%c1_36, %c1_37, %c0_38, %c0_39] : memref<2x2x256x8xf32, #tpu.memory_space<vmem>>, vector<1x1x256x8xf32>
    %43 = vector.shape_cast %42 : vector<1x1x256x8xf32> to vector<256x8xf32>
    %cst_40 = arith.constant dense<0.000000e+00> : vector<56x8xf32>
    %44 = tpu.matmul %7, %43, %cst_40 {dimension_numbers = #tpu.dot_dimension_numbers<[1], [0], [0], [1], [0, 0, 1, 1], [], []>} : vector<56x256xf32>, vector<256x8xf32>, vector<56x8xf32> -> vector<56x8xf32>
    %45 = vector.shape_cast %44 : vector<56x8xf32> to vector<1x56x8xf32>
    %46 = vector.shape_cast %45 : vector<1x56x8xf32> to vector<1x56x8xf32>
    %47 = vector.broadcast %46 : vector<1x56x8xf32> to vector<2x56x8xf32>
    %c3 = arith.constant 3 : index
    %c0_41 = arith.constant 0 : index
    %c0_42 = arith.constant 0 : index
    %c0_43 = arith.constant 0 : index
    %48 = vector.load %arg4[%c3, %c0_41, %c0_42, %c0_43] : memref<4x2x30x56xf32, #tpu.memory_space<vmem>>, vector<1x2x30x56xf32>
    %49 = vector.shape_cast %48 : vector<1x2x30x56xf32> to vector<2x30x56xf32>
    "tpu.trace_start"() <{level = 10 : i32, message = "bnm,bmd->bnd"}> : () -> ()
    %cst_44 = arith.constant dense<0.000000e+00> : vector<2x30x8xf32>
    %50 = tpu.matmul %49, %47, %cst_44 {dimension_numbers = #tpu.dot_dimension_numbers<[2], [1], [1], [2], [0, 0, 0, 1, 1, 2], [0], [0]>} : vector<2x30x56xf32>, vector<2x56x8xf32>, vector<2x30x8xf32> -> vector<2x30x8xf32>
    "tpu.trace_stop"() : () -> ()
    %51 = arith.addf %41, %50 : vector<2x30x8xf32>
    %52 = vector.extract_strided_slice %51 {offsets = [0, 0, 0], sizes = [2, 30, 1], strides = [1, 1, 1]} : vector<2x30x8xf32> to vector<2x30x1xf32>
    %c0_45 = arith.constant 0 : index
    %c0_46 = arith.constant 0 : index
    %c0_47 = arith.constant 0 : index
    %53 = vector.load %arg7[%c0_45, %c0_46, %c0_47] : memref<8x30x64xf32, #tpu.memory_space<vmem>>, vector<1x30x64xf32>
    %54 = vector.shape_cast %53 : vector<1x30x64xf32> to vector<30x64xf32>
    %55 = vector.shape_cast %54 : vector<30x64xf32> to vector<1x30x64xf32>
    %56 = vector.broadcast %52 : vector<2x30x1xf32> to vector<2x30x64xf32>
    %57 = vector.broadcast %55 : vector<1x30x64xf32> to vector<2x30x64xf32>
    %58 = arith.mulf %56, %57 : vector<2x30x64xf32>
    %59 = vector.extract_strided_slice %51 {offsets = [0, 0, 1], sizes = [2, 30, 1], strides = [1, 1, 1]} : vector<2x30x8xf32> to vector<2x30x1xf32>
    %c1_48 = arith.constant 1 : index
    %c0_49 = arith.constant 0 : index
    %c0_50 = arith.constant 0 : index
    %60 = vector.load %arg7[%c1_48, %c0_49, %c0_50] : memref<8x30x64xf32, #tpu.memory_space<vmem>>, vector<1x30x64xf32>
    %61 = vector.shape_cast %60 : vector<1x30x64xf32> to vector<30x64xf32>
    %62 = vector.shape_cast %61 : vector<30x64xf32> to vector<1x30x64xf32>
    %63 = vector.broadcast %59 : vector<2x30x1xf32> to vector<2x30x64xf32>
    %64 = vector.broadcast %62 : vector<1x30x64xf32> to vector<2x30x64xf32>
    %65 = arith.mulf %63, %64 : vector<2x30x64xf32>
    %66 = arith.addf %58, %65 : vector<2x30x64xf32>
    %67 = vector.extract_strided_slice %51 {offsets = [0, 0, 2], sizes = [2, 30, 1], strides = [1, 1, 1]} : vector<2x30x8xf32> to vector<2x30x1xf32>
    %c2_51 = arith.constant 2 : index
    %c0_52 = arith.constant 0 : index
    %c0_53 = arith.constant 0 : index
    %68 = vector.load %arg7[%c2_51, %c0_52, %c0_53] : memref<8x30x64xf32, #tpu.memory_space<vmem>>, vector<1x30x64xf32>
    %69 = vector.shape_cast %68 : vector<1x30x64xf32> to vector<30x64xf32>
    %70 = vector.shape_cast %69 : vector<30x64xf32> to vector<1x30x64xf32>
    %71 = vector.broadcast %67 : vector<2x30x1xf32> to vector<2x30x64xf32>
    %72 = vector.broadcast %70 : vector<1x30x64xf32> to vector<2x30x64xf32>
    %73 = arith.mulf %71, %72 : vector<2x30x64xf32>
    %74 = arith.addf %66, %73 : vector<2x30x64xf32>
    %75 = vector.extract_strided_slice %51 {offsets = [0, 0, 3], sizes = [2, 30, 1], strides = [1, 1, 1]} : vector<2x30x8xf32> to vector<2x30x1xf32>
    %c3_54 = arith.constant 3 : index
    %c0_55 = arith.constant 0 : index
    %c0_56 = arith.constant 0 : index
    %76 = vector.load %arg7[%c3_54, %c0_55, %c0_56] : memref<8x30x64xf32, #tpu.memory_space<vmem>>, vector<1x30x64xf32>
    %77 = vector.shape_cast %76 : vector<1x30x64xf32> to vector<30x64xf32>
    %78 = vector.shape_cast %77 : vector<30x64xf32> to vector<1x30x64xf32>
    %79 = vector.broadcast %75 : vector<2x30x1xf32> to vector<2x30x64xf32>
    %80 = vector.broadcast %78 : vector<1x30x64xf32> to vector<2x30x64xf32>
    %81 = arith.mulf %79, %80 : vector<2x30x64xf32>
    %82 = arith.addf %74, %81 : vector<2x30x64xf32>
    %83 = vector.extract_strided_slice %51 {offsets = [0, 0, 4], sizes = [2, 30, 1], strides = [1, 1, 1]} : vector<2x30x8xf32> to vector<2x30x1xf32>
    %c4 = arith.constant 4 : index
    %c0_57 = arith.constant 0 : index
    %c0_58 = arith.constant 0 : index
    %84 = vector.load %arg7[%c4, %c0_57, %c0_58] : memref<8x30x64xf32, #tpu.memory_space<vmem>>, vector<1x30x64xf32>
    %85 = vector.shape_cast %84 : vector<1x30x64xf32> to vector<30x64xf32>
    %86 = vector.shape_cast %85 : vector<30x64xf32> to vector<1x30x64xf32>
    %87 = vector.broadcast %83 : vector<2x30x1xf32> to vector<2x30x64xf32>
    %88 = vector.broadcast %86 : vector<1x30x64xf32> to vector<2x30x64xf32>
    %89 = arith.mulf %87, %88 : vector<2x30x64xf32>
    %90 = arith.addf %82, %89 : vector<2x30x64xf32>
    %91 = vector.extract_strided_slice %51 {offsets = [0, 0, 5], sizes = [2, 30, 1], strides = [1, 1, 1]} : vector<2x30x8xf32> to vector<2x30x1xf32>
    %c5 = arith.constant 5 : index
    %c0_59 = arith.constant 0 : index
    %c0_60 = arith.constant 0 : index
    %92 = vector.load %arg7[%c5, %c0_59, %c0_60] : memref<8x30x64xf32, #tpu.memory_space<vmem>>, vector<1x30x64xf32>
    %93 = vector.shape_cast %92 : vector<1x30x64xf32> to vector<30x64xf32>
    %94 = vector.shape_cast %93 : vector<30x64xf32> to vector<1x30x64xf32>
    %95 = vector.broadcast %91 : vector<2x30x1xf32> to vector<2x30x64xf32>
    %96 = vector.broadcast %94 : vector<1x30x64xf32> to vector<2x30x64xf32>
    %97 = arith.mulf %95, %96 : vector<2x30x64xf32>
    %98 = arith.addf %90, %97 : vector<2x30x64xf32>
    %99 = vector.extract_strided_slice %51 {offsets = [0, 0, 6], sizes = [2, 30, 1], strides = [1, 1, 1]} : vector<2x30x8xf32> to vector<2x30x1xf32>
    %c6 = arith.constant 6 : index
    %c0_61 = arith.constant 0 : index
    %c0_62 = arith.constant 0 : index
    %100 = vector.load %arg7[%c6, %c0_61, %c0_62] : memref<8x30x64xf32, #tpu.memory_space<vmem>>, vector<1x30x64xf32>
    %101 = vector.shape_cast %100 : vector<1x30x64xf32> to vector<30x64xf32>
    %102 = vector.shape_cast %101 : vector<30x64xf32> to vector<1x30x64xf32>
    %103 = vector.broadcast %99 : vector<2x30x1xf32> to vector<2x30x64xf32>
    %104 = vector.broadcast %102 : vector<1x30x64xf32> to vector<2x30x64xf32>
    %105 = arith.mulf %103, %104 : vector<2x30x64xf32>
    %106 = arith.addf %98, %105 : vector<2x30x64xf32>
    %107 = vector.extract_strided_slice %51 {offsets = [0, 0, 7], sizes = [2, 30, 1], strides = [1, 1, 1]} : vector<2x30x8xf32> to vector<2x30x1xf32>
    %c7 = arith.constant 7 : index
    %c0_63 = arith.constant 0 : index
    %c0_64 = arith.constant 0 : index
    %108 = vector.load %arg7[%c7, %c0_63, %c0_64] : memref<8x30x64xf32, #tpu.memory_space<vmem>>, vector<1x30x64xf32>
    %109 = vector.shape_cast %108 : vector<1x30x64xf32> to vector<30x64xf32>
    %110 = vector.shape_cast %109 : vector<30x64xf32> to vector<1x30x64xf32>
    %111 = vector.broadcast %107 : vector<2x30x1xf32> to vector<2x30x64xf32>
    %112 = vector.broadcast %110 : vector<1x30x64xf32> to vector<2x30x64xf32>
    %113 = arith.mulf %111, %112 : vector<2x30x64xf32>
    %114 = arith.addf %106, %113 : vector<2x30x64xf32>
    %c0_65 = arith.constant 0 : index
    %c0_66 = arith.constant 0 : index
    %115 = vector.load %arg8[%c0_65, %c0_66] : memref<4x64xf32, #tpu.memory_space<vmem>>, vector<4x64xf32>
    %c0_67 = arith.constant 0 : index
    %c0_68 = arith.constant 0 : index
    %116 = vector.load %arg9[%c0_67, %c0_68] : memref<64x4xf32, #tpu.memory_space<vmem>>, vector<64x4xf32>
    %117 = vector.shape_cast %115 : vector<4x64xf32> to vector<1x4x64xf32>
    %118 = vector.shape_cast %117 : vector<1x4x64xf32> to vector<1x4x64xf32>
    %119 = vector.broadcast %118 : vector<1x4x64xf32> to vector<2x4x64xf32>
    %120 = vector.shape_cast %116 : vector<64x4xf32> to vector<1x64x4xf32>
    %121 = vector.shape_cast %120 : vector<1x64x4xf32> to vector<1x64x4xf32>
    %122 = vector.broadcast %121 : vector<1x64x4xf32> to vector<2x64x4xf32>
    %cst_69 = arith.constant dense<0.000000e+00> : vector<2x64xf32>
    %123 = vector.multi_reduction <add>, %114, %cst_69 [1] : vector<2x30x64xf32> to vector<2x64xf32>
    %cst_70 = arith.constant 3.000000e+01 : f32
    %124 = vector.broadcast %cst_70 : f32 to vector<2x64xf32>
    %125 = arith.divf %123, %124 : vector<2x64xf32>
    %126 = arith.mulf %125, %125 : vector<2x64xf32>
    %cst_71 = arith.constant dense<0.000000e+00> : vector<2x4xf32>
    %127 = tpu.matmul %126, %116, %cst_71 {dimension_numbers = #tpu.dot_dimension_numbers<[1], [0], [0], [1], [0, 0, 1, 1], [], []>} : vector<2x64xf32>, vector<64x4xf32>, vector<2x4xf32> -> vector<2x4xf32>
    %cst_72 = arith.constant dense<0.000000e+00> : vector<2x64xf32>
    %128 = tpu.matmul %127, %115, %cst_72 {dimension_numbers = #tpu.dot_dimension_numbers<[1], [0], [0], [1], [0, 0, 1, 1], [], []>} : vector<2x4xf32>, vector<4x64xf32>, vector<2x64xf32> -> vector<2x64xf32>
    %cst_73 = arith.constant 9.99999993E-9 : f32
    %129 = vector.broadcast %cst_73 : f32 to vector<2x64xf32>
    %130 = arith.addf %128, %129 : vector<2x64xf32>
    %131 = math.rsqrt %130 : vector<2x64xf32>
    %132 = arith.mulf %128, %131 : vector<2x64xf32>
    %cst_74 = arith.constant 1.000000e+00 : f32
    %133 = vector.broadcast %cst_74 : f32 to vector<2x64xf32>
    %134 = arith.addf %133, %128 : vector<2x64xf32>
    %135 = tpu.reciprocal %134 {approx = true} : vector<2x64xf32> -> vector<2x64xf32>
    %136 = arith.mulf %132, %135 : vector<2x64xf32>
    %137 = arith.mulf %125, %136 : vector<2x64xf32>
    %138 = vector.shape_cast %137 : vector<2x64xf32> to vector<2x1x64xf32>
    %139 = vector.broadcast %138 : vector<2x1x64xf32> to vector<2x30x64xf32>
    %140 = arith.mulf %114, %139 : vector<2x30x64xf32>
    "tpu.trace_start"() <{level = 10 : i32, message = "bnk,bkj->bnj"}> : () -> ()
    %cst_75 = arith.constant dense<0.000000e+00> : vector<2x30x4xf32>
    %141 = tpu.matmul %140, %122, %cst_75 {dimension_numbers = #tpu.dot_dimension_numbers<[2], [1], [1], [2], [0, 0, 0, 1, 1, 2], [0], [0]>} : vector<2x30x64xf32>, vector<2x64x4xf32>, vector<2x30x4xf32> -> vector<2x30x4xf32>
    "tpu.trace_stop"() : () -> ()
    %cst_76 = arith.constant dense<0xFF800000> : vector<2x4xf32>
    %142 = vector.multi_reduction <maximumf>, %141, %cst_76 [1] : vector<2x30x4xf32> to vector<2x4xf32>
    %143 = vector.shape_cast %142 : vector<2x4xf32> to vector<2x1x4xf32>
    %144 = vector.broadcast %143 : vector<2x1x4xf32> to vector<2x30x4xf32>
    %145 = arith.subf %141, %144 : vector<2x30x4xf32>
    %146 = math.exp %145 : vector<2x30x4xf32>
    %cst_77 = arith.constant dense<0.000000e+00> : vector<2x4xf32>
    %147 = vector.multi_reduction <add>, %146, %cst_77 [1] : vector<2x30x4xf32> to vector<2x4xf32>
    %148 = vector.shape_cast %147 : vector<2x4xf32> to vector<2x1x4xf32>
    %149 = tpu.reciprocal %148 {approx = true} : vector<2x1x4xf32> -> vector<2x1x4xf32>
    %150 = vector.broadcast %149 : vector<2x1x4xf32> to vector<2x30x4xf32>
    %151 = arith.mulf %146, %150 : vector<2x30x4xf32>
    "tpu.trace_start"() <{level = 10 : i32, message = "bnj,bjk->bnk"}> : () -> ()
    %cst_78 = arith.constant dense<0.000000e+00> : vector<2x30x64xf32>
    %152 = tpu.matmul %151, %119, %cst_78 {dimension_numbers = #tpu.dot_dimension_numbers<[2], [1], [1], [2], [0, 0, 0, 1, 1, 2], [0], [0]>} : vector<2x30x4xf32>, vector<2x4x64xf32>, vector<2x30x64xf32> -> vector<2x30x64xf32>
    "tpu.trace_stop"() : () -> ()
    %153 = arith.mulf %152, %114 : vector<2x30x64xf32>
    %cst_79 = arith.constant dense<0.000000e+00> : vector<2x64xf32>
    %154 = vector.multi_reduction <add>, %153, %cst_79 [1] : vector<2x30x64xf32> to vector<2x64xf32>
    %155 = arith.mulf %154, %154 : vector<2x64xf32>
    %cst_80 = arith.constant dense<0.000000e+00> : vector<2x4xf32>
    %156 = tpu.matmul %155, %116, %cst_80 {dimension_numbers = #tpu.dot_dimension_numbers<[1], [0], [0], [1], [0, 0, 1, 1], [], []>} : vector<2x64xf32>, vector<64x4xf32>, vector<2x4xf32> -> vector<2x4xf32>
    %cst_81 = arith.constant dense<0.000000e+00> : vector<2x64xf32>
    %157 = tpu.matmul %156, %115, %cst_81 {dimension_numbers = #tpu.dot_dimension_numbers<[1], [0], [0], [1], [0, 0, 1, 1], [], []>} : vector<2x4xf32>, vector<4x64xf32>, vector<2x64xf32> -> vector<2x64xf32>
    %cst_82 = arith.constant 9.99999993E-9 : f32
    %158 = vector.broadcast %cst_82 : f32 to vector<2x64xf32>
    %159 = arith.addf %157, %158 : vector<2x64xf32>
    %160 = math.rsqrt %159 : vector<2x64xf32>
    %161 = arith.mulf %157, %160 : vector<2x64xf32>
    %cst_83 = arith.constant 1.000000e+00 : f32
    %162 = vector.broadcast %cst_83 : f32 to vector<2x64xf32>
    %163 = arith.addf %162, %157 : vector<2x64xf32>
    %164 = tpu.reciprocal %163 {approx = true} : vector<2x64xf32> -> vector<2x64xf32>
    %165 = arith.mulf %161, %164 : vector<2x64xf32>
    %166 = arith.mulf %154, %165 : vector<2x64xf32>
    %167 = vector.shape_cast %166 : vector<2x64xf32> to vector<2x1x64xf32>
    %168 = vector.broadcast %167 : vector<2x1x64xf32> to vector<2x30x64xf32>
    %169 = arith.mulf %114, %168 : vector<2x30x64xf32>
    "tpu.trace_start"() <{level = 10 : i32, message = "bnk,bkj->bnj"}> : () -> ()
    %cst_84 = arith.constant dense<0.000000e+00> : vector<2x30x4xf32>
    %170 = tpu.matmul %169, %122, %cst_84 {dimension_numbers = #tpu.dot_dimension_numbers<[2], [1], [1], [2], [0, 0, 0, 1, 1, 2], [0], [0]>} : vector<2x30x64xf32>, vector<2x64x4xf32>, vector<2x30x4xf32> -> vector<2x30x4xf32>
    "tpu.trace_stop"() : () -> ()
    %171 = arith.addf %141, %170 : vector<2x30x4xf32>
    %cst_85 = arith.constant dense<0xFF800000> : vector<2x4xf32>
    %172 = vector.multi_reduction <maximumf>, %171, %cst_85 [1] : vector<2x30x4xf32> to vector<2x4xf32>
    %173 = vector.shape_cast %172 : vector<2x4xf32> to vector<2x1x4xf32>
    %174 = vector.broadcast %173 : vector<2x1x4xf32> to vector<2x30x4xf32>
    %175 = arith.subf %171, %174 : vector<2x30x4xf32>
    %176 = math.exp %175 : vector<2x30x4xf32>
    %cst_86 = arith.constant dense<0.000000e+00> : vector<2x4xf32>
    %177 = vector.multi_reduction <add>, %176, %cst_86 [1] : vector<2x30x4xf32> to vector<2x4xf32>
    %178 = vector.shape_cast %177 : vector<2x4xf32> to vector<2x1x4xf32>
    %179 = tpu.reciprocal %178 {approx = true} : vector<2x1x4xf32> -> vector<2x1x4xf32>
    %180 = vector.broadcast %179 : vector<2x1x4xf32> to vector<2x30x4xf32>
    %181 = arith.mulf %176, %180 : vector<2x30x4xf32>
    "tpu.trace_start"() <{level = 10 : i32, message = "bnj,bjk->bnk"}> : () -> ()
    %cst_87 = arith.constant dense<0.000000e+00> : vector<2x30x64xf32>
    %182 = tpu.matmul %181, %119, %cst_87 {dimension_numbers = #tpu.dot_dimension_numbers<[2], [1], [1], [2], [0, 0, 0, 1, 1, 2], [0], [0]>} : vector<2x30x4xf32>, vector<2x4x64xf32>, vector<2x30x64xf32> -> vector<2x30x64xf32>
    "tpu.trace_stop"() : () -> ()
    %183 = arith.mulf %182, %114 : vector<2x30x64xf32>
    %cst_88 = arith.constant dense<0.000000e+00> : vector<2x64xf32>
    %184 = vector.multi_reduction <add>, %183, %cst_88 [1] : vector<2x30x64xf32> to vector<2x64xf32>
    %185 = arith.mulf %184, %184 : vector<2x64xf32>
    %cst_89 = arith.constant dense<0.000000e+00> : vector<2x4xf32>
    %186 = tpu.matmul %185, %116, %cst_89 {dimension_numbers = #tpu.dot_dimension_numbers<[1], [0], [0], [1], [0, 0, 1, 1], [], []>} : vector<2x64xf32>, vector<64x4xf32>, vector<2x4xf32> -> vector<2x4xf32>
    %cst_90 = arith.constant dense<0.000000e+00> : vector<2x64xf32>
    %187 = tpu.matmul %186, %115, %cst_90 {dimension_numbers = #tpu.dot_dimension_numbers<[1], [0], [0], [1], [0, 0, 1, 1], [], []>} : vector<2x4xf32>, vector<4x64xf32>, vector<2x64xf32> -> vector<2x64xf32>
    %cst_91 = arith.constant 9.99999993E-9 : f32
    %188 = vector.broadcast %cst_91 : f32 to vector<2x64xf32>
    %189 = arith.addf %187, %188 : vector<2x64xf32>
    %190 = math.rsqrt %189 : vector<2x64xf32>
    %191 = arith.mulf %187, %190 : vector<2x64xf32>
    %cst_92 = arith.constant 1.000000e+00 : f32
    %192 = vector.broadcast %cst_92 : f32 to vector<2x64xf32>
    %193 = arith.addf %192, %187 : vector<2x64xf32>
    %194 = tpu.reciprocal %193 {approx = true} : vector<2x64xf32> -> vector<2x64xf32>
    %195 = arith.mulf %191, %194 : vector<2x64xf32>
    %196 = arith.mulf %184, %195 : vector<2x64xf32>
    %197 = arith.mulf %196, %196 : vector<2x64xf32>
    %cst_93 = arith.constant dense<0.000000e+00> : vector<2x4xf32>
    %198 = tpu.matmul %197, %116, %cst_93 {dimension_numbers = #tpu.dot_dimension_numbers<[1], [0], [0], [1], [0, 0, 1, 1], [], []>} : vector<2x64xf32>, vector<64x4xf32>, vector<2x4xf32> -> vector<2x4xf32>
    %c0_94 = arith.constant 0 : index
    %c0_95 = arith.constant 0 : index
    %199 = vector.load %arg10[%c0_94, %c0_95] : memref<2x4xf32, #tpu.memory_space<vmem>>, vector<2x4xf32>
    tpu.vector_store %arg10[%c0_94, %c0_95], %198 {strides = array<i32>} : memref<2x4xf32, #tpu.memory_space<vmem>>, vector<2x4xf32>,
    return
  }
  func.func @transform_0(%arg0: i32) -> (i32, i32) {
    %c0_i32 = arith.constant 0 : i32
    %c0_i32_0 = arith.constant 0 : i32
    %c0_i32_1 = arith.constant 0 : i32
    return %c0_i32, %c0_i32_0 : i32, i32
  }
  func.func @transform_1(%arg0: i32) -> (i32, i32) {
    %c0_i32 = arith.constant 0 : i32
    %c0_i32_0 = arith.constant 0 : i32
    %c0_i32_1 = arith.constant 0 : i32
    return %c0_i32, %c0_i32_0 : i32, i32
  }
  func.func @transform_2(%arg0: i32) -> (i32, i32) {
    %c0_i32 = arith.constant 0 : i32
    %c0_i32_0 = arith.constant 0 : i32
    %c0_i32_1 = arith.constant 0 : i32
    return %c0_i32, %c0_i32_0 : i32, i32
  }
  func.func @transform_3(%arg0: i32) -> (i32, i32, i32, i32) {
    %c0_i32 = arith.constant 0 : i32
    %c0_i32_0 = arith.constant 0 : i32
    %c0_i32_1 = arith.constant 0 : i32
    %c0_i32_2 = arith.constant 0 : i32
    %c0_i32_3 = arith.constant 0 : i32
    return %c0_i32, %c0_i32_0, %c0_i32_1, %c0_i32_2 : i32, i32, i32, i32
  }
  func.func @transform_4(%arg0: i32) -> (i32, i32, i32, i32) {
    %c0_i32 = arith.constant 0 : i32
    %c0_i32_0 = arith.constant 0 : i32
    %c0_i32_1 = arith.constant 0 : i32
    %c0_i32_2 = arith.constant 0 : i32
    %c0_i32_3 = arith.constant 0 : i32
    return %c0_i32, %c0_i32_0, %c0_i32_1, %c0_i32_2 : i32, i32, i32, i32
  }
  func.func @transform_5(%arg0: i32) -> (i32, i32) {
    %c0_i32 = arith.constant 0 : i32
    %c0_i32_0 = arith.constant 0 : i32
    %c0_i32_1 = arith.constant 0 : i32
    return %c0_i32, %c0_i32_0 : i32, i32
  }
  func.func @transform_6(%arg0: i32) -> (i32, i32, i32) {
    %c0_i32 = arith.constant 0 : i32
    %c0_i32_0 = arith.constant 0 : i32
    %c0_i32_1 = arith.constant 0 : i32
    %c0_i32_2 = arith.constant 0 : i32
    return %c0_i32, %c0_i32_0, %c0_i32_1 : i32, i32, i32
  }
  func.func @transform_7(%arg0: i32) -> (i32, i32) {
    %c0_i32 = arith.constant 0 : i32
    %c0_i32_0 = arith.constant 0 : i32
    %c0_i32_1 = arith.constant 0 : i32
    return %c0_i32, %c0_i32_0 : i32, i32
  }
  func.func @transform_8(%arg0: i32) -> (i32, i32) {
    %c0_i32 = arith.constant 0 : i32
    %c0_i32_0 = arith.constant 0 : i32
    %c0_i32_1 = arith.constant 0 : i32
    return %c0_i32, %c0_i32_0 : i32, i32
  }
  func.func @transform_9(%arg0: i32) -> (i32, i32) {
    %c0_i32 = arith.constant 0 : i32
    %c0_i32_0 = arith.constant 0 : i32
    %c0_i32_1 = arith.constant 0 : i32
    return %c0_i32, %c0_i32_0 : i32, i32
  }
}

</mosaic_0001>

<bundles_post_ra>
// kernel: capsules_forward.1
= control target key start
LH: loop header
LB: loop body
LE: loop exit
PB: predicated region body
PF: predicated region fallthrough
CT: control target
= control target key end

     0   :  { %s4145_s0 = inlined_call_operand.vmem [shape: f32[56,128], index: 0, kind: input, shape index: {}]   ;;  %s4146_s1 = inlined_call_operand.vmem [shape: f32[128,256], index: 1, kind: input, shape index: {}]   ;;  %s4147_s2 = inlined_call_operand.vmem [shape: f32[1,256], index: 2, kind: input, shape index: {}]   ;;  %s4148_s3 = inlined_call_operand.vmem [shape: f32[4,2,30,56], index: 3, kind: input, shape index: {}]   ;;  %s4149_s4 = inlined_call_operand.vmem [shape: f32[2,2,256,8], index: 4, kind: input, shape index: {}]   ;;  %s4150_s5 = inlined_call_operand.vmem [shape: f32[30,8], index: 5, kind: input, shape index: {}]   ;;  %s4151_s6 = inlined_call_operand.vmem [shape: f32[8,30,64], index: 6, kind: input, shape index: {}]   ;;  %s4152_s7 = inlined_call_operand.vmem [shape: f32[4,64], index: 7, kind: input, shape index: {}]   ;;  %s4153_s8 = inlined_call_operand.vmem [shape: f32[64,4], index: 8, kind: input, shape index: {}]   ;;  %s4154_s9 = inlined_call_operand.hbm [shape: f32[2,4], index: 9, kind: output, shape index: {}]  }
   0x1   :  { %v70_v0 = vld [vmem:[%s4146_s1 + $0xf0] sm:$0xff]  ;;  %v71_v1 = vld [vmem:[%s4146_s1 + $0xf8] sm:$0xff]  ;;  %v68_v2 = vld [vmem:[%s4146_s1 + $0xe0] sm:$0xff] }
   0x2   :  { %78 = vmatpush.msra.mxu0 %v70_v0  ;;  %116 = vmatpush.msra.mxu1 %v71_v1  ;;  %v69_v3 = vld [vmem:[%s4146_s1 + $0xe8] sm:$0xff]  ;;  %v66_v4 = vld [vmem:[%s4146_s1 + $0xd0] sm:$0xff]  ;;  %v67_v5 = vld [vmem:[%s4146_s1 + $0xd8] sm:$0xff] }
   0x3   :  { %v64_v6 = vld [vmem:[%s4146_s1 + $0xc0] sm:$0xff]  ;;  %v65_v7 = vld [vmem:[%s4146_s1 + $0xc8] sm:$0xff]  ;;  %v62_v8 = vld [vmem:[%s4146_s1 + $0xb0] sm:$0xff] }
   0x4   :  { %79 = vmatpush.msra.mxu0 %v68_v2  ;;  %117 = vmatpush.msra.mxu1 %v69_v3  ;;  %v63_v9 = vld [vmem:[%s4146_s1 + $0xb8] sm:$0xff]  ;;  %v60_v10 = vld [vmem:[%s4146_s1 + $0xa0] sm:$0xff]  ;;  %v61_v11 = vld [vmem:[%s4146_s1 + $0xa8] sm:$0xff] }
   0x5   :  { %v58_v12 = vld [vmem:[%s4146_s1 + $0x90] sm:$0xff]  ;;  %v59_v13 = vld [vmem:[%s4146_s1 + $0x98] sm:$0xff] }
   0x6   :  { %80 = vmatpush.msra.mxu0 %v66_v4  ;;  %118 = vmatpush.msra.mxu1 %v67_v5 }
   0x8   :  { %81 = vmatpush.msra.mxu0 %v64_v6  ;;  %119 = vmatpush.msra.mxu1 %v65_v7 }
   0xa   :  { %82 = vmatpush.msra.mxu0 %v62_v8  ;;  %120 = vmatpush.msra.mxu1 %v63_v9 }
   0xc   :  { %83 = vmatpush.msra.mxu0 %v60_v10  ;;  %121 = vmatpush.msra.mxu1 %v61_v11 }
   0xd   :  { %14 = vsyncpa [#allocation3], 0  ;;  %v56_v14 = vld [vmem:[%s4146_s1 + $0x80] sm:$0xff]  ;;  %v57_v15 = vld [vmem:[%s4146_s1 + $0x88] sm:$0xff]  ;;  %vm288_vm0 = vcmask 457728   ;;  %vm1435_vm1 = vcmask 523264  }
   0xe   :  { %84 = vmatpush.msra.mxu0 %v58_v12  ;;  %122 = vmatpush.msra.mxu1 %v59_v13  ;;  %v54_v16 = vld [vmem:[%s4146_s1 + $0x70] sm:$0xff]  ;;  %v55_v17 = vld [vmem:[%s4146_s1 + $0x78] sm:$0xff]  ;;  %v52_v18 = vld [vmem:[%s4146_s1 + $0x60] sm:$0xff]  ;;  %vm1441_vm2 = vcmask 521216   ;;  %vm1476_vm4 = vcmask 1041409   ;;  %vm1504_vm5 = vcmask 1043456  }
   0xf   :  { %v53_v19 = vld [vmem:[%s4146_s1 + $0x68] sm:$0xff]  ;;  %v50_v20 = vld [vmem:[%s4146_s1 + $0x50] sm:$0xff]  ;;  %v51_v21 = vld [vmem:[%s4146_s1 + $0x58] sm:$0xff]  ;;  %vm1500_vm6 = vcmask 31744   ;;  %vm1645_vm10 = vcmask 29696   ;;  %s2325_s21 = sshll.u32 %s4154_s9, 4  ;;  %s2326_s21 = int_to_ptr.hbm [resolvable:$true] %s2325_s21 }
  0x10   :  { %85 = vmatpush.msra.mxu0 %v56_v14  ;;  %123 = vmatpush.msra.mxu1 %v57_v15  ;;  %v48_v22 = vld [vmem:[%s4146_s1 + $0x40] sm:$0xff]  ;;  %v49_v23 = vld [vmem:[%s4146_s1 + $0x48] sm:$0xff]  ;;  %v46_v24 = vld [vmem:[%s4146_s1 + $0x30] sm:$0xff] }
  0x11   :  { %v47_v25 = vld [vmem:[%s4146_s1 + $0x38] sm:$0xff]  ;;  %v44_v26 = vld [vmem:[%s4146_s1 + $0x20] sm:$0xff]  ;;  %v45_v27 = vld [vmem:[%s4146_s1 + $0x28] sm:$0xff] }
  0x12   :  { %86 = vmatpush.msra.mxu0 %v54_v16  ;;  %124 = vmatpush.msra.mxu1 %v55_v17  ;;  %v42_v28 = vld [vmem:[%s4146_s1 + $0x10] sm:$0xff]  ;;  %v43_v29 = vld [vmem:[%s4146_s1 + $0x18] sm:$0xff]  ;;  %v40_v30 = vld [vmem:[%s4146_s1] sm:$0xff] }
  0x13   :  { %v41_v31 = vld [vmem:[%s4146_s1 + $0x8] sm:$0xff]  ;;  %v33_v32 = vld [vmem:[%s4145_s0] sm:$0xff]  ;;  %v35_v34 = vld [vmem:[%s4145_s0 + $0x10] sm:$0xff] }
  0x14   :  { %87 = vmatpush.msra.mxu0 %v52_v18  ;;  %125 = vmatpush.msra.mxu1 %v53_v19  ;;  %v34_v33 = vld [vmem:[%s4145_s0 + $0x8] sm:$0xff]  ;;  %v187_v35 = vld [vmem:[%s4149_s4 + $0x78] sm:$0xff]  ;;  %v186_v37 = vld [vmem:[%s4149_s4 + $0x70] sm:$0xff] }
  0x15   :  { %v203_v36 = vld [vmem:[%s4149_s4 + $0xf8] sm:$0xff]  ;;  %204 = vmatpush.msra.mxu2 %v187_v35  ;;  %v202_v38 = vld [vmem:[%s4149_s4 + $0xf0] sm:$0xff]  ;;  %v185_v39 = vld [vmem:[%s4149_s4 + $0x68] sm:$0xff] }
  0x16   :  { %88 = vmatpush.msra.mxu0 %v50_v20  ;;  %126 = vmatpush.msra.mxu1 %v51_v21  ;;  %v201_v40 = vld [vmem:[%s4149_s4 + $0xe8] sm:$0xff]  ;;  %v184_v41 = vld [vmem:[%s4149_s4 + $0x60] sm:$0xff]  ;;  %v36_v43 = vld [vmem:[%s4145_s0 + $0x18] sm:$0xff] }
  0x17   :  { %242 = vmatpush.msra.mxu3 %v203_v36  ;;  %205 = vmatpush.msra.mxu2 %v186_v37  ;;  %v200_v42 = vld [vmem:[%s4149_s4 + $0xe0] sm:$0xff]  ;;  %v183_v44 = vld [vmem:[%s4149_s4 + $0x58] sm:$0xff]  ;;  %v182_v46 = vld [vmem:[%s4149_s4 + $0x50] sm:$0xff] }
  0x18   :  { %89 = vmatpush.msra.mxu0 %v48_v22  ;;  %127 = vmatpush.msra.mxu1 %v49_v23  ;;  %v199_v45 = vld [vmem:[%s4149_s4 + $0xd8] sm:$0xff]  ;;  %v198_v47 = vld [vmem:[%s4149_s4 + $0xd0] sm:$0xff]  ;;  %v181_v48 = vld [vmem:[%s4149_s4 + $0x48] sm:$0xff] }
  0x19   :  { %243 = vmatpush.msra.mxu3 %v202_v38  ;;  %206 = vmatpush.msra.mxu2 %v185_v39  ;;  %v197_v49 = vld [vmem:[%s4149_s4 + $0xc8] sm:$0xff]  ;;  %v180_v50 = vld [vmem:[%s4149_s4 + $0x40] sm:$0xff]  ;;  %v179_v53 = vld [vmem:[%s4149_s4 + $0x38] sm:$0xff] }
  0x1a   :  { %90 = vmatpush.msra.mxu0 %v46_v24  ;;  %128 = vmatpush.msra.mxu1 %v47_v25  ;;  %v196_v51 = vld [vmem:[%s4149_s4 + $0xc0] sm:$0xff]  ;;  %v195_v54 = vld [vmem:[%s4149_s4 + $0xb8] sm:$0xff]  ;;  %v178_v55 = vld [vmem:[%s4149_s4 + $0x30] sm:$0xff] }
  0x1b   :  { %244 = vmatpush.msra.mxu3 %v201_v40  ;;  %207 = vmatpush.msra.mxu2 %v184_v41  ;;  %v37_v52 = vld [vmem:[%s4145_s0 + $0x20] sm:$0xff]  ;;  %v194_v56 = vld [vmem:[%s4149_s4 + $0xb0] sm:$0xff]  ;;  %v177_v57 = vld [vmem:[%s4149_s4 + $0x28] sm:$0xff] }
  0x1c   :  { %91 = vmatpush.msra.mxu0 %v44_v26  ;;  %129 = vmatpush.msra.mxu1 %v45_v27  ;;  %v193_v58 = vld [vmem:[%s4149_s4 + $0xa8] sm:$0xff]  ;;  %v176_v59 = vld [vmem:[%s4149_s4 + $0x20] sm:$0xff]  ;;  %v175_v62 = vld [vmem:[%s4149_s4 + $0x18] sm:$0xff] }
  0x1d   :  { %245 = vmatpush.msra.mxu3 %v200_v42  ;;  %208 = vmatpush.msra.mxu2 %v183_v44  ;;  %v192_v60 = vld [vmem:[%s4149_s4 + $0xa0] sm:$0xff]  ;;  %v38_v61 = vld [vmem:[%s4145_s0 + $0x28] sm:$0xff]  ;;  %v191_v63 = vld [vmem:[%s4149_s4 + $0x98] sm:$0xff] }
  0x1e   :  { %92 = vmatpush.msra.mxu0 %v42_v28  ;;  %130 = vmatpush.msra.mxu1 %v43_v29  ;;  %v39_v0 = vld [vmem:[%s4145_s0 + $0x30] sm:$0xff]  ;;  %v173_v3 = vld [vmem:[%s4149_s4 + $0x8] sm:$0xff]  ;;  %v172_v5 = vld [vmem:[%s4149_s4] sm:$0xff] }
  0x1f   :  { %246 = vmatpush.msra.mxu3 %v199_v45  ;;  %209 = vmatpush.msra.mxu2 %v182_v46  ;;  %v174_v1 = vld [vmem:[%s4149_s4 + $0x10] sm:$0xff]  ;;  %v189_v4 = vld [vmem:[%s4149_s4 + $0x88] sm:$0xff]  ;;  %v188_v6 = vld [vmem:[%s4149_s4 + $0x80] sm:$0xff] }
  0x20   :  { %93 = vmatpush.msra.mxu0 %v40_v30  ;;  %131 = vmatpush.msra.mxu1 %v41_v31  ;;  %v190_v2 = vld [vmem:[%s4149_s4 + $0x90] sm:$0xff]  ;;  %v72_v7 = vld [vmem:[%s4147_s2] sm:$0x3]  ;;  %v2357_v10 = vld [vmem:[%s4149_s4 + $0x178] sm:$0xff] }
  0x21   :  { %94 = vmatmul.f32.vlgmr.msra.gmra.mxu0 %v33_v32  ;;  %132 = vmatmul.f32.vlgmr.msra.gmra.mxu1 %v33_v32  ;;  %v2989_v8 = vperm.slane %v72_v7, 0  ;;  %v2991_v9 = vperm.slane %v72_v7, 1  ;;  %v2373_v11 = vld [vmem:[%s4149_s4 + $0x1f8] sm:$0xff]  ;;  %v2356_v12 = vld [vmem:[%s4149_s4 + $0x170] sm:$0xff]  ;;  %v2355_v18 = vld [vmem:[%s4149_s4 + $0x168] sm:$0xff] }
  0x22   :  { %247 = vmatpush.msra.mxu3 %v198_v47  ;;  %210 = vmatpush.msra.mxu2 %v181_v48  ;;  %v2372_v13 = vld [vmem:[%s4149_s4 + $0x1f0] sm:$0xff]  ;;  %v2371_v19 = vld [vmem:[%s4149_s4 + $0x1e8] sm:$0xff]  ;;  %v2354_v22 = vld [vmem:[%s4149_s4 + $0x160] sm:$0xff] }
  0x23   :  { %v2370_v23 = vld [vmem:[%s4149_s4 + $0x1e0] sm:$0xff]  ;;  %v2353_v24 = vld [vmem:[%s4149_s4 + $0x158] sm:$0xff]  ;;  %v2352_v26 = vld [vmem:[%s4149_s4 + $0x150] sm:$0xff] }
  0x24   :  { %248 = vmatpush.msra.mxu3 %v197_v49  ;;  %211 = vmatpush.msra.mxu2 %v180_v50  ;;  %v2369_v25 = vld [vmem:[%s4149_s4 + $0x1d8] sm:$0xff]  ;;  %v2368_v27 = vld [vmem:[%s4149_s4 + $0x1d0] sm:$0xff]  ;;  %v2351_v32 = vld [vmem:[%s4149_s4 + $0x148] sm:$0xff] }
  0x25   :  { %v2350_v36 = vld [vmem:[%s4149_s4 + $0x140] sm:$0xff]  ;;  %v2349_v38 = vld [vmem:[%s4149_s4 + $0x138] sm:$0xff]  ;;  %v2348_v40 = vld [vmem:[%s4149_s4 + $0x130] sm:$0xff] }
  0x26   :  { %249 = vmatpush.msra.mxu3 %v196_v51  ;;  %212 = vmatpush.msra.mxu2 %v179_v53  ;;  %v2366_v37 = vld [vmem:[%s4149_s4 + $0x1c0] sm:$0xff]  ;;  %v2365_v39 = vld [vmem:[%s4149_s4 + $0x1b8] sm:$0xff]  ;;  %v2364_v41 = vld [vmem:[%s4149_s4 + $0x1b0] sm:$0xff] }
  0x27   :  { %v2347_v46 = vld [vmem:[%s4149_s4 + $0x128] sm:$0xff]  ;;  %v2346_v50 = vld [vmem:[%s4149_s4 + $0x120] sm:$0xff]  ;;  %v2361_v53 = vld [vmem:[%s4149_s4 + $0x198] sm:$0xff] }
  0x28   :  { %250 = vmatpush.msra.mxu3 %v195_v54  ;;  %213 = vmatpush.msra.mxu2 %v178_v55  ;;  %v2363_v47 = vld [vmem:[%s4149_s4 + $0x1a8] sm:$0xff]  ;;  %v2362_v51 = vld [vmem:[%s4149_s4 + $0x1a0] sm:$0xff]  ;;  %v2344_v54 = vld [vmem:[%s4149_s4 + $0x110] sm:$0xff] }
  0x29   :  { %97 = vmatmul.f32.gmra.mxu0 %v34_v33  ;;  %135 = vmatmul.f32.gmra.mxu1 %v34_v33  ;;  %v2367_v33 = vld [vmem:[%s4149_s4 + $0x1c8] sm:$0xff]  ;;  %v2360_v55 = vld [vmem:[%s4149_s4 + $0x190] sm:$0xff] }
  0x2a   :  { %251 = vmatpush.msra.mxu3 %v194_v56  ;;  %214 = vmatpush.msra.mxu2 %v177_v57  ;;  %v2343_v56 = vld [vmem:[%s4149_s4 + $0x108] sm:$0xff] }
  0x2b   :  { %v2359_v57 = vld [vmem:[%s4149_s4 + $0x188] sm:$0xff] }
  0x2c   :  { %252 = vmatpush.msra.mxu3 %v193_v58  ;;  %215 = vmatpush.msra.mxu2 %v176_v59 }
  0x2e   :  { %253 = vmatpush.msra.mxu3 %v192_v60  ;;  %216 = vmatpush.msra.mxu2 %v175_v62  ;;  %v2342_v62 = vld [vmem:[%s4149_s4 + $0x100] sm:$0xff] }
  0x30   :  { %254 = vmatpush.msra.mxu3 %v191_v63  ;;  %217 = vmatpush.msra.mxu2 %v174_v1  ;;  %v2358_v63 = vld [vmem:[%s4149_s4 + $0x180] sm:$0xff] }
  0x31   :  { %100 = vmatmul.f32.gmra.mxu0 %v35_v34  ;;  %138 = vmatmul.f32.gmra.mxu1 %v35_v34 }
  0x32   :  { %255 = vmatpush.msra.mxu3 %v190_v2  ;;  %218 = vmatpush.msra.mxu2 %v173_v3 }
  0x34   :  { %256 = vmatpush.msra.mxu3 %v189_v4  ;;  %219 = vmatpush.msra.mxu2 %v172_v5 }
  0x36   :  { %257 = vmatpush.msra.mxu3 %v188_v6  ;;  %412 = vmatpush.msrb.mxu2 %v2357_v10 }
  0x38   :  { %450 = vmatpush.msrb.mxu3 %v2373_v11  ;;  %413 = vmatpush.msrb.mxu2 %v2356_v12 }
  0x39   :  { %103 = vmatmul.f32.gmra.mxu0 %v36_v43  ;;  %141 = vmatmul.f32.gmra.mxu1 %v36_v43 }
  0x3a   :  { %451 = vmatpush.msrb.mxu3 %v2372_v13  ;;  %414 = vmatpush.msrb.mxu2 %v2355_v18 }
  0x3c   :  { %452 = vmatpush.msrb.mxu3 %v2371_v19  ;;  %415 = vmatpush.msrb.mxu2 %v2354_v22 }
  0x3e   :  { %453 = vmatpush.msrb.mxu3 %v2370_v23  ;;  %416 = vmatpush.msrb.mxu2 %v2353_v24  ;;  %v2405_v24 = vld [vmem:[%s4149_s4 + $0x278] sm:$0xff] }
  0x40   :  { %454 = vmatpush.msrb.mxu3 %v2369_v25  ;;  %417 = vmatpush.msrb.mxu2 %v2352_v26  ;;  %v2421_v25 = vld [vmem:[%s4149_s4 + $0x2f8] sm:$0xff]  ;;  %v2403_v26 = vld [vmem:[%s4149_s4 + $0x268] sm:$0xff] }
  0x41   :  { %106 = vmatmul.f32.gmra.mxu0 %v37_v52  ;;  %144 = vmatmul.f32.gmra.mxu1 %v37_v52  ;;  %v2345_v52 = vld [vmem:[%s4149_s4 + $0x118] sm:$0xff] }
  0x42   :  { %455 = vmatpush.msrb.mxu3 %v2368_v27  ;;  %418 = vmatpush.msrb.mxu2 %v2351_v32  ;;  %v2419_v27 = vld [vmem:[%s4149_s4 + $0x2e8] sm:$0xff]  ;;  %v2400_v32 = vld [vmem:[%s4149_s4 + $0x250] sm:$0xff] }
  0x44   :  { %456 = vmatpush.msrb.mxu3 %v2367_v33  ;;  %419 = vmatpush.msrb.mxu2 %v2350_v36  ;;  %v2416_v33 = vld [vmem:[%s4149_s4 + $0x2d0] sm:$0xff]  ;;  %v2399_v36 = vld [vmem:[%s4149_s4 + $0x248] sm:$0xff] }
  0x46   :  { %457 = vmatpush.msrb.mxu3 %v2366_v37  ;;  %420 = vmatpush.msrb.mxu2 %v2349_v38  ;;  %v2415_v37 = vld [vmem:[%s4149_s4 + $0x2c8] sm:$0xff]  ;;  %v2398_v38 = vld [vmem:[%s4149_s4 + $0x240] sm:$0xff] }
  0x48   :  { %458 = vmatpush.msrb.mxu3 %v2365_v39  ;;  %421 = vmatpush.msrb.mxu2 %v2348_v40  ;;  %v2414_v39 = vld [vmem:[%s4149_s4 + $0x2c0] sm:$0xff]  ;;  %v2397_v40 = vld [vmem:[%s4149_s4 + $0x238] sm:$0xff] }
  0x49   :  { %109 = vmatmul.f32.gmra.mxu0 %v38_v61  ;;  %147 = vmatmul.f32.gmra.mxu1 %v38_v61 }
  0x4a   :  { %459 = vmatpush.msrb.mxu3 %v2364_v41  ;;  %422 = vmatpush.msrb.mxu2 %v2347_v46  ;;  %v2413_v41 = vld [vmem:[%s4149_s4 + $0x2b8] sm:$0xff]  ;;  %v2394_v46 = vld [vmem:[%s4149_s4 + $0x220] sm:$0xff] }
  0x4c   :  { %460 = vmatpush.msrb.mxu3 %v2363_v47  ;;  %423 = vmatpush.msrb.mxu2 %v2346_v50  ;;  %v2410_v47 = vld [vmem:[%s4149_s4 + $0x2a0] sm:$0xff]  ;;  %v2393_v50 = vld [vmem:[%s4149_s4 + $0x218] sm:$0xff] }
  0x4e   :  { %461 = vmatpush.msrb.mxu3 %v2362_v51  ;;  %424 = vmatpush.msrb.mxu2 %v2345_v52  ;;  %v2409_v51 = vld [vmem:[%s4149_s4 + $0x298] sm:$0xff]  ;;  %v2392_v52 = vld [vmem:[%s4149_s4 + $0x210] sm:$0xff] }
  0x50   :  { %462 = vmatpush.msrb.mxu3 %v2361_v53  ;;  %425 = vmatpush.msrb.mxu2 %v2344_v54  ;;  %v2408_v53 = vld [vmem:[%s4149_s4 + $0x290] sm:$0xff]  ;;  %v2391_v54 = vld [vmem:[%s4149_s4 + $0x208] sm:$0xff] }
  0x51   :  { %112 = vmatmul.f32.gmra.mxu0 %v39_v0  ;;  %150 = vmatmul.f32.gmra.mxu1 %v39_v0 }
  0x52   :  { %463 = vmatpush.msrb.mxu3 %v2360_v55  ;;  %426 = vmatpush.msrb.mxu2 %v2343_v56  ;;  %v2407_v55 = vld [vmem:[%s4149_s4 + $0x288] sm:$0xff]  ;;  %v2390_v56 = vld [vmem:[%s4149_s4 + $0x200] sm:$0xff] }
  0x54   :  { %464 = vmatpush.msrb.mxu3 %v2359_v57  ;;  %427 = vmatpush.msrb.mxu2 %v2342_v62  ;;  %v2406_v57 = vld [vmem:[%s4149_s4 + $0x280] sm:$0xff] }
  0x56   :  { %465 = vmatpush.msrb.mxu3 %v2358_v63 }
  0x9e   :  { %v95_v14 = vpop.f32.mrf.mxu0  ;;  %v133_v15 = vpop.f32.mrf.mxu1 }
  0x9f   :  { %v96_v16 = vadd.f32 %v95_v14, %v2989_v8  ;;  %v134_v17 = vadd.f32 %v133_v15, %v2991_v9 }
  0xa1   :  { %v3013_v20 = vmax.f32 %v96_v16, 0.0  ;;  %v3015_v21 = vmax.f32 %v134_v17, 0.0 }
  0xa3   :  { %220 = vmatmul.f32.vlgmr.msra.gmra.mxu2 %v3013_v20  ;;  %258 = vmatmul.f32.vlgmr.msra.gmra.mxu3 %v3015_v21 }
  0xa4   :  { %620 = vmatpush.msra.mxu2 %v2405_v24  ;;  %658 = vmatpush.msra.mxu3 %v2421_v25 }
  0xa6   :  { %v98_v28 = vpop.f32.mrf.mxu0  ;;  %v136_v29 = vpop.f32.mrf.mxu1 }
  0xa7   :  { %v99_v30 = vadd.f32 %v98_v28, %v2989_v8  ;;  %v137_v31 = vadd.f32 %v136_v29, %v2991_v9  ;;  %v2402_v28 = vld [vmem:[%s4149_s4 + $0x260] sm:$0xff] }
  0xa8   :  { %v2418_v29 = vld [vmem:[%s4149_s4 + $0x2e0] sm:$0xff] }
  0xa9   :  { %v3045_v34 = vmax.f32 %v99_v30, 0.0  ;;  %v3047_v35 = vmax.f32 %v137_v31, 0.0  ;;  %v2401_v30 = vld [vmem:[%s4149_s4 + $0x258] sm:$0xff] }
  0xaa   :  { %v2417_v31 = vld [vmem:[%s4149_s4 + $0x2d8] sm:$0xff] }
  0xab   :  { %223 = vmatmul.f32.gmra.mxu2 %v3045_v34  ;;  %261 = vmatmul.f32.gmra.mxu3 %v3047_v35 }
  0xae   :  { %v101_v42 = vpop.f32.mrf.mxu0  ;;  %v139_v43 = vpop.f32.mrf.mxu1 }
  0xaf   :  { %v102_v44 = vadd.f32 %v101_v42, %v2989_v8  ;;  %v140_v45 = vadd.f32 %v139_v43, %v2991_v9  ;;  %v2396_v42 = vld [vmem:[%s4149_s4 + $0x230] sm:$0xff] }
  0xb0   :  { %v2412_v43 = vld [vmem:[%s4149_s4 + $0x2b0] sm:$0xff] }
  0xb1   :  { %v3077_v48 = vmax.f32 %v102_v44, 0.0  ;;  %v3079_v49 = vmax.f32 %v140_v45, 0.0  ;;  %v2395_v44 = vld [vmem:[%s4149_s4 + $0x228] sm:$0xff] }
  0xb2   :  { %v2411_v45 = vld [vmem:[%s4149_s4 + $0x2a8] sm:$0xff] }
  0xb3   :  { %226 = vmatmul.f32.gmra.mxu2 %v3077_v48  ;;  %264 = vmatmul.f32.gmra.mxu3 %v3079_v49 }
  0xb6   :  { %v104_v58 = vpop.f32.mrf.mxu0  ;;  %v142_v59 = vpop.f32.mrf.mxu1 }
  0xb7   :  { %v105_v60 = vadd.f32 %v104_v58, %v2989_v8  ;;  %v143_v61 = vadd.f32 %v142_v59, %v2991_v9 }
  0xb9   :  { %v3115_v0 = vmax.f32 %v105_v60, 0.0  ;;  %v3117_v1 = vmax.f32 %v143_v61, 0.0 }
  0xbb   :  { %229 = vmatmul.f32.gmra.mxu2 %v3115_v0  ;;  %267 = vmatmul.f32.gmra.mxu3 %v3117_v1 }
  0xbe   :  { %v107_v2 = vpop.f32.mrf.mxu0  ;;  %v145_v3 = vpop.f32.mrf.mxu1 }
  0xbf   :  { %v108_v4 = vadd.f32 %v107_v2, %v2989_v8  ;;  %v146_v5 = vadd.f32 %v145_v3, %v2991_v9 }
  0xc1   :  { %v3123_v6 = vmax.f32 %v108_v4, 0.0  ;;  %v3125_v7 = vmax.f32 %v146_v5, 0.0 }
  0xc3   :  { %232 = vmatmul.f32.gmra.mxu2 %v3123_v6  ;;  %270 = vmatmul.f32.gmra.mxu3 %v3125_v7 }
  0xc6   :  { %v110_v10 = vpop.f32.mrf.mxu0  ;;  %v148_v11 = vpop.f32.mrf.mxu1 }
  0xc7   :  { %v111_v12 = vadd.f32 %v110_v10, %v2989_v8  ;;  %v149_v13 = vadd.f32 %v148_v11, %v2991_v9 }
  0xc9   :  { %v3131_v14 = vmax.f32 %v111_v12, 0.0  ;;  %v3133_v15 = vmax.f32 %v149_v13, 0.0 }
  0xcb   :  { %235 = vmatmul.f32.gmra.mxu2 %v3131_v14  ;;  %273 = vmatmul.f32.gmra.mxu3 %v3133_v15 }
  0xce   :  { %v113_v16 = vpop.f32.mrf.mxu0  ;;  %v151_v17 = vpop.f32.mrf.mxu1 }
  0xcf   :  { %v114_v18 = vadd.f32 %v113_v16, %v2989_v8  ;;  %v152_v19 = vadd.f32 %v151_v17, %v2991_v9  ;;  %v2404_v8 = vld [vmem:[%s4149_s4 + $0x270] sm:$0xff] }
  0xd0   :  { %v2420_v9 = vld [vmem:[%s4149_s4 + $0x2f0] sm:$0xff]  ;;  %621 = vmatpush.msra.mxu2 %v2404_v8 }
  0xd1   :  { %v3139_v22 = vmax.f32 %v114_v18, 0.0  ;;  %v3141_v23 = vmax.f32 %v152_v19, 0.0  ;;  %659 = vmatpush.msra.mxu3 %v2420_v9 }
  0xd2   :  { %622 = vmatpush.msra.mxu2 %v2403_v26 }
  0xd3   :  { %238 = vmatmul.f32.gmra.mxu2 %v3139_v22  ;;  %276 = vmatmul.f32.gmra.mxu3 %v3141_v23 }
  0xd4   :  { %660 = vmatpush.msra.mxu3 %v2419_v27  ;;  %623 = vmatpush.msra.mxu2 %v2402_v28  ;;  %v280_v27 = vld [vmem:[%s4148_s3] sm:$0xff] }
  0xd5   :  { %v284_v28 = vld [vmem:[%s4148_s3 + $0x20] sm:$0xff] }
  0xd6   :  { %661 = vmatpush.msra.mxu3 %v2418_v29  ;;  %624 = vmatpush.msra.mxu2 %v2401_v30 }
  0xd8   :  { %662 = vmatpush.msra.mxu3 %v2417_v31  ;;  %625 = vmatpush.msra.mxu2 %v2400_v32  ;;  %v281_v31 = vld [vmem:[%s4148_s3 + $0x8] sm:$0xff] }
  0xd9   :  { %v285_v32 = vld [vmem:[%s4148_s3 + $0x28] sm:$0xff] }
  0xda   :  { %663 = vmatpush.msra.mxu3 %v2416_v33  ;;  %626 = vmatpush.msra.mxu2 %v2399_v36 }
  0xdb   :  { %428 = vmatmul.f32.vlgmr.msrb.gmra.mxu2 %v3013_v20  ;;  %466 = vmatmul.f32.vlgmr.msrb.gmra.mxu3 %v3015_v21 }
  0xdc   :  { %664 = vmatpush.msra.mxu3 %v2415_v37  ;;  %627 = vmatpush.msra.mxu2 %v2398_v38  ;;  %v282_v37 = vld [vmem:[%s4148_s3 + $0x10] sm:$0xff] }
  0xdd   :  { %v286_v38 = vld [vmem:[%s4148_s3 + $0x30] sm:$0xff] }
  0xde   :  { %665 = vmatpush.msra.mxu3 %v2414_v39  ;;  %628 = vmatpush.msra.mxu2 %v2397_v40 }
  0xe0   :  { %666 = vmatpush.msra.mxu3 %v2413_v41  ;;  %629 = vmatpush.msra.mxu2 %v2396_v42  ;;  %v283_v41 = vld [vmem:[%s4148_s3 + $0x18] sm:$0x3f] }
  0xe1   :  { %v287_v42 = vld [vmem:[%s4148_s3 + $0x38] sm:$0x3f] }
  0xe2   :  { %667 = vmatpush.msra.mxu3 %v2412_v43  ;;  %630 = vmatpush.msra.mxu2 %v2395_v44 }
  0xe3   :  { %431 = vmatmul.f32.gmra.mxu2 %v3045_v34  ;;  %469 = vmatmul.f32.gmra.mxu3 %v3047_v35 }
  0xe4   :  { %668 = vmatpush.msra.mxu3 %v2411_v45  ;;  %631 = vmatpush.msra.mxu2 %v2394_v46 }
  0xe6   :  { %669 = vmatpush.msra.mxu3 %v2410_v47  ;;  %632 = vmatpush.msra.mxu2 %v2393_v50 }
  0xe8   :  { %670 = vmatpush.msra.mxu3 %v2409_v51  ;;  %633 = vmatpush.msra.mxu2 %v2392_v52 }
  0xea   :  { %671 = vmatpush.msra.mxu3 %v2408_v53  ;;  %634 = vmatpush.msra.mxu2 %v2391_v54 }
  0xeb   :  { %434 = vmatmul.f32.gmra.mxu2 %v3077_v48  ;;  %472 = vmatmul.f32.gmra.mxu3 %v3079_v49 }
  0xec   :  { %672 = vmatpush.msra.mxu3 %v2407_v55  ;;  %635 = vmatpush.msra.mxu2 %v2390_v56 }
  0xee   :  { %673 = vmatpush.msra.mxu3 %v2406_v57 }
  0xf3   :  { %437 = vmatmul.f32.gmra.mxu2 %v3115_v0  ;;  %475 = vmatmul.f32.gmra.mxu3 %v3117_v1 }
  0xfb   :  { %440 = vmatmul.f32.gmra.mxu2 %v3123_v6  ;;  %478 = vmatmul.f32.gmra.mxu3 %v3125_v7 }
 0x103   :  { %443 = vmatmul.f32.gmra.mxu2 %v3131_v14  ;;  %481 = vmatmul.f32.gmra.mxu3 %v3133_v15 }
 0x10b   :  { %446 = vmatmul.f32.gmra.mxu2 %v3139_v22  ;;  %484 = vmatmul.f32.gmra.mxu3 %v3141_v23 }
 0x113   :  { %636 = vmatmul.f32.vlgmr.msra.gmra.mxu2 %v3013_v20  ;;  %674 = vmatmul.f32.vlgmr.msra.gmra.mxu3 %v3015_v21 }
 0x11b   :  { %639 = vmatmul.f32.gmra.mxu2 %v3045_v34  ;;  %677 = vmatmul.f32.gmra.mxu3 %v3047_v35 }
 0x123   :  { %642 = vmatmul.f32.gmra.mxu2 %v3077_v48  ;;  %680 = vmatmul.f32.gmra.mxu3 %v3079_v49 }
 0x126   :  { %v221_v58 = vpop.f32.mrf.mxu2  ;;  %v259_v59 = vpop.f32.mrf.mxu3 }
 0x127   :  { %v260_v26 = vadd.f32 %v259_v59, %v221_v58 }
 0x12b   :  { %645 = vmatmul.f32.gmra.mxu2 %v3115_v0  ;;  %683 = vmatmul.f32.gmra.mxu3 %v3117_v1 }
 0x12e   :  { %v224_v60 = vpop.f32.mrf.mxu2  ;;  %v262_v61 = vpop.f32.mrf.mxu3 }
 0x12f   :  { %v263_v9 = vadd.f32 %v262_v61, %v224_v60  ;;  %v2374_v60 = vld [vmem:[%s4148_s3 + $0x40] sm:$0xff] }
 0x130   :  { %v2378_v61 = vld [vmem:[%s4148_s3 + $0x60] sm:$0xff] }
 0x133   :  { %648 = vmatmul.f32.gmra.mxu2 %v3123_v6  ;;  %686 = vmatmul.f32.gmra.mxu3 %v3125_v7 }
 0x136   :  { %v227_v62 = vpop.f32.mrf.mxu2  ;;  %v265_v63 = vpop.f32.mrf.mxu3 }
 0x137   :  { %v266_v8 = vadd.f32 %v265_v63, %v227_v62 }
 0x13b   :  { %651 = vmatmul.f32.gmra.mxu2 %v3131_v14  ;;  %689 = vmatmul.f32.gmra.mxu3 %v3133_v15 }
 0x13e   :  { %v230_v2 = vpop.f32.mrf.mxu2  ;;  %v268_v3 = vpop.f32.mrf.mxu3 }
 0x13f   :  { %v269_v19 = vadd.f32 %v268_v3, %v230_v2  ;;  %v2375_v2 = vld [vmem:[%s4148_s3 + $0x48] sm:$0xff] }
 0x140   :  { %v2379_v3 = vld [vmem:[%s4148_s3 + $0x68] sm:$0xff] }
 0x143   :  { %654 = vmatmul.f32.gmra.mxu2 %v3139_v22  ;;  %692 = vmatmul.f32.gmra.mxu3 %v3141_v23 }
 0x146   :  { %v233_v4 = vpop.f32.mrf.mxu2  ;;  %v271_v5 = vpop.f32.mrf.mxu3 }
 0x147   :  { %v272_v18 = vadd.f32 %v271_v5, %v233_v4 }
 0x14e   :  { %v236_v10 = vpop.f32.mrf.mxu2  ;;  %v274_v11 = vpop.f32.mrf.mxu3 }
 0x14f   :  { %v275_v17 = vadd.f32 %v274_v11, %v236_v10  ;;  %v2376_v10 = vld [vmem:[%s4148_s3 + $0x50] sm:$0xff] }
 0x150   :  { %v2380_v11 = vld [vmem:[%s4148_s3 + $0x70] sm:$0xff] }
 0x156   :  { %v239_v12 = vpop.f32.mrf.mxu2  ;;  %v277_v13 = vpop.f32.mrf.mxu3 }
 0x157   :  { %v278_v16 = vadd.f32 %v277_v13, %v239_v12 }
 0x159   :  { %310 = vmatpush.msrb.mxu0 %v278_v16  ;;  %351 = vmatpush.msrb.mxu1 %v278_v16  ;;  %v2377_v16 = vld [vmem:[%s4148_s3 + $0x58] sm:$0x3f] }
 0x15b   :  { %311 = vmatpush.msrb.mxu0 %v275_v17  ;;  %352 = vmatpush.msrb.mxu1 %v275_v17  ;;  %v2381_v17 = vld [vmem:[%s4148_s3 + $0x78] sm:$0x3f] }
 0x15d   :  { %312 = vmatpush.msrb.mxu0 %v272_v18  ;;  %353 = vmatpush.msrb.mxu1 %v272_v18 }
 0x15e   :  { %v429_v24 = vpop.f32.mrf.mxu2  ;;  %v467_v25 = vpop.f32.mrf.mxu3 }
 0x15f   :  { %313 = vmatpush.msrb.mxu0 %v269_v19  ;;  %354 = vmatpush.msrb.mxu1 %v269_v19  ;;  %v468_v59 = vadd.f32 %v467_v25, %v429_v24 }
 0x161   :  { %314 = vmatpush.msrb.mxu0 %v266_v8  ;;  %355 = vmatpush.msrb.mxu1 %v266_v8 }
 0x163   :  { %315 = vmatpush.msrb.mxu0 %v263_v9  ;;  %356 = vmatpush.msrb.mxu1 %v263_v9 }
 0x165   :  { %316 = vmatpush.msrb.mxu0 %v260_v26  ;;  %357 = vmatpush.msrb.mxu1 %v260_v26 }
 0x166   :  { %v432_v29 = vpop.f32.mrf.mxu2  ;;  %v470_v30 = vpop.f32.mrf.mxu3  ;;  %2334 = vmatmul.msk.f32.vlgmr.msrb.gmra.mxu0 %vm288_vm0, %v280_v27  ;;  %2338 = vmatmul.msk.f32.vlgmr.msrb.gmra.mxu1 %vm288_vm0, %v284_v28 }
 0x167   :  { %v471_v58 = vadd.f32 %v470_v30, %v432_v29 }
 0x16e   :  { %v435_v33 = vpop.f32.mrf.mxu2  ;;  %v473_v36 = vpop.f32.mrf.mxu3  ;;  %2335 = vmatmul.msk.f32.gmra.mxu0 %vm288_vm0, %v281_v31  ;;  %2339 = vmatmul.msk.f32.gmra.mxu1 %vm288_vm0, %v285_v32 }
 0x16f   :  { %v474_v57 = vadd.f32 %v473_v36, %v435_v33  ;;  %v2422_v33 = vld [vmem:[%s4148_s3 + $0x80] sm:$0xff] }
 0x170   :  { %v2426_v36 = vld [vmem:[%s4148_s3 + $0xa0] sm:$0xff] }
 0x176   :  { %v438_v39 = vpop.f32.mrf.mxu2  ;;  %v476_v40 = vpop.f32.mrf.mxu3  ;;  %2336 = vmatmul.msk.f32.gmra.mxu0 %vm288_vm0, %v282_v37  ;;  %2340 = vmatmul.msk.f32.gmra.mxu1 %vm288_vm0, %v286_v38  ;;  %v2453_v37 = vld [vmem:[%s4149_s4 + $0x378] sm:$0xff] }
 0x177   :  { %v477_v54 = vadd.f32 %v476_v40, %v438_v39  ;;  %v2469_v38 = vld [vmem:[%s4149_s4 + $0x3f8] sm:$0xff]  ;;  %v2452_v39 = vld [vmem:[%s4149_s4 + $0x370] sm:$0xff] }
 0x178   :  { %v2468_v40 = vld [vmem:[%s4149_s4 + $0x3f0] sm:$0xff] }
 0x17e   :  { %v441_v43 = vpop.f32.mrf.mxu2  ;;  %v479_v44 = vpop.f32.mrf.mxu3  ;;  %2337 = vmatmul.msk.f32.gmra.mxu0 %vm288_vm0, %v283_v41  ;;  %2341 = vmatmul.msk.f32.gmra.mxu1 %vm288_vm0, %v287_v42  ;;  %v2451_v41 = vld [vmem:[%s4149_s4 + $0x368] sm:$0xff] }
 0x17f   :  { %v480_v53 = vadd.f32 %v479_v44, %v441_v43  ;;  %v2467_v42 = vld [vmem:[%s4149_s4 + $0x3e8] sm:$0xff]  ;;  %v2450_v43 = vld [vmem:[%s4149_s4 + $0x360] sm:$0xff] }
 0x180   :  { %v2466_v44 = vld [vmem:[%s4149_s4 + $0x3e0] sm:$0xff] }
 0x186   :  { %v444_v45 = vpop.f32.mrf.mxu2  ;;  %v482_v46 = vpop.f32.mrf.mxu3 }
 0x187   :  { %v483_v52 = vadd.f32 %v482_v46, %v444_v45  ;;  %v2423_v45 = vld [vmem:[%s4148_s3 + $0x88] sm:$0xff] }
 0x188   :  { %v2427_v46 = vld [vmem:[%s4148_s3 + $0xa8] sm:$0xff] }
 0x18e   :  { %v447_v47 = vpop.f32.mrf.mxu2  ;;  %v485_v50 = vpop.f32.mrf.mxu3 }
 0x18f   :  { %v486_v51 = vadd.f32 %v485_v50, %v447_v47  ;;  %v2449_v47 = vld [vmem:[%s4149_s4 + $0x358] sm:$0xff] }
 0x190   :  { %v2465_v50 = vld [vmem:[%s4149_s4 + $0x3d8] sm:$0xff] }
 0x191   :  { %518 = vmatpush.msra.mxu0 %v486_v51  ;;  %559 = vmatpush.msra.mxu1 %v486_v51  ;;  %v2448_v51 = vld [vmem:[%s4149_s4 + $0x350] sm:$0xff] }
 0x193   :  { %519 = vmatpush.msra.mxu0 %v483_v52  ;;  %560 = vmatpush.msra.mxu1 %v483_v52  ;;  %v2464_v52 = vld [vmem:[%s4149_s4 + $0x3d0] sm:$0xff] }
 0x195   :  { %520 = vmatpush.msra.mxu0 %v480_v53  ;;  %561 = vmatpush.msra.mxu1 %v480_v53  ;;  %v2447_v53 = vld [vmem:[%s4149_s4 + $0x348] sm:$0xff] }
 0x196   :  { %v637_v55 = vpop.f32.mrf.mxu2  ;;  %v675_v56 = vpop.f32.mrf.mxu3 }
 0x197   :  { %521 = vmatpush.msra.mxu0 %v477_v54  ;;  %562 = vmatpush.msra.mxu1 %v477_v54  ;;  %v676_v32 = vadd.f32 %v675_v56, %v637_v55  ;;  %v2463_v54 = vld [vmem:[%s4149_s4 + $0x3c8] sm:$0xff]  ;;  %v2446_v55 = vld [vmem:[%s4149_s4 + $0x340] sm:$0xff] }
 0x198   :  { %v2462_v56 = vld [vmem:[%s4149_s4 + $0x3c0] sm:$0xff] }
 0x199   :  { %522 = vmatpush.msra.mxu0 %v474_v57  ;;  %563 = vmatpush.msra.mxu1 %v474_v57  ;;  %v2424_v57 = vld [vmem:[%s4148_s3 + $0x90] sm:$0xff] }
 0x19b   :  { %523 = vmatpush.msra.mxu0 %v471_v58  ;;  %564 = vmatpush.msra.mxu1 %v471_v58  ;;  %v2428_v58 = vld [vmem:[%s4148_s3 + $0xb0] sm:$0xff] }
 0x19d   :  { %524 = vmatpush.msra.mxu0 %v468_v59  ;;  %565 = vmatpush.msra.mxu1 %v468_v59  ;;  %v2445_v59 = vld [vmem:[%s4149_s4 + $0x338] sm:$0xff] }
 0x19e   :  { %2382 = vmatmul.msk.f32.vlgmr.msra.gmra.mxu0 %vm288_vm0, %v2374_v60  ;;  %2386 = vmatmul.msk.f32.vlgmr.msra.gmra.mxu1 %vm288_vm0, %v2378_v61  ;;  %v640_v62 = vpop.f32.mrf.mxu2  ;;  %v678_v63 = vpop.f32.mrf.mxu3  ;;  %v2461_v60 = vld [vmem:[%s4149_s4 + $0x3b8] sm:$0xff]  ;;  %v2444_v61 = vld [vmem:[%s4149_s4 + $0x330] sm:$0xff] }
 0x19f   :  { %v679_v31 = vadd.f32 %v678_v63, %v640_v62  ;;  %v2460_v62 = vld [vmem:[%s4149_s4 + $0x3b0] sm:$0xff]  ;;  %v2443_v63 = vld [vmem:[%s4149_s4 + $0x328] sm:$0xff] }
 0x1a6   :  { %2383 = vmatmul.msk.f32.gmra.mxu0 %vm288_vm0, %v2375_v2  ;;  %2387 = vmatmul.msk.f32.gmra.mxu1 %vm288_vm0, %v2379_v3  ;;  %v643_v4 = vpop.f32.mrf.mxu2  ;;  %v681_v5 = vpop.f32.mrf.mxu3  ;;  %v2459_v2 = vld [vmem:[%s4149_s4 + $0x3a8] sm:$0xff]  ;;  %v2442_v3 = vld [vmem:[%s4149_s4 + $0x320] sm:$0xff] }
 0x1a7   :  { %v682_v30 = vadd.f32 %v681_v5, %v643_v4  ;;  %v2458_v4 = vld [vmem:[%s4149_s4 + $0x3a0] sm:$0xff]  ;;  %v2425_v5 = vld [vmem:[%s4148_s3 + $0x98] sm:$0x3f] }
 0x1ae   :  { %2384 = vmatmul.msk.f32.gmra.mxu0 %vm288_vm0, %v2376_v10  ;;  %2388 = vmatmul.msk.f32.gmra.mxu1 %vm288_vm0, %v2380_v11  ;;  %v646_v12 = vpop.f32.mrf.mxu2  ;;  %v684_v13 = vpop.f32.mrf.mxu3  ;;  %v2429_v10 = vld [vmem:[%s4148_s3 + $0xb8] sm:$0x3f] }
 0x1af   :  { %v685_v29 = vadd.f32 %v684_v13, %v646_v12  ;;  %v2441_v11 = vld [vmem:[%s4149_s4 + $0x318] sm:$0xff]  ;;  %v2440_v13 = vld [vmem:[%s4149_s4 + $0x310] sm:$0xff] }
 0x1b0   :  { %v2457_v12 = vld [vmem:[%s4149_s4 + $0x398] sm:$0xff] }
 0x1b6   :  { %2385 = vmatmul.msk.f32.gmra.mxu0 %vm288_vm0, %v2377_v16  ;;  %2389 = vmatmul.msk.f32.gmra.mxu1 %vm288_vm0, %v2381_v17  ;;  %v649_v18 = vpop.f32.mrf.mxu2  ;;  %v687_v19 = vpop.f32.mrf.mxu3  ;;  %v2456_v16 = vld [vmem:[%s4149_s4 + $0x390] sm:$0xff]  ;;  %v2439_v17 = vld [vmem:[%s4149_s4 + $0x308] sm:$0xff] }
 0x1b7   :  { %v688_v28 = vadd.f32 %v687_v19, %v649_v18  ;;  %v2455_v18 = vld [vmem:[%s4149_s4 + $0x388] sm:$0xff]  ;;  %v2438_v19 = vld [vmem:[%s4149_s4 + $0x300] sm:$0xff] }
 0x1be   :  { %v652_v24 = vpop.f32.mrf.mxu2  ;;  %v690_v25 = vpop.f32.mrf.mxu3 }
 0x1bf   :  { %v691_v27 = vadd.f32 %v690_v25, %v652_v24  ;;  %v2454_v24 = vld [vmem:[%s4149_s4 + $0x380] sm:$0xff] }
 0x1c6   :  { %v655_v8 = vpop.f32.mrf.mxu2  ;;  %v693_v9 = vpop.f32.mrf.mxu3 }
 0x1c7   :  { %v694_v26 = vadd.f32 %v693_v9, %v655_v8 }
 0x1c9   :  { %726 = vmatpush.msrb.mxu0 %v694_v26  ;;  %767 = vmatpush.msrb.mxu1 %v694_v26 }
 0x1cb   :  { %727 = vmatpush.msrb.mxu0 %v691_v27  ;;  %768 = vmatpush.msrb.mxu1 %v691_v27 }
 0x1cd   :  { %728 = vmatpush.msrb.mxu0 %v688_v28  ;;  %769 = vmatpush.msrb.mxu1 %v688_v28 }
 0x1cf   :  { %729 = vmatpush.msrb.mxu0 %v685_v29  ;;  %770 = vmatpush.msrb.mxu1 %v685_v29 }
 0x1d1   :  { %730 = vmatpush.msrb.mxu0 %v682_v30  ;;  %771 = vmatpush.msrb.mxu1 %v682_v30 }
 0x1d3   :  { %731 = vmatpush.msrb.mxu0 %v679_v31  ;;  %772 = vmatpush.msrb.mxu1 %v679_v31  ;;  %v169_v31 = vld [vmem:[%s4150_s5 + $0x8] sm:$0xff] }
 0x1d5   :  { %732 = vmatpush.msrb.mxu0 %v676_v32  ;;  %773 = vmatpush.msrb.mxu1 %v676_v32 }
 0x1d6   :  { %2430 = vmatmul.msk.f32.vlgmr.msrb.gmra.mxu0 %vm288_vm0, %v2422_v33  ;;  %2434 = vmatmul.msk.f32.vlgmr.msrb.gmra.mxu1 %vm288_vm0, %v2426_v36 }
 0x1d7   :  { %828 = vmatpush.msra.mxu0 %v2453_v37  ;;  %866 = vmatpush.msra.mxu1 %v2469_v38 }
 0x1d9   :  { %829 = vmatpush.msra.mxu0 %v2452_v39  ;;  %867 = vmatpush.msra.mxu1 %v2468_v40 }
 0x1db   :  { %830 = vmatpush.msra.mxu0 %v2451_v41  ;;  %868 = vmatpush.msra.mxu1 %v2467_v42  ;;  %v170_v42 = vld [vmem:[%s4150_s5 + $0x10] sm:$0xff] }
 0x1dd   :  { %831 = vmatpush.msra.mxu0 %v2450_v43  ;;  %869 = vmatpush.msra.mxu1 %v2466_v44 }
 0x1de   :  { %2431 = vmatmul.msk.f32.gmra.mxu0 %vm288_vm0, %v2423_v45  ;;  %2435 = vmatmul.msk.f32.gmra.mxu1 %vm288_vm0, %v2427_v46 }
 0x1df   :  { %832 = vmatpush.msra.mxu0 %v2449_v47  ;;  %870 = vmatpush.msra.mxu1 %v2465_v50 }
 0x1e1   :  { %833 = vmatpush.msra.mxu0 %v2448_v51  ;;  %871 = vmatpush.msra.mxu1 %v2464_v52 }
 0x1e3   :  { %834 = vmatpush.msra.mxu0 %v2447_v53  ;;  %872 = vmatpush.msra.mxu1 %v2463_v54  ;;  %v3465_v25 = vpop.f32.mrf.mxu0  ;;  %v359_v8 = vpop.f32.mrf.mxu1  ;;  %v171_v53 = vld [vmem:[%s4150_s5 + $0x18] sm:$0x3f] }
 0x1e5   :  { %835 = vmatpush.msra.mxu0 %v2446_v55  ;;  %873 = vmatpush.msra.mxu1 %v2462_v56 }
 0x1e6   :  { %2432 = vmatmul.msk.f32.gmra.mxu0 %vm288_vm0, %v2424_v57  ;;  %2436 = vmatmul.msk.f32.gmra.mxu1 %vm288_vm0, %v2428_v58 }
 0x1e7   :  { %836 = vmatpush.msra.mxu0 %v2445_v59  ;;  %874 = vmatpush.msra.mxu1 %v2461_v60 }
 0x1e9   :  { %837 = vmatpush.msra.mxu0 %v2444_v61  ;;  %875 = vmatpush.msra.mxu1 %v2460_v62 }
 0x1eb   :  { %838 = vmatpush.msra.mxu0 %v2443_v63  ;;  %876 = vmatpush.msra.mxu1 %v2459_v2  ;;  %v321_v9 = vpop.f32.mrf.mxu0  ;;  %v362_v26 = vpop.f32.mrf.mxu1 }
 0x1ec   :  { %v372_v32 = vadd.f32 %v321_v9, %v169_v31  ;;  %v376_v33 = vadd.f32 %v362_v26, %v169_v31 }
 0x1ed   :  { %839 = vmatpush.msra.mxu0 %v2442_v3  ;;  %877 = vmatpush.msra.mxu1 %v2458_v4 }
 0x1ee   :  { %2433 = vmatmul.msk.f32.gmra.mxu0 %vm288_vm0, %v2425_v5  ;;  %2437 = vmatmul.msk.f32.gmra.mxu1 %vm288_vm0, %v2429_v10 }
 0x1ef   :  { %840 = vmatpush.msra.mxu0 %v2441_v11  ;;  %878 = vmatpush.msra.mxu1 %v2457_v12 }
 0x1f1   :  { %841 = vmatpush.msra.mxu0 %v2440_v13  ;;  %879 = vmatpush.msra.mxu1 %v2456_v16 }
 0x1f3   :  { %842 = vmatpush.msra.mxu0 %v2439_v17  ;;  %880 = vmatpush.msra.mxu1 %v2455_v18 }
 0x1f5   :  { %843 = vmatpush.msra.mxu0 %v2438_v19  ;;  %881 = vmatpush.msra.mxu1 %v2454_v24 }
 0x1f6   :  { %844 = vmatmul.f32.vlgmr.msra.gmra.mxu0 %v3013_v20  ;;  %882 = vmatmul.f32.vlgmr.msra.gmra.mxu1 %v3015_v21  ;;  %v324_v20 = vpop.f32.mrf.mxu0  ;;  %v365_v21 = vpop.f32.mrf.mxu1 }
 0x1f7   :  { %v373_v43 = vadd.f32 %v324_v20, %v170_v42  ;;  %v377_v44 = vadd.f32 %v365_v21, %v170_v42 }
 0x1fe   :  { %847 = vmatmul.f32.gmra.mxu0 %v3045_v34  ;;  %885 = vmatmul.f32.gmra.mxu1 %v3047_v35  ;;  %v327_v34 = vpop.f32.mrf.mxu0  ;;  %v368_v35 = vpop.f32.mrf.mxu1 }
 0x1ff   :  { %v374_v54 = vadd.f32 %v327_v34, %v171_v53  ;;  %v378_v55 = vadd.f32 %v368_v35, %v171_v53  ;;  %v2470_v35 = vld [vmem:[%s4148_s3 + $0xc0] sm:$0xff] }
 0x200   :  { %v2486_v53 = vld [vmem:[%s4151_s6 + $0x20] sm:$0xff] }
 0x206   :  { %850 = vmatmul.f32.gmra.mxu0 %v3077_v48  ;;  %888 = vmatmul.f32.gmra.mxu1 %v3079_v49 }
 0x20e   :  { %853 = vmatmul.f32.gmra.mxu0 %v3115_v0  ;;  %891 = vmatmul.f32.gmra.mxu1 %v3117_v1 }
 0x216   :  { %856 = vmatmul.f32.gmra.mxu0 %v3123_v6  ;;  %894 = vmatmul.f32.gmra.mxu1 %v3125_v7 }
 0x21b   :  { %v3477_v48 = vpop.f32.mrf.mxu0  ;;  %v567_v49 = vpop.f32.mrf.mxu1 }
 0x21e   :  { %859 = vmatmul.f32.gmra.mxu0 %v3131_v14  ;;  %897 = vmatmul.f32.gmra.mxu1 %v3133_v15  ;;  %v3482_v14 = vld [vmem:[%s4150_s5] sm:$0xff] }
 0x21f   :  { %v375_v15 = vadd.f32 %v359_v8, %v3482_v14 }
 0x221   :  { %v583_v29 = vadd.f32 %v567_v49, %v375_v15  ;;  %v2474_v49 = vld [vmem:[%s4148_s3 + $0xe0] sm:$0xff]  ;;  %v2713_v15 = vmov 1  }
 0x222   :  { %2572 = vset.pattern.permute.xlu2 %v2713_v15 }
 0x223   :  { %v529_v0 = vpop.f32.mrf.mxu0  ;;  %v570_v1 = vpop.f32.mrf.mxu1 }
 0x224   :  { %v580_v36 = vadd.f32 %v529_v0, %v372_v32  ;;  %v584_v37 = vadd.f32 %v570_v1, %v376_v33  ;;  %v2471_v0 = vld [vmem:[%s4148_s3 + $0xc8] sm:$0xff] }
 0x225   :  { %v2475_v1 = vld [vmem:[%s4148_s3 + $0xe8] sm:$0xff] }
 0x226   :  { %862 = vmatmul.f32.gmra.mxu0 %v3139_v22  ;;  %900 = vmatmul.f32.gmra.mxu1 %v3141_v23 }
 0x22b   :  { %v532_v6 = vpop.f32.mrf.mxu0  ;;  %v573_v27 = vpop.f32.mrf.mxu1 }
 0x22c   :  { %v581_v45 = vadd.f32 %v532_v6, %v373_v43  ;;  %v585_v46 = vadd.f32 %v573_v27, %v377_v44  ;;  %v2472_v6 = vld [vmem:[%s4148_s3 + $0xd0] sm:$0xff]  ;;  %v2715_v43 = vmov 2  }
 0x22d   :  { %v2476_v27 = vld [vmem:[%s4148_s3 + $0xf0] sm:$0xff] }
 0x233   :  { %v535_v7 = vpop.f32.mrf.mxu0  ;;  %v576_v28 = vpop.f32.mrf.mxu1 }
 0x234   :  { %v582_v56 = vadd.f32 %v535_v7, %v374_v54  ;;  %v586_v57 = vadd.f32 %v576_v28, %v378_v55  ;;  %v2473_v7 = vld [vmem:[%s4148_s3 + $0xd8] sm:$0x3f]  ;;  %v1003_v54 = vld [vmem:[%s4151_s6] sm:$0xff] }
 0x235   :  { %v2477_v28 = vld [vmem:[%s4148_s3 + $0xf8] sm:$0x3f] }
 0x253   :  { %v3485_v22 = vpop.f32.mrf.mxu0  ;;  %v775_v23 = vpop.f32.mrf.mxu1 }
 0x254   :  { %v3487_v30 = vadd.f32 %v775_v23, %v583_v29  ;;  %v2714_v29 = vmov 0   ;;  %v371_v23 = vadd.f32 %v3465_v25, %v3482_v14  ;;  %v2716_v25 = vmov 3  }
 0x255   :  { %2571 = vset.pattern.permute.xlu1 %v2714_v29  ;;  %2570 = vset.pattern.permute.xlu0 %v2714_v29  ;;  %v2718_v14 = vmov 5  }
 0x256   :  { %v579_v31 = vadd.f32 %v3477_v48, %v371_v23  ;;  %v2717_v48 = vmov 4  }
 0x258   :  { %v787_v32 = vadd.f32 %v3485_v22, %v579_v31  ;;  %v2719_v22 = vmov 6  }
 0x25b   :  { %v737_v38 = vpop.f32.mrf.mxu0  ;;  %v778_v39 = vpop.f32.mrf.mxu1 }
 0x25c   :  { %v3492_v40 = vadd.f32 %v737_v38, %v580_v36  ;;  %v3494_v41 = vadd.f32 %v778_v39, %v584_v37 }
 0x263   :  { %v740_v47 = vpop.f32.mrf.mxu0  ;;  %v781_v50 = vpop.f32.mrf.mxu1 }
 0x264   :  { %v3499_v51 = vadd.f32 %v740_v47, %v581_v45  ;;  %v3501_v52 = vadd.f32 %v781_v50, %v585_v46 }
 0x26b   :  { %v743_v58 = vpop.f32.mrf.mxu0  ;;  %v784_v59 = vpop.f32.mrf.mxu1 }
 0x26c   :  { %v3506_v60 = vadd.f32 %v743_v58, %v582_v56  ;;  %v3508_v61 = vadd.f32 %v784_v59, %v586_v57 }
 0x273   :  { %v845_v62 = vpop.f32.mrf.mxu0  ;;  %v883_v63 = vpop.f32.mrf.mxu1 }
 0x274   :  { %v884_v34 = vadd.f32 %v883_v63, %v845_v62  ;;  %v2490_v63 = vld [vmem:[%s4151_s6 + $0x40] sm:$0xff] }
 0x27b   :  { %v848_v2 = vpop.f32.mrf.mxu0  ;;  %v886_v3 = vpop.f32.mrf.mxu1 }
 0x27c   :  { %v887_v21 = vadd.f32 %v886_v3, %v848_v2 }
 0x283   :  { %v851_v4 = vpop.f32.mrf.mxu0  ;;  %v889_v5 = vpop.f32.mrf.mxu1 }
 0x284   :  { %v890_v20 = vadd.f32 %v889_v5, %v851_v4 }
 0x28b   :  { %v854_v10 = vpop.f32.mrf.mxu0  ;;  %v892_v11 = vpop.f32.mrf.mxu1 }
 0x28c   :  { %v893_v26 = vadd.f32 %v892_v11, %v854_v10 }
 0x293   :  { %v857_v12 = vpop.f32.mrf.mxu0  ;;  %v895_v13 = vpop.f32.mrf.mxu1 }
 0x294   :  { %v896_v9 = vadd.f32 %v895_v13, %v857_v12 }
 0x29b   :  { %v860_v16 = vpop.f32.mrf.mxu0  ;;  %v898_v17 = vpop.f32.mrf.mxu1 }
 0x29c   :  { %v899_v8 = vadd.f32 %v898_v17, %v860_v16 }
 0x2a3   :  { %v863_v18 = vpop.f32.mrf.mxu0  ;;  %v901_v19 = vpop.f32.mrf.mxu1 }
 0x2a4   :  { %v902_v24 = vadd.f32 %v901_v19, %v863_v18 }
 0x2a6   :  { %934 = vmatpush.msrb.mxu2 %v902_v24  ;;  %975 = vmatpush.msrb.mxu3 %v902_v24 }
 0x2a8   :  { %935 = vmatpush.msrb.mxu2 %v899_v8  ;;  %976 = vmatpush.msrb.mxu3 %v899_v8 }
 0x2aa   :  { %936 = vmatpush.msrb.mxu2 %v896_v9  ;;  %977 = vmatpush.msrb.mxu3 %v896_v9 }
 0x2ac   :  { %937 = vmatpush.msrb.mxu2 %v893_v26  ;;  %978 = vmatpush.msrb.mxu3 %v893_v26 }
 0x2ae   :  { %938 = vmatpush.msrb.mxu2 %v890_v20  ;;  %979 = vmatpush.msrb.mxu3 %v890_v20 }
 0x2b0   :  { %939 = vmatpush.msrb.mxu2 %v887_v21  ;;  %980 = vmatpush.msrb.mxu3 %v887_v21 }
 0x2b2   :  { %940 = vmatpush.msrb.mxu2 %v884_v34  ;;  %981 = vmatpush.msrb.mxu3 %v884_v34  ;;  %v2498_v34 = vld [vmem:[%s4151_s6 + $0x80] sm:$0xff] }
 0x2b3   :  { %2478 = vmatmul.msk.f32.vlgmr.msrb.gmra.mxu2 %vm288_vm0, %v2470_v35  ;;  %2482 = vmatmul.msk.f32.vlgmr.msrb.gmra.mxu3 %vm288_vm0, %v2474_v49 }
 0x2bb   :  { %2479 = vmatmul.msk.f32.gmra.mxu2 %vm288_vm0, %v2471_v0  ;;  %2483 = vmatmul.msk.f32.gmra.mxu3 %vm288_vm0, %v2475_v1 }
 0x2c3   :  { %2480 = vmatmul.msk.f32.gmra.mxu2 %vm288_vm0, %v2472_v6  ;;  %2484 = vmatmul.msk.f32.gmra.mxu3 %vm288_vm0, %v2476_v27 }
 0x2cb   :  { %2481 = vmatmul.msk.f32.gmra.mxu2 %vm288_vm0, %v2473_v7  ;;  %2485 = vmatmul.msk.f32.gmra.mxu3 %vm288_vm0, %v2477_v28 }
 0x336   :  { %v942_v33 = vpop.f32.mrf.mxu2  ;;  %v983_v36 = vpop.f32.mrf.mxu3 }
 0x337   :  { %v995_v37 = vadd.f32 %v942_v33, %v787_v32  ;;  %v999_v38 = vadd.f32 %v983_v36, %v3487_v30  ;;  %v2720_v30 = vmov 7  }
 0x339   :  { %1029 = vperm.xlu1 %2571, %v999_v38   ;;  %1061 = vperm.xlu2 %2572, %v995_v37  }
 0x33a   :  { %1009 = vperm.xlu0 %2570, %v995_v37  }
 0x33e   :  { %v945_v39 = vpop.f32.mrf.mxu2 }
 0x33f   :  { %v996_v42 = vadd.f32 %v945_v39, %v3492_v40  ;;  %v986_v40 = vpop.f32.mrf.mxu3  ;;  %v2506_v39 = vld [vmem:[%s4151_s6 + $0xc0] sm:$0xff] }
 0x340   :  { %v3569_v44 = vadd.f32 %v986_v40, %v3494_v41 }
 0x341   :  { %2574 = vset.pattern.permute.xlu1 %v2715_v43  ;;  %1065 = vperm.xlu2 %2572, %v996_v42  }
 0x342   :  { %2573 = vset.pattern.permute.xlu0 %v2713_v15  ;;  %1114 = vperm.xlu1 %2574, %v995_v37  }
 0x343   :  { %1077 = vperm.xlu0 %2573, %v999_v38  }
 0x346   :  { %v948_v45 = vpop.f32.mrf.mxu2 }
 0x347   :  { %v3576_v46 = vadd.f32 %v948_v45, %v3499_v51  ;;  %v989_v41 = vpop.f32.mrf.mxu3 }
 0x348   :  { %v3585_v47 = vadd.f32 %v989_v41, %v3501_v52  ;;  %v2510_v41 = vld [vmem:[%s4151_s6 + $0xe0] sm:$0xff] }
 0x349   :  { %2589 = vset.pattern.permute.xlu2 %v2715_v43 }
 0x34a   :  { %2576 = vset.pattern.permute.xlu1 %v2716_v25  ;;  %1118 = vperm.xlu2 %2589, %v996_v42  }
 0x34b   :  { %2575 = vset.pattern.permute.xlu0 %v2715_v43  ;;  %1167 = vperm.xlu1 %2576, %v995_v37  }
 0x34c   :  { %1130 = vperm.xlu0 %2575, %v999_v38  }
 0x34e   :  { %v951_v21 = vpop.f32.mrf.mxu2 }
 0x34f   :  { %v992_v2 = vpop.f32.mrf.mxu3  ;;  %v3657_v35 = vadd.f32 %v951_v21, %v3506_v60  ;;  %v2502_v60 = vld [vmem:[%s4151_s6 + $0xa0] sm:$0xff] }
 0x350   :  { %v3633_v10 = vadd.f32 %v992_v2, %v3508_v61  ;;  %v2494_v61 = vld [vmem:[%s4151_s6 + $0x60] sm:$0xff] }
 0x352   :  { %2591 = vset.pattern.permute.xlu2 %v2716_v25 }
 0x353   :  { %2578 = vset.pattern.permute.xlu1 %v2717_v48  ;;  %1171 = vperm.xlu2 %2591, %v996_v42  }
 0x354   :  { %2577 = vset.pattern.permute.xlu0 %v2716_v25  ;;  %1220 = vperm.xlu1 %2578, %v995_v37  }
 0x355   :  { %1183 = vperm.xlu0 %2577, %v999_v38  }
 0x35b   :  { %2593 = vset.pattern.permute.xlu2 %v2717_v48 }
 0x35c   :  { %2580 = vset.pattern.permute.xlu1 %v2718_v14  ;;  %1224 = vperm.xlu2 %2593, %v996_v42  }
 0x35d   :  { %2579 = vset.pattern.permute.xlu0 %v2717_v48  ;;  %1273 = vperm.xlu1 %2580, %v995_v37  }
 0x35e   :  { %1236 = vperm.xlu0 %2579, %v999_v38  }
 0x364   :  { %2595 = vset.pattern.permute.xlu2 %v2718_v14 }
 0x365   :  { %2582 = vset.pattern.permute.xlu1 %v2719_v22  ;;  %1277 = vperm.xlu2 %2595, %v996_v42  }
 0x366   :  { %2581 = vset.pattern.permute.xlu0 %v2718_v14  ;;  %1326 = vperm.xlu1 %2582, %v995_v37  }
 0x367   :  { %1289 = vperm.xlu0 %2581, %v999_v38  }
 0x36d   :  { %2597 = vset.pattern.permute.xlu2 %v2719_v22 }
 0x36e   :  { %2584 = vset.pattern.permute.xlu1 %v2720_v30  ;;  %1330 = vperm.xlu2 %2597, %v996_v42  }
 0x36f   :  { %2583 = vset.pattern.permute.xlu0 %v2719_v22  ;;  %1379 = vperm.xlu1 %2584, %v995_v37  }
 0x370   :  { %1342 = vperm.xlu0 %2583, %v999_v38  }
 0x376   :  { %2599 = vset.pattern.permute.xlu2 %v2720_v30 }
 0x377   :  { %2587 = vset.pattern.permute.xlu1 %v2714_v29  ;;  %1383 = vperm.xlu2 %2599, %v996_v42  }
 0x378   :  { %2585 = vset.pattern.permute.xlu0 %v2720_v30  ;;  %1034 = vperm.xlu1 %2587, %v3569_v44  }
 0x379   :  { %1395 = vperm.xlu0 %2585, %v999_v38  }
 0x37f   :  { %2601 = vset.pattern.permute.xlu2 %v2714_v29 }
 0x380   :  { %2588 = vset.pattern.permute.xlu1 %v2713_v15  ;;  %1019 = vperm.xlu2 %2601, %v3576_v46  }
 0x381   :  { %2586 = vset.pattern.permute.xlu0 %v2714_v29  ;;  %1081 = vperm.xlu1 %2588, %v3569_v44  }
 0x382   :  { %1014 = vperm.xlu0 %2586, %v996_v42  }
 0x388   :  { %2603 = vset.pattern.permute.xlu2 %v2713_v15 }
 0x389   :  { %2590 = vset.pattern.permute.xlu1 %v2715_v43  ;;  %1069 = vperm.xlu2 %2603, %v3576_v46  }
 0x38a   :  { %2604 = vset.pattern.permute.xlu0 %v2713_v15  ;;  %1134 = vperm.xlu1 %2590, %v3569_v44  }
 0x38b   :  { %1085 = vperm.xlu0 %2604, %v3585_v47  }
 0x391   :  { %2606 = vset.pattern.permute.xlu2 %v2715_v43 }
 0x392   :  { %2592 = vset.pattern.permute.xlu1 %v2716_v25  ;;  %1138 = vperm.xlu2 %2606, %v3585_v47  }
 0x393   :  { %2608 = vset.pattern.permute.xlu0 %v2716_v25  ;;  %1187 = vperm.xlu1 %2592, %v3569_v44   ;;  %v1062_v50 = vpop.permute.xlu2 %1061 }
 0x394   :  { %1191 = vperm.xlu0 %2608, %v3585_v47   ;;  %v1092_v57 = vmul.f32 %v2486_v53, %v1062_v50 }
 0x39a   :  { %2607 = vset.pattern.permute.xlu2 %v2716_v25 }
 0x39b   :  { %2594 = vset.pattern.permute.xlu1 %v2717_v48  ;;  %v3600_v51 = vpop.permute.xlu2 %1065  ;;  %1175 = vperm.xlu2 %2607, %v3576_v46  }
 0x39c   :  { %2610 = vset.pattern.permute.xlu0 %v2717_v48  ;;  %1240 = vperm.xlu1 %2594, %v3569_v44  }
 0x39d   :  { %1244 = vperm.xlu0 %2610, %v3585_v47  }
 0x3a3   :  { %2609 = vset.pattern.permute.xlu2 %v2717_v48 }
 0x3a4   :  { %2596 = vset.pattern.permute.xlu1 %v2718_v14  ;;  %v3608_v52 = vpop.permute.xlu2 %1118  ;;  %1228 = vperm.xlu2 %2609, %v3576_v46  }
 0x3a5   :  { %2612 = vset.pattern.permute.xlu0 %v2718_v14  ;;  %1293 = vperm.xlu1 %2596, %v3569_v44  }
 0x3a6   :  { %1297 = vperm.xlu0 %2612, %v3585_v47  }
 0x3ab   :  { %v1030_v55 = vpop.permute.xlu1 %1029 }
 0x3ac   :  { %v1010_v56 = vpop.permute.xlu0 %1009  ;;  %2611 = vset.pattern.permute.xlu2 %v2718_v14  ;;  %v1051_v11 = vmul.f32 %v1030_v55, %v1003_v54 }
 0x3ad   :  { %v1047_v58 = vmul.f32 %v1010_v56, %v1003_v54  ;;  %2598 = vset.pattern.permute.xlu1 %v2719_v22  ;;  %v3622_v59 = vpop.permute.xlu2 %1171  ;;  %1281 = vperm.xlu2 %2611, %v3576_v46  }
 0x3ae   :  { %2614 = vset.pattern.permute.xlu0 %v2719_v22  ;;  %1346 = vperm.xlu1 %2598, %v3569_v44  }
 0x3af   :  { %v1100_v62 = vadd.f32 %v1092_v57, %v1047_v58  ;;  %1350 = vperm.xlu0 %2614, %v3585_v47  }
 0x3b4   :  { %v1115_v3 = vpop.permute.xlu1 %1114 }
 0x3b5   :  { %v1145_v4 = vmul.f32 %v2490_v63, %v1115_v3  ;;  %v1078_v5 = vpop.permute.xlu0 %1077  ;;  %2613 = vset.pattern.permute.xlu2 %v2719_v22 }
 0x3b6   :  { %v1096_v12 = vmul.f32 %v2486_v53, %v1078_v5  ;;  %2600 = vset.pattern.permute.xlu1 %v2720_v30  ;;  %v3636_v13 = vpop.permute.xlu2 %1224  ;;  %1334 = vperm.xlu2 %2613, %v3576_v46  }
 0x3b7   :  { %v1153_v16 = vadd.f32 %v1145_v4, %v1100_v62  ;;  %2619 = vset.pattern.permute.xlu0 %v2713_v15  ;;  %1399 = vperm.xlu1 %2600, %v3569_v44  }
 0x3b8   :  { %v1104_v17 = vadd.f32 %v1096_v12, %v1051_v11  ;;  %1089 = vperm.xlu0 %2619, %v3633_v10   ;;  %v1004_v12 = vld [vmem:[%s4151_s6 + $0x8] sm:$0xff] }
 0x3bd   :  { %v1168_v18 = vpop.permute.xlu1 %1167 }
 0x3be   :  { %v1198_v19 = vmul.f32 %v2494_v61, %v1168_v18  ;;  %v1131_v24 = vpop.permute.xlu0 %1130  ;;  %2615 = vset.pattern.permute.xlu2 %v2720_v30 }
 0x3bf   :  { %v1149_v8 = vmul.f32 %v2490_v63, %v1131_v24  ;;  %2602 = vset.pattern.permute.xlu1 %v2714_v29  ;;  %v3647_v9 = vpop.permute.xlu2 %1277  ;;  %1387 = vperm.xlu2 %2615, %v3576_v46  }
 0x3c0   :  { %v1206_v26 = vadd.f32 %v1198_v19, %v1153_v16  ;;  %2630 = vset.pattern.permute.xlu0 %v2720_v30  ;;  %1039 = vperm.xlu1 %2602, %v3585_v47   ;;  %v2487_v16 = vld [vmem:[%s4151_s6 + $0x28] sm:$0xff] }
 0x3c1   :  { %v1157_v20 = vadd.f32 %v1149_v8, %v1104_v17  ;;  %1403 = vperm.xlu0 %2630, %v3585_v47   ;;  %v3687_v47 = vld [vmem:[%s4151_s6 + $0x10] sm:$0xff]  ;;  %v1093_v24 = vmul.f32 %v2487_v16, %v3600_v51 }
 0x3c6   :  { %v1221_v49 = vpop.permute.xlu1 %1220 }
 0x3c7   :  { %v1251_v0 = vmul.f32 %v2498_v34, %v1221_v49  ;;  %v1184_v1 = vpop.permute.xlu0 %1183  ;;  %2616 = vset.pattern.permute.xlu2 %v2714_v29  ;;  %v2499_v49 = vld [vmem:[%s4151_s6 + $0x88] sm:$0xff] }
 0x3c8   :  { %v1202_v6 = vmul.f32 %v2494_v61, %v1184_v1  ;;  %2605 = vset.pattern.permute.xlu1 %v2715_v43  ;;  %v3661_v27 = vpop.permute.xlu2 %1330  ;;  %1024 = vperm.xlu2 %2616, %v3657_v35   ;;  %v2503_v1 = vld [vmem:[%s4151_s6 + $0xa8] sm:$0xff] }
 0x3c9   :  { %v1259_v7 = vadd.f32 %v1251_v0, %v1206_v26  ;;  %1122 = vperm.xlu1 %2605, %v3576_v46   ;;  %v2495_v26 = vld [vmem:[%s4151_s6 + $0x68] sm:$0xff] }
 0x3ca   :  { %v1210_v28 = vadd.f32 %v1202_v6, %v1157_v20  ;;  %v1199_v51 = vmul.f32 %v2495_v26, %v3622_v59  ;;  %v1252_v6 = vmul.f32 %v2499_v49, %v3636_v13  ;;  %v2511_v59 = vld [vmem:[%s4151_s6 + $0xe8] sm:$0xff] }
 0x3cf   :  { %v1274_v23 = vpop.permute.xlu1 %1273 }
 0x3d0   :  { %v1304_v31 = vmul.f32 %v2502_v60, %v1274_v23  ;;  %v1237_v32 = vpop.permute.xlu0 %1236  ;;  %2618 = vset.pattern.permute.xlu2 %v2713_v15 }
 0x3d1   :  { %v1255_v33 = vmul.f32 %v2498_v34, %v1237_v32  ;;  %v3669_v36 = vpop.permute.xlu2 %1383  ;;  %2617 = vset.pattern.permute.xlu1 %v2714_v29  ;;  %1073 = vperm.xlu2 %2618, %v3657_v35  }
 0x3d2   :  { %v1312_v37 = vadd.f32 %v1304_v31, %v1259_v7  ;;  %1044 = vperm.xlu1 %2617, %v3633_v10  }
 0x3d3   :  { %v1263_v38 = vadd.f32 %v1255_v33, %v1210_v28 }
 0x3d8   :  { %v1327_v42 = vpop.permute.xlu1 %1326 }
 0x3d9   :  { %v1357_v40 = vmul.f32 %v2506_v39, %v1327_v42  ;;  %v1290_v44 = vpop.permute.xlu0 %1289  ;;  %2620 = vset.pattern.permute.xlu2 %v2715_v43 }
 0x3da   :  { %v1308_v15 = vmul.f32 %v2502_v60, %v1290_v44  ;;  %2621 = vset.pattern.permute.xlu1 %v2715_v43  ;;  %v1020_v45 = vpop.permute.xlu2 %1019  ;;  %1126 = vperm.xlu2 %2620, %v3657_v35   ;;  %v3692_v43 = vld [vmem:[%s4151_s6 + $0x30] sm:$0xff]  ;;  %v1305_v60 = vmul.f32 %v2503_v1, %v3647_v9  ;;  %v1411_v9 = vmul.f32 %v2511_v59, %v3669_v36 }
 0x3db   :  { %v1365_v29 = vadd.f32 %v1357_v40, %v1312_v37  ;;  %1142 = vperm.xlu1 %2621, %v3633_v10   ;;  %v1049_v57 = vmul.f32 %v1020_v45, %v3687_v47 }
 0x3dc   :  { %v1316_v46 = vadd.f32 %v1308_v15, %v1263_v38 }
 0x3e1   :  { %v1380_v50 = vpop.permute.xlu1 %1379 }
 0x3e2   :  { %v1410_v53 = vmul.f32 %v2510_v41, %v1380_v50  ;;  %v1343_v54 = vpop.permute.xlu0 %1342  ;;  %2622 = vset.pattern.permute.xlu2 %v2716_v25 }
 0x3e3   :  { %v1361_v55 = vmul.f32 %v2506_v39, %v1343_v54  ;;  %2623 = vset.pattern.permute.xlu1 %v2716_v25  ;;  %v1070_v56 = vpop.permute.xlu2 %1069  ;;  %1179 = vperm.xlu2 %2622, %v3657_v35  }
 0x3e4   :  { %v3698_v58 = vadd.f32 %v1410_v53, %v1365_v29  ;;  %v1094_v62 = vmul.f32 %v3692_v43, %v1070_v56  ;;  %1195 = vperm.xlu1 %2623, %v3633_v10  }
 0x3e5   :  { %v1369_v63 = vadd.f32 %v1361_v55, %v1316_v46 }
 0x3e6   :  { %v3702_v2 = vadd.f32 %v1094_v62, %v1049_v57 }
 0x3ea   :  { %v1035_v3 = vpop.permute.xlu1 %1034 }
 0x3eb   :  { %v1396_v4 = vpop.permute.xlu0 %1395  ;;  %2624 = vset.pattern.permute.xlu2 %v2717_v48  ;;  %v1052_v61 = vmul.f32 %v1035_v3, %v1004_v12 }
 0x3ec   :  { %v1414_v5 = vmul.f32 %v2510_v41, %v1396_v4  ;;  %2625 = vset.pattern.permute.xlu1 %v2717_v48  ;;  %1232 = vperm.xlu2 %2624, %v3657_v35   ;;  %v3710_v11 = vpop.permute.xlu2 %1138  ;;  %v2491_v48 = vld [vmem:[%s4151_s6 + $0x48] sm:$0xff]  ;;  %v2492_v4 = vld [vmem:[%s4151_s6 + $0x50] sm:$0xff] }
 0x3ed   :  { %1248 = vperm.xlu1 %2625, %v3633_v10   ;;  %v1146_v21 = vmul.f32 %v2491_v48, %v3608_v52  ;;  %v2507_v52 = vld [vmem:[%s4151_s6 + $0xc8] sm:$0xff] }
 0x3ee   :  { %v3708_v25 = vadd.f32 %v1414_v5, %v1369_v63  ;;  %v1358_v13 = vmul.f32 %v2507_v52, %v3661_v27  ;;  %v2496_v5 = vld [vmem:[%s4151_s6 + $0x70] sm:$0xff] }
 0x3f3   :  { %v1082_v17 = vpop.permute.xlu1 %1081 }
 0x3f4   :  { %v1097_v18 = vmul.f32 %v2487_v16, %v1082_v17  ;;  %v1015_v19 = vpop.permute.xlu0 %1014  ;;  %2626 = vset.pattern.permute.xlu2 %v2718_v14  ;;  %v2500_v17 = vld [vmem:[%s4151_s6 + $0x90] sm:$0xff] }
 0x3f5   :  { %v1048_v8 = vmul.f32 %v1015_v19, %v1004_v12  ;;  %2627 = vset.pattern.permute.xlu1 %v2718_v14  ;;  %1285 = vperm.xlu2 %2626, %v3657_v35   ;;  %v1176_v14 = vpop.permute.xlu2 %1175 }
 0x3f6   :  { %v1105_v20 = vadd.f32 %v1097_v18, %v1052_v61  ;;  %1301 = vperm.xlu1 %2627, %v3633_v10   ;;  %v2504_v18 = vld [vmem:[%s4151_s6 + $0xb0] sm:$0xff] }
 0x3f7   :  { %v1101_v34 = vadd.f32 %v1093_v24, %v1048_v8 }
 0x3f9   :  { %v1154_v0 = vadd.f32 %v1146_v21, %v1101_v34 }
 0x3fb   :  { %v1207_v7 = vadd.f32 %v1199_v51, %v1154_v0 }
 0x3fc   :  { %v1135_v28 = vpop.permute.xlu1 %1134 }
 0x3fd   :  { %v1260_v23 = vadd.f32 %v1252_v6, %v1207_v7  ;;  %v1150_v31 = vmul.f32 %v2491_v48, %v1135_v28  ;;  %2628 = vset.pattern.permute.xlu2 %v2719_v22  ;;  %v1200_v48 = vmul.f32 %v2496_v5, %v1176_v14 }
 0x3fe   :  { %2629 = vset.pattern.permute.xlu1 %v2719_v22  ;;  %1338 = vperm.xlu2 %2628, %v3657_v35   ;;  %v1229_v39 = vpop.permute.xlu2 %1228 }
 0x3ff   :  { %v1313_v32 = vadd.f32 %v1305_v60, %v1260_v23  ;;  %v1158_v33 = vadd.f32 %v1150_v31, %v1105_v20  ;;  %1354 = vperm.xlu1 %2629, %v3633_v10   ;;  %v1253_v24 = vmul.f32 %v2500_v17, %v1229_v39 }
 0x401   :  { %v1366_v37 = vadd.f32 %v1358_v13, %v1313_v32 }
 0x403   :  { %v3751_v38 = vadd.f32 %v1411_v9, %v1366_v37 }
 0x405   :  { %v1188_v42 = vpop.permute.xlu1 %1187 }
 0x406   :  { %v1203_v40 = vmul.f32 %v2495_v26, %v1188_v42  ;;  %2632 = vset.pattern.permute.xlu2 %v2720_v30  ;;  %v2508_v26 = vld [vmem:[%s4151_s6 + $0xd0] sm:$0xff] }
 0x407   :  { %2631 = vset.pattern.permute.xlu1 %v2720_v30  ;;  %1407 = vperm.xlu2 %2632, %v3633_v10   ;;  %v1282_v27 = vpop.permute.xlu2 %1281 }
 0x408   :  { %v1211_v22 = vadd.f32 %v1203_v40, %v1158_v33  ;;  %1391 = vperm.xlu1 %2631, %v3657_v35   ;;  %v1086_v35 = vpop.permute.xlu0 %1085  ;;  %v1306_v20 = vmul.f32 %v2504_v18, %v1282_v27 }
 0x409   :  { %v1098_v28 = vmul.f32 %v3692_v43, %v1086_v35  ;;  %v1006_v43 = vld [vmem:[%s4151_s6 + $0x18] sm:$0x3f] }
 0x40e   :  { %v1241_v44 = vpop.permute.xlu1 %1240 }
 0x40f   :  { %v1256_v15 = vmul.f32 %v2499_v49, %v1241_v44  ;;  %v3810_v44 = vld [vmem:[%s4153_s8 + $0x30] sm:$0xff] }
 0x410   :  { %v1335_v36 = vpop.permute.xlu2 %1334  ;;  %v1192_v3 = vpop.permute.xlu0 %1191 }
 0x411   :  { %v1264_v45 = vadd.f32 %v1256_v15, %v1211_v22  ;;  %v1359_v49 = vmul.f32 %v2508_v26, %v1335_v36  ;;  %v1204_v33 = vmul.f32 %v2496_v5, %v1192_v3  ;;  %v3815_v15 = vld [vmem:[%s4153_s8 + $0x28] sm:$0xff] }
 0x417   :  { %v1294_v29 = vpop.permute.xlu1 %1293 }
 0x418   :  { %v1309_v46 = vmul.f32 %v2503_v1, %v1294_v29  ;;  %v1245_v34 = vpop.permute.xlu0 %1244 }
 0x419   :  { %v3757_v53 = vpop.permute.xlu2 %1387  ;;  %v1257_v42 = vmul.f32 %v2500_v17, %v1245_v34  ;;  %v3850_v17 = vld [vmem:[%s4153_s8 + $0x10] sm:$0xff] }
 0x41a   :  { %v1317_v41 = vadd.f32 %v1309_v46, %v1264_v45  ;;  %v2493_v45 = vld [vmem:[%s4151_s6 + $0x58] sm:$0x3f] }
 0x420   :  { %v1347_v50 = vpop.permute.xlu1 %1346  ;;  %v1298_v1 = vpop.permute.xlu0 %1297 }
 0x421   :  { %v1362_v54 = vmul.f32 %v2507_v52, %v1347_v50  ;;  %v1310_v22 = vmul.f32 %v2504_v18, %v1298_v1  ;;  %v2505_v18 = vld [vmem:[%s4151_s6 + $0xb8] sm:$0x3f] }
 0x422   :  { %v3759_v57 = vpop.permute.xlu2 %1024  ;;  %v2509_v1 = vld [vmem:[%s4151_s6 + $0xd8] sm:$0x3f] }
 0x423   :  { %v1370_v55 = vadd.f32 %v1362_v54, %v1317_v41  ;;  %v3828_v54 = vld [vmem:[%s4153_s8 + $0x20] sm:$0xff] }
 0x428   :  { %v1351_v23 = vpop.permute.xlu0 %1350 }
 0x429   :  { %v1400_v56 = vpop.permute.xlu1 %1399 }
 0x42a   :  { %v1415_v30 = vmul.f32 %v2511_v59, %v1400_v56  ;;  %v1151_v59 = vmul.f32 %v2492_v4, %v3710_v11  ;;  %v2489_v11 = vld [vmem:[%s4151_s6 + $0x38] sm:$0x3f]  ;;  %v1363_v56 = vmul.f32 %v2508_v26, %v1351_v23 }
 0x42b   :  { %v3763_v63 = vpop.permute.xlu2 %1073 }
 0x42c   :  { %v3761_v10 = vadd.f32 %v1415_v30, %v1370_v55  ;;  %v2497_v55 = vld [vmem:[%s4151_s6 + $0x78] sm:$0x3f] }
 0x430   :  { %v1090_v39 = vpop.permute.xlu0 %1089 }
 0x431   :  { %v1099_v29 = vmul.f32 %v2489_v11, %v1090_v39 }
 0x432   :  { %v1040_v62 = vpop.permute.xlu1 %1039 }
 0x433   :  { %v1053_v52 = vmul.f32 %v1040_v62, %v3687_v47  ;;  %v3797_v47 = vld [vmem:[%s4153_s8 + $0x38] sm:$0xff] }
 0x434   :  { %v3778_v19 = vpop.permute.xlu2 %1126  ;;  %1488 = vmatpush.msra.mxu2 %v3797_v47  ;;  %1579 = vmatpush.msrb.mxu0 %v3797_v47  ;;  %v3839_v62 = vld [vmem:[%s4153_s8 + $0x18] sm:$0xff] }
 0x435   :  { %v1106_v31 = vadd.f32 %v1098_v28, %v1053_v52  ;;  %1620 = vmatpush.msrb.mxu1 %v3797_v47 }
 0x436   :  { %1489 = vmatpush.msra.mxu2 %v3810_v44  ;;  %1580 = vmatpush.msrb.mxu0 %v3810_v44 }
 0x437   :  { %v1159_v13 = vadd.f32 %v1151_v59, %v1106_v31  ;;  %1621 = vmatpush.msrb.mxu1 %v3810_v44 }
 0x438   :  { %1490 = vmatpush.msra.mxu2 %v3815_v15  ;;  %1581 = vmatpush.msrb.mxu0 %v3815_v15  ;;  %v1404_v3 = vpop.permute.xlu0 %1403 }
 0x439   :  { %v1212_v37 = vadd.f32 %v1204_v33, %v1159_v13  ;;  %1622 = vmatpush.msrb.mxu1 %v3815_v15 }
 0x43a   :  { %1491 = vmatpush.msra.mxu2 %v3828_v54  ;;  %1582 = vmatpush.msrb.mxu0 %v3828_v54 }
 0x43b   :  { %v1123_v12 = vpop.permute.xlu1 %1122  ;;  %v1265_v40 = vadd.f32 %v1257_v42, %v1212_v37  ;;  %1623 = vmatpush.msrb.mxu1 %v3828_v54 }
 0x43c   :  { %v1147_v16 = vmul.f32 %v2492_v4, %v1123_v12  ;;  %v2501_v4 = vld [vmem:[%s4151_s6 + $0x98] sm:$0x3f]  ;;  %1492 = vmatpush.msra.mxu2 %v3839_v62  ;;  %1583 = vmatpush.msrb.mxu0 %v3839_v62 }
 0x43d   :  { %v1318_v46 = vadd.f32 %v1310_v22, %v1265_v40  ;;  %1624 = vmatpush.msrb.mxu1 %v3839_v62 }
 0x43e   :  { %v1155_v61 = vadd.f32 %v1147_v16, %v3702_v2  ;;  %v3785_v2 = vpop.permute.xlu2 %1179  ;;  %1493 = vmatpush.msra.mxu2 %v3850_v17  ;;  %1584 = vmatpush.msrb.mxu0 %v3850_v17 }
 0x43f   :  { %v1371_v5 = vadd.f32 %v1363_v56, %v1318_v46  ;;  %1625 = vmatpush.msrb.mxu1 %v3850_v17 }
 0x440   :  { %v1208_v8 = vadd.f32 %v1200_v48, %v1155_v61  ;;  %v2512_v48 = vld [vmem:[%s4151_s6 + $0xf0] sm:$0xff]  ;;  %v1095_v61 = vmul.f32 %v2489_v11, %v3763_v63  ;;  %v1050_v63 = vmul.f32 %v3759_v57, %v1006_v43 }
 0x441   :  { %v1412_v33 = vmul.f32 %v2512_v48, %v3757_v53 }
 0x442   :  { %v1261_v21 = vadd.f32 %v1253_v24, %v1208_v8  ;;  %v1416_v24 = vmul.f32 %v2512_v48, %v1404_v3  ;;  %v1103_v57 = vadd.f32 %v1095_v61, %v1050_v63 }
 0x444   :  { %v1314_v51 = vadd.f32 %v1306_v20, %v1261_v21  ;;  %v1045_v0 = vpop.permute.xlu1 %1044  ;;  %v3865_v20 = vld [vmem:[%s4153_s8 + $0x8] sm:$0xff]  ;;  %v1148_v21 = vmul.f32 %v2493_v45, %v3778_v19  ;;  %v3872_v34 = vadd.f32 %v1416_v24, %v1371_v5  ;;  %v1201_v19 = vmul.f32 %v2497_v55, %v3785_v2 }
 0x445   :  { %v1054_v27 = vmul.f32 %v1045_v0, %v1006_v43  ;;  %v2721_v0 = vmov 30.0   ;;  %1494 = vmatpush.msra.mxu2 %v3865_v20  ;;  %1585 = vmatpush.msrb.mxu0 %v3865_v20  ;;  %v1450_v2 = vsel %vm1435_vm1, %v3708_v25, 0.0 }
 0x446   :  { %v3783_v14 = vadd.f32 %v1359_v49, %v1314_v51  ;;  %v3787_v7 = vpop.permute.xlu2 %1232  ;;  %v3877_v51 = vld [vmem:[%s4153_s8] sm:$0xff]  ;;  %2633 = vrcp.f32 %v2721_v0  ;;  %1626 = vmatpush.msrb.mxu1 %v3865_v20  ;;  %v1156_v59 = vadd.f32 %v1148_v21, %v1103_v57 }
 0x447   :  { %v1107_v30 = vadd.f32 %v1099_v29, %v1054_v27  ;;  %v1254_v13 = vmul.f32 %v2501_v4, %v3787_v7  ;;  %1495 = vmatpush.msra.mxu2 %v3877_v51  ;;  %1586 = vmatpush.msrb.mxu0 %v3877_v51 }
 0x448   :  { %1627 = vmatpush.msrb.mxu1 %v3877_v51  ;;  %v1209_v40 = vadd.f32 %v1201_v19, %v1156_v59  ;;  %v3907_v22 = vadd.f32 %v1412_v33, %v3783_v14  ;;  %v3933_v59 = vld [vmem:[%s4152_s7] sm:$0xf]  ;;  %s2722_s7 = smov [#allocation2]  }
 0x449   :  { %1859 = vmatpush.msra.mxu0 %v3797_v47  ;;  %2515 = vmatpush.msk.msra.mxu3 %vm1504_vm5, %v3933_v59  ;;  %s2323_s19 = sshll.u32 %s2722_s7, 4  ;;  %s2324_s19 = int_to_ptr.vmem [resolvable:$true] %s2323_s19 }
 0x44a   :  { %v1262_v27 = vadd.f32 %v1254_v13, %v1209_v40  ;;  %2525 = vmatpush.msk.msrb.mxu2 %vm1504_vm5, %v3933_v59  ;;  %2536 = vmatpush.msk.msra.mxu1 %vm1504_vm5, %v3933_v59 }
 0x44b   :  { %1860 = vmatpush.msra.mxu0 %v3810_v44  ;;  %2530 = vmatpush.msk.msrb.mxu3 %vm1504_vm5, %v3933_v59 }
 0x44c   :  { %v2634_v7 = vpop.eup %2633 }
 0x44d   :  { %v1143_v6 = vpop.permute.xlu1 %1142  ;;  %1861 = vmatpush.msra.mxu0 %v3815_v15  ;;  %vm1468_vm3 = vweird.f32 %v2634_v7 }
 0x44e   :  { %v1152_v41 = vmul.f32 %v2493_v45, %v1143_v6  ;;  %v2513_v6 = vld [vmem:[%s4151_s6 + $0xf8] sm:$0x3f] }
 0x44f   :  { %v3792_v32 = vpop.permute.xlu2 %1285  ;;  %1862 = vmatpush.msra.mxu0 %v3828_v54 }
 0x450   :  { %v1160_v12 = vadd.f32 %v1152_v41, %v1107_v30  ;;  %v1307_v43 = vmul.f32 %v2505_v18, %v3792_v32  ;;  %v1437_v41 = vsel %vm1435_vm1, %v3751_v38, 0.0 }
 0x451   :  { %1863 = vmatpush.msra.mxu0 %v3839_v62 }
 0x452   :  { %v1315_v46 = vadd.f32 %v1307_v43, %v1262_v27 }
 0x453   :  { %1864 = vmatpush.msra.mxu0 %v3850_v17 }
 0x455   :  { %1865 = vmatpush.msra.mxu0 %v3865_v20 }
 0x456   :  { %v1196_v60 = vpop.permute.xlu1 %1195 }
 0x457   :  { %v1205_v35 = vmul.f32 %v2497_v55, %v1196_v60  ;;  %v1451_v60 = vsel %vm1435_vm1, %v3761_v10, 0.0  ;;  %v1436_v55 = vsel %vm1435_vm1, %v3698_v58, 0.0  ;;  %1866 = vmatpush.msra.mxu0 %v3877_v51 }
 0x458   :  { %v3821_v36 = vpop.permute.xlu2 %1338  ;;  %v1452_v42 = vadd.f32 %v1451_v60, %v1450_v2  ;;  %v1438_v3 = vadd.f32 %v1437_v41, %v1436_v55 }
 0x459   :  { %v1213_v8 = vadd.f32 %v1205_v35, %v1160_v12  ;;  %v1360_v45 = vmul.f32 %v2509_v1, %v3821_v36  ;;  %v1439_v36 = vsel %vm1435_vm1, %v3907_v22, 0.0 }
 0x45b   :  { %v1368_v14 = vadd.f32 %v1360_v45, %v1315_v46 }
 0x45f   :  { %v1249_v9 = vpop.permute.xlu1 %1248 }
 0x460   :  { %v1258_v16 = vmul.f32 %v2501_v4, %v1249_v9  ;;  %v1453_v9 = vsel %vm1435_vm1, %v3872_v34, 0.0 }
 0x461   :  { %v1408_v52 = vpop.permute.xlu2 %1407  ;;  %v1454_v53 = vadd.f32 %v1453_v9, %v1452_v42 }
 0x462   :  { %v1266_v49 = vadd.f32 %v1258_v16, %v1213_v8  ;;  %v1417_v37 = vmul.f32 %v2513_v6, %v1408_v52  ;;  %v1440_v16 = vadd.f32 %v1439_v36, %v1438_v3 }
 0x468   :  { %v1302_v50 = vpop.permute.xlu1 %1301 }
 0x469   :  { %v1311_v26 = vmul.f32 %v2505_v18, %v1302_v50  ;;  %v1464_v50 = vmul.f32 30.0, %v2634_v7 }
 0x46b   :  { %v1319_v23 = vadd.f32 %v1311_v26, %v1266_v49  ;;  %v1465_v12 = vsub.f32 1.0, %v1464_v50 }
 0x46d   :  { %v1466_v8 = vmul.f32 %v2634_v7, %v1465_v12 }
 0x46f   :  { %v1467_v49 = vadd.f32 %v2634_v7, %v1466_v8 }
 0x471   :  { %v1355_v28 = vpop.permute.xlu1 %1354 }
 0x472   :  { %v1364_v31 = vmul.f32 %v2509_v1, %v1355_v28  ;;  %v1469_v1 = vsel %vm1468_vm3, %v2634_v7, %v1467_v49 }
 0x474   :  { %v1372_v39 = vadd.f32 %v1364_v31, %v1319_v23 }
 0x476   :  { %v3903_v11 = vadd.f32 %v1417_v37, %v1372_v39 }
 0x478   :  { %v1455_v29 = vsel %vm1441_vm2, %v3903_v11, 0.0 }
 0x479   :  { %v1456_v32 = vadd.f32 %v1455_v29, %v1454_v53 }
 0x47a   :  { %v1392_v56 = vpop.permute.xlu1 %1391 }
 0x47b   :  { %v1457_v30 = vrot.slane %v1456_v32, 4  ;;  %v1413_v35 = vmul.f32 %v2513_v6, %v1392_v56 }
 0x47d   :  { %v1458_v4 = vadd.f32 %v1457_v30, %v1456_v32  ;;  %v3921_v5 = vadd.f32 %v1413_v35, %v1368_v14 }
 0x47f   :  { %v1442_v48 = vsel %vm1441_vm2, %v3921_v5, 0.0  ;;  %v1459_v61 = vrot.slane %v1458_v4, 2 }
 0x480   :  { %v1443_v18 = vadd.f32 %v1442_v48, %v1440_v16 }
 0x481   :  { %v1460_v24 = vadd.f32 %v1459_v61, %v1458_v4 }
 0x482   :  { %v1444_v26 = vrot.slane %v1443_v18, 4 }
 0x483   :  { %v1461_v21 = vrot.slane %v1460_v24, 1 }
 0x484   :  { %v1445_v63 = vadd.f32 %v1444_v26, %v1443_v18 }
 0x485   :  { %v1462_v19 = vadd.f32 %v1461_v21, %v1460_v24 }
 0x486   :  { %v1446_v0 = vrot.slane %v1445_v63, 2 }
 0x487   :  { %v1471_v28 = vmul.f32 %v1469_v1, %v1462_v19 }
 0x488   :  { %v1447_v57 = vadd.f32 %v1446_v0, %v1445_v63 }
 0x489   :  { %v1473_v31 = vmul.f32 %v1471_v28, %v1471_v28 }
 0x48a   :  { %v1448_v6 = vrot.slane %v1447_v57, 1 }
 0x48c   :  { %v1449_v52 = vadd.f32 %v1448_v6, %v1447_v57 }
 0x48e   :  { %v1470_v60 = vmul.f32 %v1469_v1, %v1449_v52 }
 0x490   :  { %v1472_v23 = vmul.f32 %v1470_v60, %v1470_v60 }
 0x492   :  { %v1477_v2 = vsel %vm1476_vm4, %v1473_v31, %v1472_v23 }
 0x493   :  { %2514 = vmatmul.msk.f32.vlgmr.msra.gmra.mxu2 %vm1435_vm1, %v1477_v2 }
 0x494   :  { %1945 = vmatpush.msra.mxu2 %v3797_v47 }
 0x496   :  { %1946 = vmatpush.msra.mxu2 %v3810_v44 }
 0x498   :  { %1947 = vmatpush.msra.mxu2 %v3815_v15 }
 0x49a   :  { %1948 = vmatpush.msra.mxu2 %v3828_v54 }
 0x49c   :  { %1949 = vmatpush.msra.mxu2 %v3839_v62 }
 0x49e   :  { %1950 = vmatpush.msra.mxu2 %v3850_v17 }
 0x4a0   :  { %1951 = vmatpush.msra.mxu2 %v3865_v20 }
 0x4a2   :  { %1952 = vmatpush.msra.mxu2 %v3877_v51 }
 0x516   :  { %v1497_v13 = vpop.f32.mrf.mxu2 }
 0x517   :  { %2516 = vmatmul.msk.f32.vlgmr.msra.gmra.mxu3 %vm1500_vm6, %v1497_v13 }
 0x518   :  { %1986 = vmatpush.msra.mxu3 %v3797_v47 }
 0x51a   :  { %1987 = vmatpush.msra.mxu3 %v3810_v44 }
 0x51c   :  { %1988 = vmatpush.msra.mxu3 %v3815_v15 }
 0x51e   :  { %1989 = vmatpush.msra.mxu3 %v3828_v54 }
 0x520   :  { %1990 = vmatpush.msra.mxu3 %v3839_v62 }
 0x522   :  { %1991 = vmatpush.msra.mxu3 %v3850_v17 }
 0x524   :  { %1992 = vmatpush.msra.mxu3 %v3865_v20 }
 0x526   :  { %1993 = vmatpush.msra.mxu3 %v3877_v51 }
 0x59a   :  { %v1525_v33 = vpop.f32.mrf.mxu3 }
 0x59b   :  { %v1528_v9 = vadd.f32 1e-08, %v1525_v33  ;;  %v1540_v40 = vadd.f32 1.0, %v1525_v33 }
 0x59d   :  { %2635 = vrsqrt.f32 %v1528_v9  ;;  %vm1535_vm8 = vweird.f32 %v1528_v9 }
 0x59e   :  { %2637 = vrcp.f32 %v1540_v40 }
 0x5a3   :  { %v2636_v37 = vpop.eup %2635 }
 0x5a4   :  { %v1530_v39 = vmul.f32 %v2636_v37, %v1528_v9  ;;  %vm1536_vm7 = vweird.f32 %v2636_v37  ;;  %v2638_v29 = vpop.eup %2637 }
 0x5a5   :  { %vm1537_vm9 = vmor %vm1535_vm8, %vm1536_vm7 }
 0x5a6   :  { %v1531_v42 = vmul.f32 %v2636_v37, %v1530_v39 }
 0x5a8   :  { %v1532_v43 = vmul.f32 0.5, %v1531_v42 }
 0x5aa   :  { %v1533_v7 = vsub.f32 1.5, %v1532_v43 }
 0x5ac   :  { %v1534_v53 = vmul.f32 %v2636_v37, %v1533_v7 }
 0x5ae   :  { %v1538_v27 = vsel %vm1537_vm9, %v2636_v37, %v1534_v53 }
 0x5af   :  { %v1539_v45 = vmul.f32 %v1538_v27, %v1525_v33 }
 0x5b1   :  { %v1542_v46 = vmul.f32 %v2638_v29, %v1539_v45 }
 0x5b3   :  { %v1544_v32 = vrot.slane %v1542_v46, 1  ;;  %v1547_v41 = vmul.f32 %v1542_v46, %v1470_v60 }
 0x5b5   :  { %v1548_v50 = vmul.f32 %v1544_v32, %v1471_v28  ;;  %v1549_v55 = vperm.slane %v1547_v41, 0 }
 0x5b7   :  { %v1550_v56 = vperm.slane %v1548_v50, 0  ;;  %v1551_v14 = vmul.f32 %v1549_v55, %v3698_v58  ;;  %v1552_v36 = vmul.f32 %v1549_v55, %v3751_v38  ;;  %v1553_v3 = vmul.f32 %v1549_v55, %v3907_v22 }
 0x5b8   :  { %v1554_v12 = vmul.f32 %v1549_v55, %v3921_v5 }
 0x5b9   :  { %2517 = vmatmul.msk.f32.vlgmr.msrb.gmra.mxu0 %vm1435_vm1, %v1551_v14  ;;  %v1555_v30 = vmul.f32 %v1550_v56, %v3708_v25  ;;  %v1556_v35 = vmul.f32 %v1550_v56, %v3761_v10  ;;  %v1557_v4 = vmul.f32 %v1550_v56, %v3872_v34  ;;  %v1558_v16 = vmul.f32 %v1550_v56, %v3903_v11 }
 0x5ba   :  { %2546 = vmatpush.msk.msrb.mxu0 %vm1504_vm5, %v3933_v59 }
 0x5bb   :  { %2521 = vmatmul.msk.f32.vlgmr.msrb.gmra.mxu1 %vm1435_vm1, %v1555_v30 }
 0x5bc   :  { %2551 = vmatpush.msk.msrb.mxu1 %vm1504_vm5, %v3933_v59 }
 0x5c1   :  { %2518 = vmatmul.msk.f32.gmra.mxu0 %vm1435_vm1, %v1552_v36 }
 0x5c3   :  { %2522 = vmatmul.msk.f32.gmra.mxu1 %vm1435_vm1, %v1556_v35 }
 0x5c9   :  { %2519 = vmatmul.msk.f32.gmra.mxu0 %vm1435_vm1, %v1553_v3 }
 0x5cb   :  { %2523 = vmatmul.msk.f32.gmra.mxu1 %vm1435_vm1, %v1557_v4 }
 0x5d1   :  { %2520 = vmatmul.msk.f32.gmra.mxu0 %vm1435_vm1, %v1554_v12 }
 0x5d3   :  { %2524 = vmatmul.msk.f32.gmra.mxu1 %vm1435_vm1, %v1558_v16 }
 0x636   :  { %v3980_v48 = vpop.f32.mrf.mxu0 }
 0x637   :  { %v1641_v49 = vsel %vm1500_vm6, %v3980_v48, -inf }
 0x638   :  { %v3982_v61 = vpop.f32.mrf.mxu1 }
 0x639   :  { %v1655_v28 = vsel %vm1500_vm6, %v3982_v61, -inf }
 0x63e   :  { %v3984_v18 = vpop.f32.mrf.mxu0 }
 0x63f   :  { %v1642_v0 = vsel %vm1500_vm6, %v3984_v18, -inf }
 0x640   :  { %v3986_v24 = vpop.f32.mrf.mxu1 }
 0x641   :  { %v1656_v60 = vsel %vm1500_vm6, %v3986_v24, -inf }
 0x646   :  { %v3988_v8 = vpop.f32.mrf.mxu0 }
 0x647   :  { %v1643_v63 = vsel %vm1500_vm6, %v3988_v8, -inf }
 0x648   :  { %v3990_v26 = vpop.f32.mrf.mxu1  ;;  %v1644_v1 = vmax.f32 %v1641_v49, %v1643_v63 }
 0x649   :  { %v1657_v57 = vsel %vm1500_vm6, %v3990_v26, -inf }
 0x64a   :  { %v1658_v31 = vmax.f32 %v1655_v28, %v1657_v57 }
 0x64e   :  { %v3994_v21 = vpop.f32.mrf.mxu0 }
 0x64f   :  { %v1646_v19 = vsel %vm1645_vm10, %v3994_v21, -inf }
 0x650   :  { %v1647_v6 = vmax.f32 %v1642_v0, %v1646_v19  ;;  %v4004_v52 = vpop.f32.mrf.mxu1 }
 0x651   :  { %v1659_v23 = vsel %vm1645_vm10, %v4004_v52, -inf }
 0x652   :  { %v1648_v2 = vmax.f32 %v1644_v1, %v1647_v6  ;;  %v1660_v13 = vmax.f32 %v1656_v60, %v1659_v23 }
 0x654   :  { %v1649_v33 = vrot.slane %v1648_v2, 4  ;;  %v1661_v9 = vmax.f32 %v1658_v31, %v1660_v13 }
 0x656   :  { %v1650_v37 = vmax.f32 %v1648_v2, %v1649_v33  ;;  %v1662_v39 = vrot.slane %v1661_v9, 4 }
 0x658   :  { %v1651_v42 = vrot.slane %v1650_v37, 2  ;;  %v1663_v40 = vmax.f32 %v1661_v9, %v1662_v39 }
 0x65a   :  { %v1652_v43 = vmax.f32 %v1650_v37, %v1651_v42  ;;  %v1664_v7 = vrot.slane %v1663_v40, 2 }
 0x65c   :  { %v1653_v53 = vrot.slane %v1652_v43, 1  ;;  %v1665_v27 = vmax.f32 %v1663_v40, %v1664_v7 }
 0x65e   :  { %v1654_v45 = vmax.f32 %v1652_v43, %v1653_v53  ;;  %v1666_v29 = vrot.slane %v1665_v27, 1 }
 0x660   :  { %v1668_v46 = vsub.f32 %v3980_v48, %v1654_v45  ;;  %v1669_v32 = vsub.f32 %v3984_v18, %v1654_v45  ;;  %v1670_v41 = vsub.f32 %v3988_v8, %v1654_v45  ;;  %v1671_v50 = vsub.f32 %v3994_v21, %v1654_v45 }
 0x661   :  { %v1667_v55 = vmax.f32 %v1665_v27, %v1666_v29 }
 0x662   :  { %v1676_v56 = vmul.f32 1.442695, %v1668_v46  ;;  %v1678_v14 = vmul.f32 1.442695, %v1669_v32  ;;  %v1680_v30 = vmul.f32 1.442695, %v1670_v41 }
 0x663   :  { %v1682_v36 = vmul.f32 1.442695, %v1671_v50  ;;  %v1672_v35 = vsub.f32 %v3982_v61, %v1667_v55  ;;  %v1673_v3 = vsub.f32 %v3986_v24, %v1667_v55  ;;  %v1674_v4 = vsub.f32 %v3990_v26, %v1667_v55 }
 0x664   :  { %2639 = vpow2.f32 %v1676_v56  ;;  %v1675_v12 = vsub.f32 %v4004_v52, %v1667_v55 }
 0x665   :  { %2641 = vpow2.f32 %v1678_v14  ;;  %v1684_v16 = vmul.f32 1.442695, %v1672_v35  ;;  %v1686_v63 = vmul.f32 1.442695, %v1673_v3  ;;  %v1688_v49 = vmul.f32 1.442695, %v1674_v4 }
 0x666   :  { %2643 = vpow2.f32 %v1680_v30  ;;  %v1690_v0 = vmul.f32 1.442695, %v1675_v12 }
 0x667   :  { %2645 = vpow2.f32 %v1682_v36 }
 0x668   :  { %2647 = vpow2.f32 %v1684_v16 }
 0x669   :  { %2649 = vpow2.f32 %v1686_v63 }
 0x66a   :  { %v2640_v57 = vpop.eup %2639  ;;  %2651 = vpow2.f32 %v1688_v49 }
 0x66b   :  { %v2642_v19 = vpop.eup %2641  ;;  %v1692_v1 = vsel %vm1500_vm6, %v2640_v57, 0.0  ;;  %2653 = vpow2.f32 %v1690_v0 }
 0x66c   :  { %v2644_v6 = vpop.eup %2643  ;;  %v1693_v28 = vsel %vm1500_vm6, %v2642_v19, 0.0 }
 0x66d   :  { %v2646_v60 = vpop.eup %2645  ;;  %v1694_v23 = vadd.f32 %v1693_v28, %v1692_v1  ;;  %v1695_v2 = vsel %vm1500_vm6, %v2644_v6, 0.0 }
 0x66e   :  { %v2648_v31 = vpop.eup %2647  ;;  %v1697_v39 = vsel %vm1645_vm10, %v2646_v60, 0.0 }
 0x66f   :  { %v2650_v13 = vpop.eup %2649  ;;  %v1696_v33 = vadd.f32 %v1695_v2, %v1694_v23  ;;  %v1705_v9 = vsel %vm1500_vm6, %v2648_v31, 0.0 }
 0x670   :  { %v2652_v37 = vpop.eup %2651  ;;  %v1706_v42 = vsel %vm1500_vm6, %v2650_v13, 0.0 }
 0x671   :  { %v2654_v40 = vpop.eup %2653  ;;  %v1698_v43 = vadd.f32 %v1697_v39, %v1696_v33  ;;  %v1707_v7 = vadd.f32 %v1706_v42, %v1705_v9  ;;  %v1708_v53 = vsel %vm1500_vm6, %v2652_v37, 0.0 }
 0x672   :  { %v1710_v29 = vsel %vm1645_vm10, %v2654_v40, 0.0 }
 0x673   :  { %v1699_v27 = vrot.slane %v1698_v43, 4  ;;  %v1709_v45 = vadd.f32 %v1708_v53, %v1707_v7 }
 0x675   :  { %v1700_v46 = vadd.f32 %v1699_v27, %v1698_v43  ;;  %v1711_v32 = vadd.f32 %v1710_v29, %v1709_v45 }
 0x677   :  { %v1701_v41 = vrot.slane %v1700_v46, 2  ;;  %v1712_v50 = vrot.slane %v1711_v32, 4 }
 0x679   :  { %v1702_v55 = vadd.f32 %v1701_v41, %v1700_v46  ;;  %v1713_v56 = vadd.f32 %v1712_v50, %v1711_v32 }
 0x67b   :  { %v1703_v14 = vrot.slane %v1702_v55, 1  ;;  %v1714_v30 = vrot.slane %v1713_v56, 2 }
 0x67d   :  { %v1704_v36 = vadd.f32 %v1703_v14, %v1702_v55  ;;  %v1715_v35 = vadd.f32 %v1714_v30, %v1713_v56 }
 0x67f   :  { %2655 = vrcp.f32 %v1704_v36  ;;  %v1716_v3 = vrot.slane %v1715_v35, 1 }
 0x681   :  { %v1717_v4 = vadd.f32 %v1716_v3, %v1715_v35 }
 0x683   :  { %2657 = vrcp.f32 %v1717_v4 }
 0x685   :  { %v2656_v12 = vpop.eup %2655 }
 0x686   :  { %v1720_v16 = vmul.f32 %v2656_v12, %v2640_v57  ;;  %v1721_v0 = vmul.f32 %v2656_v12, %v2642_v19  ;;  %v1722_v1 = vmul.f32 %v2656_v12, %v2644_v6  ;;  %v1723_v19 = vmul.f32 %v2656_v12, %v2646_v60 }
 0x688   :  { %2526 = vmatmul.msk.f32.vlgmr.msrb.gmra.mxu2 %vm1500_vm6, %v1720_v16 }
 0x689   :  { %v2658_v63 = vpop.eup %2657  ;;  %2232 = vmatpush.msrb.mxu2 %v3797_v47 }
 0x68a   :  { %v1724_v49 = vmul.f32 %v2658_v63, %v2648_v31  ;;  %v1725_v57 = vmul.f32 %v2658_v63, %v2650_v13  ;;  %v1727_v28 = vmul.f32 %v2658_v63, %v2654_v40 }
 0x68b   :  { %2233 = vmatpush.msrb.mxu2 %v3810_v44 }
 0x68c   :  { %2531 = vmatmul.msk.f32.vlgmr.msrb.gmra.mxu3 %vm1500_vm6, %v1724_v49 }
 0x68d   :  { %2234 = vmatpush.msrb.mxu2 %v3815_v15  ;;  %2557 = vmatpush.msk.msrb.mxu3 %vm1504_vm5, %v3933_v59  ;;  %v1726_v59 = vmul.f32 %v2658_v63, %v2652_v37 }
 0x68f   :  { %2235 = vmatpush.msrb.mxu2 %v3828_v54 }
 0x690   :  { %2527 = vmatmul.msk.f32.gmra.mxu2 %vm1500_vm6, %v1721_v0 }
 0x691   :  { %2236 = vmatpush.msrb.mxu2 %v3839_v62 }
 0x693   :  { %2237 = vmatpush.msrb.mxu2 %v3850_v17 }
 0x694   :  { %2532 = vmatmul.msk.f32.gmra.mxu3 %vm1500_vm6, %v1725_v57 }
 0x695   :  { %2238 = vmatpush.msrb.mxu2 %v3865_v20 }
 0x697   :  { %2239 = vmatpush.msrb.mxu2 %v3877_v51 }
 0x698   :  { %2528 = vmatmul.msk.f32.gmra.mxu2 %vm1500_vm6, %v1722_v1 }
 0x69c   :  { %2533 = vmatmul.msk.f32.gmra.mxu3 %vm1500_vm6, %v1726_v59 }
 0x6a0   :  { %2529 = vmatmul.msk.f32.gmra.mxu2 %vm1500_vm6, %v1723_v19 }
 0x6a4   :  { %2534 = vmatmul.msk.f32.gmra.mxu3 %vm1500_vm6, %v1727_v28 }
 0x70b   :  { %v1757_v23 = vpop.f32.mrf.mxu2 }
 0x70c   :  { %v1810_v9 = vmul.f32 %v1757_v23, %v3698_v58 }
 0x70e   :  { %v1818_v40 = vsel %vm1435_vm1, %v1810_v9, 0.0 }
 0x70f   :  { %v1798_v31 = vpop.f32.mrf.mxu3 }
 0x710   :  { %v1814_v43 = vmul.f32 %v1798_v31, %v3708_v25 }
 0x712   :  { %v1831_v41 = vsel %vm1435_vm1, %v1814_v43, 0.0 }
 0x713   :  { %v1760_v2 = vpop.f32.mrf.mxu2 }
 0x714   :  { %v1811_v6 = vmul.f32 %v1760_v2, %v3751_v38 }
 0x716   :  { %v1819_v42 = vsel %vm1435_vm1, %v1811_v6, 0.0 }
 0x717   :  { %v1801_v13 = vpop.f32.mrf.mxu3  ;;  %v1820_v27 = vadd.f32 %v1819_v42, %v1818_v40 }
 0x718   :  { %v1815_v60 = vmul.f32 %v1801_v13, %v3761_v10 }
 0x71a   :  { %v1832_v29 = vsel %vm1435_vm1, %v1815_v60, 0.0 }
 0x71b   :  { %v1763_v33 = vpop.f32.mrf.mxu2  ;;  %v1833_v56 = vadd.f32 %v1832_v29, %v1831_v41 }
 0x71c   :  { %v1812_v39 = vmul.f32 %v1763_v33, %v3907_v22 }
 0x71e   :  { %v1821_v7 = vsel %vm1435_vm1, %v1812_v39, 0.0 }
 0x71f   :  { %v1804_v37 = vpop.f32.mrf.mxu3  ;;  %v1822_v32 = vadd.f32 %v1821_v7, %v1820_v27 }
 0x720   :  { %v1816_v53 = vmul.f32 %v1804_v37, %v3872_v34 }
 0x722   :  { %v1834_v50 = vsel %vm1435_vm1, %v1816_v53, 0.0 }
 0x723   :  { %v1766_v45 = vpop.f32.mrf.mxu2  ;;  %v1835_v35 = vadd.f32 %v1834_v50, %v1833_v56 }
 0x724   :  { %v1813_v46 = vmul.f32 %v1766_v45, %v3921_v5 }
 0x726   :  { %v1823_v55 = vsel %vm1441_vm2, %v1813_v46, 0.0 }
 0x727   :  { %v1824_v14 = vadd.f32 %v1823_v55, %v1822_v32  ;;  %v1807_v30 = vpop.f32.mrf.mxu3 }
 0x728   :  { %v1817_v36 = vmul.f32 %v1807_v30, %v3903_v11 }
 0x729   :  { %v1825_v3 = vrot.slane %v1824_v14, 4 }
 0x72a   :  { %v1836_v4 = vsel %vm1441_vm2, %v1817_v36, 0.0 }
 0x72b   :  { %v1826_v12 = vadd.f32 %v1825_v3, %v1824_v14  ;;  %v1837_v16 = vadd.f32 %v1836_v4, %v1835_v35 }
 0x72d   :  { %v1827_v63 = vrot.slane %v1826_v12, 2  ;;  %v1838_v49 = vrot.slane %v1837_v16, 4 }
 0x72f   :  { %v1828_v0 = vadd.f32 %v1827_v63, %v1826_v12  ;;  %v1839_v57 = vadd.f32 %v1838_v49, %v1837_v16 }
 0x731   :  { %v1829_v1 = vrot.slane %v1828_v0, 1  ;;  %v1840_v59 = vrot.slane %v1839_v57, 2 }
 0x733   :  { %v1841_v19 = vadd.f32 %v1840_v59, %v1839_v57  ;;  %v1830_v28 = vadd.f32 %v1829_v1, %v1828_v0 }
 0x735   :  { %v1842_v23 = vrot.slane %v1841_v19, 1  ;;  %v1844_v2 = vmul.f32 %v1830_v28, %v1830_v28 }
 0x737   :  { %v1843_v31 = vadd.f32 %v1842_v23, %v1841_v19 }
 0x739   :  { %v1845_v13 = vmul.f32 %v1843_v31, %v1843_v31 }
 0x73b   :  { %v1848_v33 = vsel %vm1476_vm4, %v1845_v13, %v1844_v2 }
 0x73c   :  { %2535 = vmatmul.msk.f32.vlgmr.msra.gmra.mxu0 %vm1435_vm1, %v1848_v33 }
 0x73d   :  { %2304 = vmatpush.msra.mxu0 %v3797_v47 }
 0x73f   :  { %2305 = vmatpush.msra.mxu0 %v3810_v44 }
 0x741   :  { %2306 = vmatpush.msra.mxu0 %v3815_v15 }
 0x743   :  { %2307 = vmatpush.msra.mxu0 %v3828_v54 }
 0x745   :  { %2308 = vmatpush.msra.mxu0 %v3839_v62 }
 0x747   :  { %2309 = vmatpush.msra.mxu0 %v3850_v17 }
 0x749   :  { %2310 = vmatpush.msra.mxu0 %v3865_v20 }
 0x74b   :  { %2311 = vmatpush.msra.mxu0 %v3877_v51 }
 0x7b9   :  { %v1868_v6 = vpop.f32.mrf.mxu0 }
 0x7ba   :  { %2537 = vmatmul.msk.f32.vlgmr.msra.gmra.mxu1 %vm1500_vm6, %v1868_v6 }
 0x837   :  { %v1891_v9 = vpop.f32.mrf.mxu1 }
 0x838   :  { %v1894_v39 = vadd.f32 1e-08, %v1891_v9  ;;  %v1906_v15 = vadd.f32 1.0, %v1891_v9 }
 0x83a   :  { %2659 = vrsqrt.f32 %v1894_v39  ;;  %vm1901_vm12 = vweird.f32 %v1894_v39 }
 0x83b   :  { %2661 = vrcp.f32 %v1906_v15 }
 0x840   :  { %v2660_v47 = vpop.eup %2659 }
 0x841   :  { %v1896_v44 = vmul.f32 %v2660_v47, %v1894_v39  ;;  %vm1902_vm11 = vweird.f32 %v2660_v47  ;;  %v2662_v51 = vpop.eup %2661 }
 0x842   :  { %vm1903_vm13 = vmor %vm1901_vm12, %vm1902_vm11 }
 0x843   :  { %v1897_v37 = vmul.f32 %v2660_v47, %v1896_v44 }
 0x845   :  { %v1898_v42 = vmul.f32 0.5, %v1897_v37 }
 0x847   :  { %v1899_v54 = vsub.f32 1.5, %v1898_v42 }
 0x849   :  { %v1900_v62 = vmul.f32 %v2660_v47, %v1899_v54 }
 0x84b   :  { %v1904_v17 = vsel %vm1903_vm13, %v2660_v47, %v1900_v62 }
 0x84c   :  { %v1905_v20 = vmul.f32 %v1904_v17, %v1891_v9 }
 0x84e   :  { %v1908_v60 = vmul.f32 %v2662_v51, %v1905_v20 }
 0x850   :  { %v1910_v40 = vrot.slane %v1908_v60, 1  ;;  %v1913_v43 = vmul.f32 %v1908_v60, %v1830_v28 }
 0x852   :  { %v1914_v7 = vmul.f32 %v1910_v40, %v1843_v31  ;;  %v1915_v53 = vperm.slane %v1913_v43, 0 }
 0x854   :  { %v1916_v27 = vperm.slane %v1914_v7, 0  ;;  %v1917_v45 = vmul.f32 %v1915_v53, %v3698_v58  ;;  %v1918_v46 = vmul.f32 %v1915_v53, %v3751_v38  ;;  %v1919_v41 = vmul.f32 %v1915_v53, %v3907_v22 }
 0x855   :  { %v1920_v55 = vmul.f32 %v1915_v53, %v3921_v5 }
 0x856   :  { %2538 = vmatmul.msk.f32.vlgmr.msra.gmra.mxu2 %vm1435_vm1, %v1917_v45  ;;  %v1921_v29 = vmul.f32 %v1916_v27, %v3708_v25  ;;  %v1922_v32 = vmul.f32 %v1916_v27, %v3761_v10  ;;  %v1923_v50 = vmul.f32 %v1916_v27, %v3872_v34  ;;  %v1924_v56 = vmul.f32 %v1916_v27, %v3903_v11 }
 0x858   :  { %2542 = vmatmul.msk.f32.vlgmr.msra.gmra.mxu3 %vm1435_vm1, %v1921_v29 }
 0x85e   :  { %2539 = vmatmul.msk.f32.gmra.mxu2 %vm1435_vm1, %v1918_v46 }
 0x860   :  { %2543 = vmatmul.msk.f32.gmra.mxu3 %vm1435_vm1, %v1922_v32 }
 0x866   :  { %2540 = vmatmul.msk.f32.gmra.mxu2 %vm1435_vm1, %v1919_v41 }
 0x868   :  { %2544 = vmatmul.msk.f32.gmra.mxu3 %vm1435_vm1, %v1923_v50 }
 0x86e   :  { %2541 = vmatmul.msk.f32.gmra.mxu2 %vm1435_vm1, %v1920_v55 }
 0x870   :  { %2545 = vmatmul.msk.f32.gmra.mxu3 %vm1435_vm1, %v1924_v56 }
 0x8d9   :  { %v1954_v14 = vpop.f32.mrf.mxu2 }
 0x8da   :  { %v2007_v16 = vadd.f32 %v1954_v14, %v3980_v48 }
 0x8db   :  { %v1995_v30 = vpop.f32.mrf.mxu3 }
 0x8dc   :  { %v2011_v57 = vadd.f32 %v1995_v30, %v3982_v61  ;;  %v2015_v28 = vsel %vm1500_vm6, %v2007_v16, -inf }
 0x8de   :  { %v2028_v61 = vsel %vm1500_vm6, %v2011_v57, -inf }
 0x8e1   :  { %v1957_v36 = vpop.f32.mrf.mxu2 }
 0x8e2   :  { %v2008_v63 = vadd.f32 %v1957_v36, %v3984_v18 }
 0x8e3   :  { %v1998_v35 = vpop.f32.mrf.mxu3 }
 0x8e4   :  { %v2012_v1 = vadd.f32 %v1998_v35, %v3986_v24 }
 0x8e6   :  { %v2029_v24 = vsel %vm1500_vm6, %v2012_v1, -inf }
 0x8e9   :  { %v1960_v3 = vpop.f32.mrf.mxu2 }
 0x8ea   :  { %v2009_v12 = vadd.f32 %v1960_v3, %v3988_v8  ;;  %v2016_v8 = vsel %vm1500_vm6, %v2008_v63, -inf }
 0x8eb   :  { %v2001_v4 = vpop.f32.mrf.mxu3 }
 0x8ec   :  { %v2013_v49 = vadd.f32 %v2001_v4, %v3990_v26  ;;  %v2017_v59 = vsel %vm1500_vm6, %v2009_v12, -inf }
 0x8ed   :  { %v2018_v31 = vmax.f32 %v2015_v28, %v2017_v59 }
 0x8ee   :  { %v2030_v48 = vsel %vm1500_vm6, %v2013_v49, -inf }
 0x8f1   :  { %v1963_v0 = vpop.f32.mrf.mxu2 }
 0x8f2   :  { %v2010_v19 = vadd.f32 %v1963_v0, %v3994_v21  ;;  %v2031_v21 = vmax.f32 %v2028_v61, %v2030_v48 }
 0x8f3   :  { %v2004_v23 = vpop.f32.mrf.mxu3 }
 0x8f4   :  { %v2019_v18 = vsel %vm1645_vm10, %v2010_v19, -inf  ;;  %v2014_v26 = vadd.f32 %v2004_v23, %v4004_v52 }
 0x8f5   :  { %v2020_v2 = vmax.f32 %v2016_v8, %v2019_v18 }
 0x8f6   :  { %v2032_v13 = vsel %vm1645_vm10, %v2014_v26, -inf }
 0x8f7   :  { %v2021_v33 = vmax.f32 %v2018_v31, %v2020_v2  ;;  %v2033_v6 = vmax.f32 %v2029_v24, %v2032_v13 }
 0x8f9   :  { %v2022_v9 = vrot.slane %v2021_v33, 4  ;;  %v2034_v39 = vmax.f32 %v2031_v21, %v2033_v6 }
 0x8fb   :  { %v2023_v47 = vmax.f32 %v2021_v33, %v2022_v9  ;;  %v2035_v44 = vrot.slane %v2034_v39, 4 }
 0x8fd   :  { %v2024_v37 = vrot.slane %v2023_v47, 2  ;;  %v2036_v15 = vmax.f32 %v2034_v39, %v2035_v44 }
 0x8ff   :  { %v2025_v42 = vmax.f32 %v2023_v47, %v2024_v37  ;;  %v2037_v54 = vrot.slane %v2036_v15, 2 }
 0x901   :  { %v2026_v52 = vrot.slane %v2025_v42, 1  ;;  %v2038_v62 = vmax.f32 %v2036_v15, %v2037_v54 }
 0x903   :  { %v2027_v17 = vmax.f32 %v2025_v42, %v2026_v52  ;;  %v2039_v20 = vrot.slane %v2038_v62, 1 }
 0x905   :  { %v2041_v51 = vsub.f32 %v2007_v16, %v2027_v17  ;;  %v2042_v60 = vsub.f32 %v2008_v63, %v2027_v17  ;;  %v2043_v40 = vsub.f32 %v2009_v12, %v2027_v17  ;;  %v2044_v43 = vsub.f32 %v2010_v19, %v2027_v17 }
 0x906   :  { %v2040_v7 = vmax.f32 %v2038_v62, %v2039_v20 }
 0x907   :  { %v2049_v53 = vmul.f32 1.442695, %v2041_v51  ;;  %v2051_v27 = vmul.f32 1.442695, %v2042_v60  ;;  %v2053_v45 = vmul.f32 1.442695, %v2043_v40 }
 0x908   :  { %v2055_v29 = vmul.f32 1.442695, %v2044_v43  ;;  %v2045_v46 = vsub.f32 %v2011_v57, %v2040_v7  ;;  %v2046_v32 = vsub.f32 %v2012_v1, %v2040_v7  ;;  %v2047_v41 = vsub.f32 %v2013_v49, %v2040_v7 }
 0x909   :  { %2663 = vpow2.f32 %v2049_v53  ;;  %v2048_v50 = vsub.f32 %v2014_v26, %v2040_v7 }
 0x90a   :  { %2665 = vpow2.f32 %v2051_v27  ;;  %v2057_v55 = vmul.f32 1.442695, %v2045_v46  ;;  %v2059_v56 = vmul.f32 1.442695, %v2046_v32  ;;  %v2061_v14 = vmul.f32 1.442695, %v2047_v41 }
 0x90b   :  { %2667 = vpow2.f32 %v2053_v45  ;;  %v2063_v30 = vmul.f32 1.442695, %v2048_v50 }
 0x90c   :  { %2669 = vpow2.f32 %v2055_v29 }
 0x90d   :  { %2671 = vpow2.f32 %v2057_v55 }
 0x90e   :  { %2673 = vpow2.f32 %v2059_v56 }
 0x90f   :  { %v2664_v36 = vpop.eup %2663  ;;  %2675 = vpow2.f32 %v2061_v14 }
 0x910   :  { %v2666_v35 = vpop.eup %2665  ;;  %v2065_v3 = vsel %vm1500_vm6, %v2664_v36, 0.0  ;;  %2677 = vpow2.f32 %v2063_v30 }
 0x911   :  { %v2668_v4 = vpop.eup %2667  ;;  %v2066_v12 = vsel %vm1500_vm6, %v2666_v35, 0.0 }
 0x912   :  { %v2670_v16 = vpop.eup %2669  ;;  %v2067_v63 = vadd.f32 %v2066_v12, %v2065_v3  ;;  %v2068_v0 = vsel %vm1500_vm6, %v2668_v4, 0.0 }
 0x913   :  { %v2672_v49 = vpop.eup %2671  ;;  %v2070_v28 = vsel %vm1645_vm10, %v2670_v16, 0.0 }
 0x914   :  { %v2674_v57 = vpop.eup %2673  ;;  %v2069_v1 = vadd.f32 %v2068_v0, %v2067_v63  ;;  %v2078_v59 = vsel %vm1500_vm6, %v2672_v49, 0.0 }
 0x915   :  { %v2676_v19 = vpop.eup %2675  ;;  %v2079_v23 = vsel %vm1500_vm6, %v2674_v57, 0.0 }
 0x916   :  { %v2678_v8 = vpop.eup %2677  ;;  %v2071_v48 = vadd.f32 %v2070_v28, %v2069_v1  ;;  %v2080_v18 = vadd.f32 %v2079_v23, %v2078_v59  ;;  %v2081_v26 = vsel %vm1500_vm6, %v2676_v19, 0.0 }
 0x917   :  { %v2083_v61 = vsel %vm1645_vm10, %v2678_v8, 0.0 }
 0x918   :  { %v2072_v31 = vrot.slane %v2071_v48, 4  ;;  %v2082_v2 = vadd.f32 %v2081_v26, %v2080_v18 }
 0x91a   :  { %v2073_v24 = vadd.f32 %v2072_v31, %v2071_v48  ;;  %v2084_v13 = vadd.f32 %v2083_v61, %v2082_v2 }
 0x91c   :  { %v2074_v21 = vrot.slane %v2073_v24, 2  ;;  %v2085_v33 = vrot.slane %v2084_v13, 4 }
 0x91e   :  { %v2075_v6 = vadd.f32 %v2074_v21, %v2073_v24  ;;  %v2086_v9 = vadd.f32 %v2085_v33, %v2084_v13 }
 0x920   :  { %v2076_v39 = vrot.slane %v2075_v6, 1  ;;  %v2087_v47 = vrot.slane %v2086_v9, 2 }
 0x922   :  { %v2077_v44 = vadd.f32 %v2076_v39, %v2075_v6  ;;  %v2088_v37 = vadd.f32 %v2087_v47, %v2086_v9 }
 0x924   :  { %2679 = vrcp.f32 %v2077_v44  ;;  %v2089_v15 = vrot.slane %v2088_v37, 1 }
 0x926   :  { %v2090_v42 = vadd.f32 %v2089_v15, %v2088_v37 }
 0x928   :  { %2681 = vrcp.f32 %v2090_v42 }
 0x92a   :  { %v2680_v54 = vpop.eup %2679 }
 0x92b   :  { %v2093_v52 = vmul.f32 %v2680_v54, %v2664_v36  ;;  %v2094_v20 = vmul.f32 %v2680_v54, %v2666_v35  ;;  %v2095_v60 = vmul.f32 %v2680_v54, %v2668_v4  ;;  %v2096_v43 = vmul.f32 %v2680_v54, %v2670_v16 }
 0x92d   :  { %2547 = vmatmul.msk.f32.vlgmr.msrb.gmra.mxu0 %vm1500_vm6, %v2093_v52 }
 0x92e   :  { %v2682_v62 = vpop.eup %2681 }
 0x92f   :  { %v2097_v17 = vmul.f32 %v2682_v62, %v2672_v49  ;;  %v2098_v51 = vmul.f32 %v2682_v62, %v2674_v57  ;;  %v2099_v40 = vmul.f32 %v2682_v62, %v2676_v19  ;;  %v2100_v7 = vmul.f32 %v2682_v62, %v2678_v8 }
 0x931   :  { %2552 = vmatmul.msk.f32.vlgmr.msrb.gmra.mxu1 %vm1500_vm6, %v2097_v17 }
 0x935   :  { %2548 = vmatmul.msk.f32.gmra.mxu0 %vm1500_vm6, %v2094_v20 }
 0x939   :  { %2553 = vmatmul.msk.f32.gmra.mxu1 %vm1500_vm6, %v2098_v51 }
 0x93d   :  { %2549 = vmatmul.msk.f32.gmra.mxu0 %vm1500_vm6, %v2095_v60 }
 0x941   :  { %2554 = vmatmul.msk.f32.gmra.mxu1 %vm1500_vm6, %v2099_v40 }
 0x945   :  { %2550 = vmatmul.msk.f32.gmra.mxu0 %vm1500_vm6, %v2096_v43 }
 0x949   :  { %2555 = vmatmul.msk.f32.gmra.mxu1 %vm1500_vm6, %v2100_v7 }
 0x9aa   :  { %v2130_v53 = vpop.f32.mrf.mxu0 }
 0x9ab   :  { %v2183_v41 = vmul.f32 %v2130_v53, %v3698_v58 }
 0x9ad   :  { %v2191_v30 = vsel %vm1435_vm1, %v2183_v41, 0.0 }
 0x9ae   :  { %v2171_v27 = vpop.f32.mrf.mxu1 }
 0x9af   :  { %v2187_v36 = vmul.f32 %v2171_v27, %v3708_v25 }
 0x9b1   :  { %v2204_v16 = vsel %vm1435_vm1, %v2187_v36, 0.0 }
 0x9b2   :  { %v2133_v45 = vpop.f32.mrf.mxu0 }
 0x9b3   :  { %v2184_v32 = vmul.f32 %v2133_v45, %v3751_v38 }
 0x9b5   :  { %v2192_v56 = vsel %vm1435_vm1, %v2184_v32, 0.0 }
 0x9b6   :  { %v2174_v29 = vpop.f32.mrf.mxu1  ;;  %v2193_v4 = vadd.f32 %v2192_v56, %v2191_v30 }
 0x9b7   :  { %v2188_v14 = vmul.f32 %v2174_v29, %v3761_v10 }
 0x9b9   :  { %v2205_v38 = vsel %vm1435_vm1, %v2188_v14, 0.0 }
 0x9ba   :  { %v2136_v46 = vpop.f32.mrf.mxu0  ;;  %v2206_v49 = vadd.f32 %v2205_v38, %v2204_v16 }
 0x9bb   :  { %v2185_v50 = vmul.f32 %v2136_v46, %v3907_v22 }
 0x9bd   :  { %v2194_v35 = vsel %vm1435_vm1, %v2185_v50, 0.0 }
 0x9be   :  { %v2177_v55 = vpop.f32.mrf.mxu1  ;;  %v2195_v22 = vadd.f32 %v2194_v35, %v2193_v4 }
 0x9bf   :  { %v2189_v3 = vmul.f32 %v2177_v55, %v3872_v34 }
 0x9c1   :  { %v2207_v63 = vsel %vm1435_vm1, %v2189_v3, 0.0 }
 0x9c2   :  { %v2139_v12 = vpop.f32.mrf.mxu0  ;;  %v2208_v1 = vadd.f32 %v2207_v63, %v2206_v49 }
 0x9c3   :  { %v2186_v58 = vmul.f32 %v2139_v12, %v3921_v5 }
 0x9c5   :  { %v2196_v10 = vsel %vm1441_vm2, %v2186_v58, 0.0 }
 0x9c6   :  { %v2197_v0 = vadd.f32 %v2196_v10, %v2195_v22  ;;  %v2180_v25 = vpop.f32.mrf.mxu1 }
 0x9c7   :  { %v2190_v57 = vmul.f32 %v2180_v25, %v3903_v11 }
 0x9c8   :  { %v2198_v34 = vrot.slane %v2197_v0, 4 }
 0x9c9   :  { %v2209_v59 = vsel %vm1441_vm2, %v2190_v57, 0.0  ;;  %vm2316_vm2 = vcmask 25600  }
 0x9ca   :  { %v2199_v19 = vadd.f32 %v2198_v34, %v2197_v0  ;;  %v2210_v28 = vadd.f32 %v2209_v59, %v2208_v1 }
 0x9cc   :  { %v2200_v23 = vrot.slane %v2199_v19, 2  ;;  %v2211_v5 = vrot.slane %v2210_v28, 4 }
 0x9ce   :  { %v2201_v8 = vadd.f32 %v2200_v23, %v2199_v19  ;;  %v2212_v48 = vadd.f32 %v2211_v5, %v2210_v28 }
 0x9d0   :  { %v2202_v18 = vrot.slane %v2201_v8, 1  ;;  %v2213_v26 = vrot.slane %v2212_v48, 2 }
 0x9d2   :  { %v2214_v31 = vadd.f32 %v2213_v26, %v2212_v48  ;;  %v2203_v2 = vadd.f32 %v2202_v18, %v2201_v8 }
 0x9d4   :  { %v2215_v61 = vrot.slane %v2214_v31, 1  ;;  %v2217_v13 = vmul.f32 %v2203_v2, %v2203_v2 }
 0x9d6   :  { %v2216_v24 = vadd.f32 %v2215_v61, %v2214_v31 }
 0x9d8   :  { %v2218_v21 = vmul.f32 %v2216_v24, %v2216_v24 }
 0x9da   :  { %v2221_v11 = vsel %vm1476_vm4, %v2218_v21, %v2217_v13 }
 0x9db   :  { %2556 = vmatmul.msk.f32.vlgmr.msrb.gmra.mxu2 %vm1435_vm1, %v2221_v11 }
 0xa5e   :  { %v2241_v33 = vpop.f32.mrf.mxu2 }
 0xa5f   :  { %2558 = vmatmul.msk.f32.vlgmr.msrb.gmra.mxu3 %vm1500_vm6, %v2241_v33 }
 0xae2   :  { %v2264_v6 = vpop.f32.mrf.mxu3 }
 0xae3   :  { %v2267_v9 = vadd.f32 1e-08, %v2264_v6  ;;  %v2279_v37 = vadd.f32 1.0, %v2264_v6 }
 0xae5   :  { %2683 = vrsqrt.f32 %v2267_v9  ;;  %vm2274_vm15 = vweird.f32 %v2267_v9 }
 0xae6   :  { %2685 = vrcp.f32 %v2279_v37 }
 0xaeb   :  { %v2684_v39 = vpop.eup %2683 }
 0xaec   :  { %v2269_v47 = vmul.f32 %v2684_v39, %v2267_v9  ;;  %vm2275_vm14 = vweird.f32 %v2684_v39  ;;  %v2686_v17 = vpop.eup %2685 }
 0xaed   :  { %vm2276_vm0 = vmor %vm2274_vm15, %vm2275_vm14 }
 0xaee   :  { %v2270_v44 = vmul.f32 %v2684_v39, %v2269_v47 }
 0xaf0   :  { %v2271_v15 = vmul.f32 0.5, %v2270_v44 }
 0xaf2   :  { %v2272_v42 = vsub.f32 1.5, %v2271_v15 }
 0xaf4   :  { %v2273_v54 = vmul.f32 %v2684_v39, %v2272_v42 }
 0xaf6   :  { %v2277_v52 = vsel %vm2276_vm0, %v2684_v39, %v2273_v54 }
 0xaf7   :  { %v2278_v62 = vmul.f32 %v2277_v52, %v2264_v6 }
 0xaf9   :  { %v2281_v20 = vmul.f32 %v2686_v17, %v2278_v62 }
 0xafb   :  { %v2283_v51 = vrot.slane %v2281_v20, 1  ;;  %v2286_v60 = vmul.f32 %v2281_v20, %v2203_v2 }
 0xafd   :  { %v2287_v40 = vmul.f32 %v2283_v51, %v2216_v24  ;;  %v2288_v7 = vmul.f32 %v2286_v60, %v2286_v60 }
 0xaff   :  { %v2289_v43 = vmul.f32 %v2287_v40, %v2287_v40 }
 0xb01   :  { %v2292_v53 = vrot.slane %v2289_v43, 7 }
 0xb03   :  { %v2293_v27 = vsel %vm1476_vm4, %v2292_v53, %v2288_v7 }
 0xb04   :  { %2559 = vmatmul.msk.f32.vlgmr.msra.gmra.mxu0 %vm1435_vm1, %v2293_v27 }
 0xb81   :  { %v2313_v45 = vpop.f32.mrf.mxu0 }
 0xb82   :  { %2317 = vst.msk [vmem:[#allocation2] sm:$0x3] %vm2316_vm2, %v2313_v45 }
 0xb83   :  { %2328 = dma.vmem_to_hbm [thread:$0]  %s2324_s19, 32, %s2326_s21, [#allocation3]  }
 0xb84   :  { %2711 = dma.done.wait [#allocation3], 32  }
 0xb85   :  { %2712 = vsyncadd [#allocation3], 4294967264 }
 0xb86   :  { %2333 = vsyncpa [#allocation3], 1 }

</bundles_post_ra>
